<compile_context>
chip_gen: v7x
topology: tpu7x:2x2x1
jax: 0.10.0
libtpu: 0.0.40
codegen_flags: <defaults>
</compile_context>

<pallas_src>
import jax
import jax.numpy as jnp
from jax.experimental import pallas as pl
from jax.experimental.pallas import tpu as pltpu

INPUT_SIZE = 1024
HIDDEN_SIZE = 512
OUTPUT_SIZE = 7
OUT_PAD = 128  # lane-dense padded output width

# Config tags proven unsupported on this runtime (so we don't retry each call).
_UNSUPPORTED_CONFIGS = set()


def _qnet_kernel(x_ref, w1_ref, b1_ref, w2_ref, b2_ref,
                 w3_ref, b3_ref, w4_ref, b4_ref, o_ref):
    """Fused 4-layer MLP: (Linear+ReLU) x3 -> Linear; bf16 MXU, f32 accumulate."""
    # Layer 1: Linear(input_size -> hidden) + ReLU.  x may already be bf16
    # (producer-side cast); astype is then a no-op.
    h = jnp.dot(x_ref[...].astype(jnp.bfloat16), w1_ref[...],
                preferred_element_type=jnp.float32)
    h = jnp.maximum(h + b1_ref[...], 0.0)
    # Layer 2: Linear(hidden -> hidden) + ReLU.
    h = jnp.dot(h.astype(jnp.bfloat16), w2_ref[...],
                preferred_element_type=jnp.float32)
    h = jnp.maximum(h + b2_ref[...], 0.0)
    # Layer 3: Linear(hidden -> hidden // 2) + ReLU.
    h = jnp.dot(h.astype(jnp.bfloat16), w3_ref[...],
                preferred_element_type=jnp.float32)
    h = jnp.maximum(h + b3_ref[...], 0.0)
    # Layer 4: Linear(hidden // 2 -> 128-padded output), no activation.
    o = jnp.dot(h.astype(jnp.bfloat16), w4_ref[...],
                preferred_element_type=jnp.float32)
    o_ref[...] = (o + b4_ref[...]).astype(o_ref.dtype)  # lane-dense full-tile store


def _is_multi_core_tc():
    """True on chips with >1 TensorCore (v7x), where CORE_PARALLEL pays off."""
    try:
        kind = jax.devices()[0].device_kind.lower()
    except Exception:
        return False
    return ("v7" in kind) or ("tpu7" in kind)


def _make_call(tm, pad_b, in_size, out_pad, param_shapes, dim_sem,
               weight_buffers, vmem_limit_bytes, cost_estimate):
    grid = (pad_b // tm,)
    resident = lambda i: (0, 0)  # weights/biases stay put across batch tiles

    def wspec(shape):
        if weight_buffers is None:
            return pl.BlockSpec(shape, resident)
        # Constant index_map -> a second pipeline buffer is pure waste.
        return pl.BlockSpec(shape, resident,
                            pipeline_mode=pl.Buffered(weight_buffers))

    in_specs = [pl.BlockSpec((tm, in_size), lambda i: (i, 0))]  # x tile (streamed)
    for shp in param_shapes:
        in_specs.append(wspec(shp))

    return pl.pallas_call(
        _qnet_kernel,
        out_shape=jax.ShapeDtypeStruct((pad_b, out_pad), jnp.float32),
        grid=grid,
        in_specs=in_specs,
        out_specs=pl.BlockSpec((tm, out_pad), lambda i: (i, 0)),
        compiler_params=pltpu.CompilerParams(
            dimension_semantics=(dim_sem,),
            vmem_limit_bytes=vmem_limit_bytes,
        ),
        cost_estimate=cost_estimate,
    )


def qnetwork_forward(x, params, out_size=OUTPUT_SIZE):
    """Fused MLP forward.
    x: (B, input_size) or (input_size,), f32 or bf16 (bf16 preferred from the
       producer: halves the dominant activation DMA at large batch on v6e).
    params: list of (weight_bf16 (in,out), bias_f32 (1,out)); last layer is
       pre-padded to OUT_PAD output lanes.
    Returns (B, out_size) float32.
    """
    if x.ndim == 1:
        x = x[None, :]  # mirrors torch's unsqueeze(0)
    if not jnp.issubdtype(x.dtype, jnp.floating):
        x = x.astype(jnp.float32)
    (w1, b1), (w2, b2), (w3, b3), (w4, b4) = params
    batch, in_size = x.shape
    out_pad = w4.shape[1]

    # Batch tiling: 256-row tiles at large batch (amortizes the ~0.35 us/step
    # pipeline overhead, matches the 256-wide MXU on v6e/v7x); tiny batches
    # become a single 8-sublane-aligned tile (one grid step).
    if batch <= 256:
        tm = max(8, ((batch + 7) // 8) * 8)
    else:
        tm = 256

    multi_core = _is_multi_core_tc()
    # On v7x keep an even number of batch tiles so both TensorCores get work.
    align = 2 * tm if (multi_core and batch > tm) else tm
    pad_b = ((batch + align - 1) // align) * align
    if pad_b != batch:
        x = jnp.pad(x, ((0, pad_b - batch), (0, 0)))
    n_tiles = pad_b // tm

    # Advisory cost estimate (FLOPs on the real, unpadded network).
    flops = 2 * batch * (INPUT_SIZE * HIDDEN_SIZE
                         + HIDDEN_SIZE * HIDDEN_SIZE
                         + HIDDEN_SIZE * (HIDDEN_SIZE // 2)
                         + (HIDDEN_SIZE // 2) * out_size)
    weight_bytes = sum(int(w.size) * w.dtype.itemsize + int(b.size) * b.dtype.itemsize
                       for (w, b) in params)
    bytes_accessed = weight_bytes + int(x.size) * x.dtype.itemsize + pad_b * out_pad * 4
    cost = pl.CostEstimate(flops=flops, transcendentals=0,
                           bytes_accessed=bytes_accessed)

    def vmem_budget(weight_buffers):
        w_mult = 1 if weight_buffers == 1 else 2
        need = (2 * tm * in_size * x.dtype.itemsize      # double-buffered x tile
                + w_mult * weight_bytes                  # resident weights/biases
                + 2 * tm * out_pad * 4                   # double-buffered out tile
                + 2 * tm * HIDDEN_SIZE * 4)              # f32 activations in flight
        # Generous headroom, but <=28 MiB so v7x (64 MiB physical) keeps slack.
        return int(min(max(2 * need, 16 << 20), 28 << 20))

    param_shapes = [w1.shape, b1.shape, w2.shape, b2.shape,
                    w3.shape, b3.shape, w4.shape, b4.shape]
    args = (x, w1, b1, w2, b2, w3, b3, w4, b4)

    # Config ladder: most aggressive first; fall back gracefully so a runtime
    # lacking CORE_PARALLEL / Buffered(1) support still runs clean.
    configs = []
    if (multi_core and n_tiles >= 2 and n_tiles % 2 == 0
            and hasattr(pltpu, "CORE_PARALLEL")):
        configs.append(("core_parallel+buffered1", pltpu.CORE_PARALLEL, 1))
    configs.append(("parallel+buffered1", "parallel", 1))
    configs.append(("parallel+default", "parallel", None))  # previously-validated baseline

    last_err = None
    for idx, (tag, dim_sem, wbuf) in enumerate(configs):
        is_last = idx == len(configs) - 1
        if tag in _UNSUPPORTED_CONFIGS and not is_last:
            continue
        try:
            call = _make_call(tm, pad_b, in_size, out_pad, param_shapes,
                              dim_sem, wbuf, vmem_budget(wbuf), cost)
            out = call(*args)
            return out[:batch, :out_size]
        except Exception as e:  # fall back to a safer config
            _UNSUPPORTED_CONFIGS.add(tag)
            last_err = e
            if is_last:
                raise
    raise last_err if last_err is not None else RuntimeError("no kernel config tried")


def init_params(key, input_size=INPUT_SIZE, hidden_size=HIDDEN_SIZE,
                output_size=OUTPUT_SIZE, out_pad=OUT_PAD):
    """Kaiming-normal (fan_in, relu gain) weights, zero biases — matches
    QNetwork._init_weights.  Weights stored as (in, out) bf16; biases (1, out)
    f32.  The last layer is zero-padded to `out_pad` output lanes."""
    dims = [(input_size, hidden_size),
            (hidden_size, hidden_size),
            (hidden_size, hidden_size // 2),
            (hidden_size // 2, output_size)]
    params = []
    for li, (fan_in, fan_out) in enumerate(dims):
        key, sub = jax.random.split(key)
        std = jnp.sqrt(2.0 / fan_in)  # kaiming_normal_, nonlinearity='relu'
        w = std * jax.random.normal(sub, (fan_in, fan_out), dtype=jnp.float32)
        b = jnp.zeros((1, fan_out), dtype=jnp.float32)
        if li == len(dims) - 1 and fan_out < out_pad:
            w = jnp.pad(w, ((0, 0), (0, out_pad - fan_out)))
            b = jnp.pad(b, ((0, 0), (0, out_pad - fan_out)))
        params.append((w.astype(jnp.bfloat16), b))
    return params


def qnetwork_reference(x, params, out_size=OUTPUT_SIZE):
    """Plain-JAX reference mirroring the kernel's bf16-weight / f32-accumulate
    numerics, for a tight correctness check."""
    if x.ndim == 1:
        x = x[None, :]
    (w1, b1), (w2, b2), (w3, b3), (w4, b4) = params

    def lin(h, w, b):
        return jnp.dot(h.astype(jnp.bfloat16), w,
                       preferred_element_type=jnp.float32) + b

    h = jnp.maximum(lin(x, w1, b1), 0.0)
    h = jnp.maximum(lin(h, w2, b2), 0.0)
    h = jnp.maximum(lin(h, w3, b3), 0.0)
    return lin(h, w4, b4)[:, :out_size]


if __name__ == "__main__":
    key = jax.random.PRNGKey(0)
    k_params, k_x = jax.random.split(key)
    params = init_params(k_params, INPUT_SIZE, HIDDEN_SIZE, OUTPUT_SIZE)

    # Small-batch acting-loop case (batch=2); producer supplies bf16 activations.
    BATCH = 2
    x = jax.random.normal(k_x, (BATCH, INPUT_SIZE),
                          dtype=jnp.float32).astype(jnp.bfloat16)
    out = jax.block_until_ready(qnetwork_forward(x, params))
    ref = qnetwork_reference(x, params)
    assert out.shape == (BATCH, OUTPUT_SIZE), out.shape
    assert jnp.allclose(out, ref, atol=1e-2, rtol=1e-2), "mismatch vs reference (batch=2)"
    assert bool(jnp.all(jnp.isfinite(out))), "non-finite outputs"

    # Multi-tile path (256-row batch tiles; even tile count for v7x CORE_PARALLEL).
    BATCH_LG = 384
    k_x2 = jax.random.fold_in(k_x, 1)
    x_lg = jax.random.normal(k_x2, (BATCH_LG, INPUT_SIZE),
                             dtype=jnp.float32).astype(jnp.bfloat16)
    out_lg = jax.block_until_ready(qnetwork_forward(x_lg, params))
    ref_lg = qnetwork_reference(x_lg, params)
    assert out_lg.shape == (BATCH_LG, OUTPUT_SIZE), out_lg.shape
    assert jnp.allclose(out_lg, ref_lg, atol=1e-2, rtol=1e-2), "mismatch vs reference (batch=384)"

    print("KERNEL_OK")
</pallas_src>

<mosaic_0001>
module attributes {stable_mosaic.version = 11 : i64} {
  func.func @_qnet_kernel(%arg0: i32, %arg1: memref<8x1024xbf16, #tpu.memory_space<vmem>>, %arg2: memref<1024x512xbf16, #tpu.memory_space<vmem>>, %arg3: memref<1x512xf32, #tpu.memory_space<vmem>>, %arg4: memref<512x512xbf16, #tpu.memory_space<vmem>>, %arg5: memref<1x512xf32, #tpu.memory_space<vmem>>, %arg6: memref<512x256xbf16, #tpu.memory_space<vmem>>, %arg7: memref<1x256xf32, #tpu.memory_space<vmem>>, %arg8: memref<256x128xbf16, #tpu.memory_space<vmem>>, %arg9: memref<1x128xf32, #tpu.memory_space<vmem>>, %arg10: memref<8x128xf32, #tpu.memory_space<vmem>>) attributes {dimension_semantics = [#tpu.dimension_semantics<parallel>], iteration_bounds = array<i64: 1>, scalar_prefetch = 0 : i64, scratch_operands = 0 : i64, tpu.core_type = #tpu.core_type<tc>, window_params = [{transform_indices = @transform_0, window_bounds = array<i64: 8, 1024>}, {pipeline_mode = #tpu.pipeline_mode<synchronous>, transform_indices = @transform_1, window_bounds = array<i64: 1024, 512>}, {pipeline_mode = #tpu.pipeline_mode<synchronous>, transform_indices = @transform_2, window_bounds = array<i64: 1, 512>}, {pipeline_mode = #tpu.pipeline_mode<synchronous>, transform_indices = @transform_3, window_bounds = array<i64: 512, 512>}, {pipeline_mode = #tpu.pipeline_mode<synchronous>, transform_indices = @transform_4, window_bounds = array<i64: 1, 512>}, {pipeline_mode = #tpu.pipeline_mode<synchronous>, transform_indices = @transform_5, window_bounds = array<i64: 512, 256>}, {pipeline_mode = #tpu.pipeline_mode<synchronous>, transform_indices = @transform_6, window_bounds = array<i64: 1, 256>}, {pipeline_mode = #tpu.pipeline_mode<synchronous>, transform_indices = @transform_7, window_bounds = array<i64: 256, 128>}, {pipeline_mode = #tpu.pipeline_mode<synchronous>, transform_indices = @transform_8, window_bounds = array<i64: 1, 128>}, {transform_indices = @transform_9, window_bounds = array<i64: 8, 128>}]} {
    %c0 = arith.constant 0 : index
    %c0_0 = arith.constant 0 : index
    %0 = vector.load %arg1[%c0, %c0_0] : memref<8x1024xbf16, #tpu.memory_space<vmem>>, vector<8x1024xbf16>
    %c0_1 = arith.constant 0 : index
    %c0_2 = arith.constant 0 : index
    %1 = vector.load %arg2[%c0_1, %c0_2] : memref<1024x512xbf16, #tpu.memory_space<vmem>>, vector<1024x512xbf16>
    %cst = arith.constant dense<0.000000e+00> : vector<8x512xf32>
    %2 = tpu.matmul %0, %1, %cst {dimension_numbers = #tpu.dot_dimension_numbers<[1], [0], [0], [1], [0, 0, 1, 1], [], []>} : vector<8x1024xbf16>, vector<1024x512xbf16>, vector<8x512xf32> -> vector<8x512xf32>
    %c0_3 = arith.constant 0 : index
    %c0_4 = arith.constant 0 : index
    %3 = vector.load %arg3[%c0_3, %c0_4] : memref<1x512xf32, #tpu.memory_space<vmem>>, vector<1x512xf32>
    %4 = vector.broadcast %3 : vector<1x512xf32> to vector<8x512xf32>
    %5 = arith.addf %2, %4 : vector<8x512xf32>
    %cst_5 = arith.constant 0.000000e+00 : f32
    %6 = vector.broadcast %cst_5 : f32 to vector<8x512xf32>
    %7 = arith.maximumf %5, %6 : vector<8x512xf32>
    %8 = arith.truncf %7 : vector<8x512xf32> to vector<8x512xbf16>
    %c0_6 = arith.constant 0 : index
    %c0_7 = arith.constant 0 : index
    %9 = vector.load %arg4[%c0_6, %c0_7] : memref<512x512xbf16, #tpu.memory_space<vmem>>, vector<512x512xbf16>
    %cst_8 = arith.constant dense<0.000000e+00> : vector<8x512xf32>
    %10 = tpu.matmul %8, %9, %cst_8 {dimension_numbers = #tpu.dot_dimension_numbers<[1], [0], [0], [1], [0, 0, 1, 1], [], []>} : vector<8x512xbf16>, vector<512x512xbf16>, vector<8x512xf32> -> vector<8x512xf32>
    %c0_9 = arith.constant 0 : index
    %c0_10 = arith.constant 0 : index
    %11 = vector.load %arg5[%c0_9, %c0_10] : memref<1x512xf32, #tpu.memory_space<vmem>>, vector<1x512xf32>
    %12 = vector.broadcast %11 : vector<1x512xf32> to vector<8x512xf32>
    %13 = arith.addf %10, %12 : vector<8x512xf32>
    %cst_11 = arith.constant 0.000000e+00 : f32
    %14 = vector.broadcast %cst_11 : f32 to vector<8x512xf32>
    %15 = arith.maximumf %13, %14 : vector<8x512xf32>
    %16 = arith.truncf %15 : vector<8x512xf32> to vector<8x512xbf16>
    %c0_12 = arith.constant 0 : index
    %c0_13 = arith.constant 0 : index
    %17 = vector.load %arg6[%c0_12, %c0_13] : memref<512x256xbf16, #tpu.memory_space<vmem>>, vector<512x256xbf16>
    %cst_14 = arith.constant dense<0.000000e+00> : vector<8x256xf32>
    %18 = tpu.matmul %16, %17, %cst_14 {dimension_numbers = #tpu.dot_dimension_numbers<[1], [0], [0], [1], [0, 0, 1, 1], [], []>} : vector<8x512xbf16>, vector<512x256xbf16>, vector<8x256xf32> -> vector<8x256xf32>
    %c0_15 = arith.constant 0 : index
    %c0_16 = arith.constant 0 : index
    %19 = vector.load %arg7[%c0_15, %c0_16] : memref<1x256xf32, #tpu.memory_space<vmem>>, vector<1x256xf32>
    %20 = vector.broadcast %19 : vector<1x256xf32> to vector<8x256xf32>
    %21 = arith.addf %18, %20 : vector<8x256xf32>
    %cst_17 = arith.constant 0.000000e+00 : f32
    %22 = vector.broadcast %cst_17 : f32 to vector<8x256xf32>
    %23 = arith.maximumf %21, %22 : vector<8x256xf32>
    %24 = arith.truncf %23 : vector<8x256xf32> to vector<8x256xbf16>
    %c0_18 = arith.constant 0 : index
    %c0_19 = arith.constant 0 : index
    %25 = vector.load %arg8[%c0_18, %c0_19] : memref<256x128xbf16, #tpu.memory_space<vmem>>, vector<256x128xbf16>
    %cst_20 = arith.constant dense<0.000000e+00> : vector<8x128xf32>
    %26 = tpu.matmul %24, %25, %cst_20 {dimension_numbers = #tpu.dot_dimension_numbers<[1], [0], [0], [1], [0, 0, 1, 1], [], []>} : vector<8x256xbf16>, vector<256x128xbf16>, vector<8x128xf32> -> vector<8x128xf32>
    %c0_21 = arith.constant 0 : index
    %c0_22 = arith.constant 0 : index
    %27 = vector.load %arg9[%c0_21, %c0_22] : memref<1x128xf32, #tpu.memory_space<vmem>>, vector<1x128xf32>
    %28 = vector.broadcast %27 : vector<1x128xf32> to vector<8x128xf32>
    %29 = arith.addf %26, %28 : vector<8x128xf32>
    %c0_23 = arith.constant 0 : index
    %c0_24 = arith.constant 0 : index
    %30 = vector.load %arg10[%c0_23, %c0_24] : memref<8x128xf32, #tpu.memory_space<vmem>>, vector<8x128xf32>
    tpu.vector_store %arg10[%c0_23, %c0_24], %29 {strides = array<i32>} : memref<8x128xf32, #tpu.memory_space<vmem>>, vector<8x128xf32>,
    return
  }
  func.func @transform_0(%arg0: i32) -> (i32, i32) {
    %c0_i32 = arith.constant 0 : i32
    %c0_i32_0 = arith.constant 0 : i32
    return %arg0, %c0_i32 : i32, i32
  }
  func.func @transform_1(%arg0: i32) -> (i32, i32) {
    %c0_i32 = arith.constant 0 : i32
    %c0_i32_0 = arith.constant 0 : i32
    %c0_i32_1 = arith.constant 0 : i32
    return %c0_i32, %c0_i32_0 : i32, i32
  }
  func.func @transform_2(%arg0: i32) -> (i32, i32) {
    %c0_i32 = arith.constant 0 : i32
    %c0_i32_0 = arith.constant 0 : i32
    %c0_i32_1 = arith.constant 0 : i32
    return %c0_i32, %c0_i32_0 : i32, i32
  }
  func.func @transform_3(%arg0: i32) -> (i32, i32) {
    %c0_i32 = arith.constant 0 : i32
    %c0_i32_0 = arith.constant 0 : i32
    %c0_i32_1 = arith.constant 0 : i32
    return %c0_i32, %c0_i32_0 : i32, i32
  }
  func.func @transform_4(%arg0: i32) -> (i32, i32) {
    %c0_i32 = arith.constant 0 : i32
    %c0_i32_0 = arith.constant 0 : i32
    %c0_i32_1 = arith.constant 0 : i32
    return %c0_i32, %c0_i32_0 : i32, i32
  }
  func.func @transform_5(%arg0: i32) -> (i32, i32) {
    %c0_i32 = arith.constant 0 : i32
    %c0_i32_0 = arith.constant 0 : i32
    %c0_i32_1 = arith.constant 0 : i32
    return %c0_i32, %c0_i32_0 : i32, i32
  }
  func.func @transform_6(%arg0: i32) -> (i32, i32) {
    %c0_i32 = arith.constant 0 : i32
    %c0_i32_0 = arith.constant 0 : i32
    %c0_i32_1 = arith.constant 0 : i32
    return %c0_i32, %c0_i32_0 : i32, i32
  }
  func.func @transform_7(%arg0: i32) -> (i32, i32) {
    %c0_i32 = arith.constant 0 : i32
    %c0_i32_0 = arith.constant 0 : i32
    %c0_i32_1 = arith.constant 0 : i32
    return %c0_i32, %c0_i32_0 : i32, i32
  }
  func.func @transform_8(%arg0: i32) -> (i32, i32) {
    %c0_i32 = arith.constant 0 : i32
    %c0_i32_0 = arith.constant 0 : i32
    %c0_i32_1 = arith.constant 0 : i32
    return %c0_i32, %c0_i32_0 : i32, i32
  }
  func.func @transform_9(%arg0: i32) -> (i32, i32) {
    %c0_i32 = arith.constant 0 : i32
    %c0_i32_0 = arith.constant 0 : i32
    return %arg0, %c0_i32 : i32, i32
  }
}

module attributes {stable_mosaic.version = 11 : i64} {
  func.func @_qnet_kernel(%arg0: i32, %arg1: memref<8x1024xbf16, #tpu.memory_space<vmem>>, %arg2: memref<1024x512xbf16, #tpu.memory_space<vmem>>, %arg3: memref<1x512xf32, #tpu.memory_space<vmem>>, %arg4: memref<512x512xbf16, #tpu.memory_space<vmem>>, %arg5: memref<1x512xf32, #tpu.memory_space<vmem>>, %arg6: memref<512x256xbf16, #tpu.memory_space<vmem>>, %arg7: memref<1x256xf32, #tpu.memory_space<vmem>>, %arg8: memref<256x128xbf16, #tpu.memory_space<vmem>>, %arg9: memref<1x128xf32, #tpu.memory_space<vmem>>, %arg10: memref<8x128xf32, #tpu.memory_space<vmem>>) attributes {dimension_semantics = [#tpu.dimension_semantics<parallel>], iteration_bounds = array<i64: 1>, scalar_prefetch = 0 : i64, scratch_operands = 0 : i64, tpu.core_type = #tpu.core_type<tc>, window_params = [{transform_indices = @transform_0, window_bounds = array<i64: 8, 1024>}, {pipeline_mode = #tpu.pipeline_mode<synchronous>, transform_indices = @transform_1, window_bounds = array<i64: 1024, 512>}, {pipeline_mode = #tpu.pipeline_mode<synchronous>, transform_indices = @transform_2, window_bounds = array<i64: 1, 512>}, {pipeline_mode = #tpu.pipeline_mode<synchronous>, transform_indices = @transform_3, window_bounds = array<i64: 512, 512>}, {pipeline_mode = #tpu.pipeline_mode<synchronous>, transform_indices = @transform_4, window_bounds = array<i64: 1, 512>}, {pipeline_mode = #tpu.pipeline_mode<synchronous>, transform_indices = @transform_5, window_bounds = array<i64: 512, 256>}, {pipeline_mode = #tpu.pipeline_mode<synchronous>, transform_indices = @transform_6, window_bounds = array<i64: 1, 256>}, {pipeline_mode = #tpu.pipeline_mode<synchronous>, transform_indices = @transform_7, window_bounds = array<i64: 256, 128>}, {pipeline_mode = #tpu.pipeline_mode<synchronous>, transform_indices = @transform_8, window_bounds = array<i64: 1, 128>}, {transform_indices = @transform_9, window_bounds = array<i64: 8, 128>}]} {
    %c0 = arith.constant 0 : index
    %c0_0 = arith.constant 0 : index
    %0 = vector.load %arg1[%c0, %c0_0] : memref<8x1024xbf16, #tpu.memory_space<vmem>>, vector<8x1024xbf16>
    %c0_1 = arith.constant 0 : index
    %c0_2 = arith.constant 0 : index
    %1 = vector.load %arg2[%c0_1, %c0_2] : memref<1024x512xbf16, #tpu.memory_space<vmem>>, vector<1024x512xbf16>
    %cst = arith.constant dense<0.000000e+00> : vector<8x512xf32>
    %2 = tpu.matmul %0, %1, %cst {dimension_numbers = #tpu.dot_dimension_numbers<[1], [0], [0], [1], [0, 0, 1, 1], [], []>} : vector<8x1024xbf16>, vector<1024x512xbf16>, vector<8x512xf32> -> vector<8x512xf32>
    %c0_3 = arith.constant 0 : index
    %c0_4 = arith.constant 0 : index
    %3 = vector.load %arg3[%c0_3, %c0_4] : memref<1x512xf32, #tpu.memory_space<vmem>>, vector<1x512xf32>
    %4 = vector.broadcast %3 : vector<1x512xf32> to vector<8x512xf32>
    %5 = arith.addf %2, %4 : vector<8x512xf32>
    %cst_5 = arith.constant 0.000000e+00 : f32
    %6 = vector.broadcast %cst_5 : f32 to vector<8x512xf32>
    %7 = arith.maximumf %5, %6 : vector<8x512xf32>
    %8 = arith.truncf %7 : vector<8x512xf32> to vector<8x512xbf16>
    %c0_6 = arith.constant 0 : index
    %c0_7 = arith.constant 0 : index
    %9 = vector.load %arg4[%c0_6, %c0_7] : memref<512x512xbf16, #tpu.memory_space<vmem>>, vector<512x512xbf16>
    %cst_8 = arith.constant dense<0.000000e+00> : vector<8x512xf32>
    %10 = tpu.matmul %8, %9, %cst_8 {dimension_numbers = #tpu.dot_dimension_numbers<[1], [0], [0], [1], [0, 0, 1, 1], [], []>} : vector<8x512xbf16>, vector<512x512xbf16>, vector<8x512xf32> -> vector<8x512xf32>
    %c0_9 = arith.constant 0 : index
    %c0_10 = arith.constant 0 : index
    %11 = vector.load %arg5[%c0_9, %c0_10] : memref<1x512xf32, #tpu.memory_space<vmem>>, vector<1x512xf32>
    %12 = vector.broadcast %11 : vector<1x512xf32> to vector<8x512xf32>
    %13 = arith.addf %10, %12 : vector<8x512xf32>
    %cst_11 = arith.constant 0.000000e+00 : f32
    %14 = vector.broadcast %cst_11 : f32 to vector<8x512xf32>
    %15 = arith.maximumf %13, %14 : vector<8x512xf32>
    %16 = arith.truncf %15 : vector<8x512xf32> to vector<8x512xbf16>
    %c0_12 = arith.constant 0 : index
    %c0_13 = arith.constant 0 : index
    %17 = vector.load %arg6[%c0_12, %c0_13] : memref<512x256xbf16, #tpu.memory_space<vmem>>, vector<512x256xbf16>
    %cst_14 = arith.constant dense<0.000000e+00> : vector<8x256xf32>
    %18 = tpu.matmul %16, %17, %cst_14 {dimension_numbers = #tpu.dot_dimension_numbers<[1], [0], [0], [1], [0, 0, 1, 1], [], []>} : vector<8x512xbf16>, vector<512x256xbf16>, vector<8x256xf32> -> vector<8x256xf32>
    %c0_15 = arith.constant 0 : index
    %c0_16 = arith.constant 0 : index
    %19 = vector.load %arg7[%c0_15, %c0_16] : memref<1x256xf32, #tpu.memory_space<vmem>>, vector<1x256xf32>
    %20 = vector.broadcast %19 : vector<1x256xf32> to vector<8x256xf32>
    %21 = arith.addf %18, %20 : vector<8x256xf32>
    %cst_17 = arith.constant 0.000000e+00 : f32
    %22 = vector.broadcast %cst_17 : f32 to vector<8x256xf32>
    %23 = arith.maximumf %21, %22 : vector<8x256xf32>
    %24 = arith.truncf %23 : vector<8x256xf32> to vector<8x256xbf16>
    %c0_18 = arith.constant 0 : index
    %c0_19 = arith.constant 0 : index
    %25 = vector.load %arg8[%c0_18, %c0_19] : memref<256x128xbf16, #tpu.memory_space<vmem>>, vector<256x128xbf16>
    %cst_20 = arith.constant dense<0.000000e+00> : vector<8x128xf32>
    %26 = tpu.matmul %24, %25, %cst_20 {dimension_numbers = #tpu.dot_dimension_numbers<[1], [0], [0], [1], [0, 0, 1, 1], [], []>} : vector<8x256xbf16>, vector<256x128xbf16>, vector<8x128xf32> -> vector<8x128xf32>
    %c0_21 = arith.constant 0 : index
    %c0_22 = arith.constant 0 : index
    %27 = vector.load %arg9[%c0_21, %c0_22] : memref<1x128xf32, #tpu.memory_space<vmem>>, vector<1x128xf32>
    %28 = vector.broadcast %27 : vector<1x128xf32> to vector<8x128xf32>
    %29 = arith.addf %26, %28 : vector<8x128xf32>
    %c0_23 = arith.constant 0 : index
    %c0_24 = arith.constant 0 : index
    %30 = vector.load %arg10[%c0_23, %c0_24] : memref<8x128xf32, #tpu.memory_space<vmem>>, vector<8x128xf32>
    tpu.vector_store %arg10[%c0_23, %c0_24], %29 {strides = array<i32>} : memref<8x128xf32, #tpu.memory_space<vmem>>, vector<8x128xf32>,
    return
  }
  func.func @transform_0(%arg0: i32) -> (i32, i32) {
    %c0_i32 = arith.constant 0 : i32
    %c0_i32_0 = arith.constant 0 : i32
    return %arg0, %c0_i32 : i32, i32
  }
  func.func @transform_1(%arg0: i32) -> (i32, i32) {
    %c0_i32 = arith.constant 0 : i32
    %c0_i32_0 = arith.constant 0 : i32
    %c0_i32_1 = arith.constant 0 : i32
    return %c0_i32, %c0_i32_0 : i32, i32
  }
  func.func @transform_2(%arg0: i32) -> (i32, i32) {
    %c0_i32 = arith.constant 0 : i32
    %c0_i32_0 = arith.constant 0 : i32
    %c0_i32_1 = arith.constant 0 : i32
    return %c0_i32, %c0_i32_0 : i32, i32
  }
  func.func @transform_3(%arg0: i32) -> (i32, i32) {
    %c0_i32 = arith.constant 0 : i32
    %c0_i32_0 = arith.constant 0 : i32
    %c0_i32_1 = arith.constant 0 : i32
    return %c0_i32, %c0_i32_0 : i32, i32
  }
  func.func @transform_4(%arg0: i32) -> (i32, i32) {
    %c0_i32 = arith.constant 0 : i32
    %c0_i32_0 = arith.constant 0 : i32
    %c0_i32_1 = arith.constant 0 : i32
    return %c0_i32, %c0_i32_0 : i32, i32
  }
  func.func @transform_5(%arg0: i32) -> (i32, i32) {
    %c0_i32 = arith.constant 0 : i32
    %c0_i32_0 = arith.constant 0 : i32
    %c0_i32_1 = arith.constant 0 : i32
    return %c0_i32, %c0_i32_0 : i32, i32
  }
  func.func @transform_6(%arg0: i32) -> (i32, i32) {
    %c0_i32 = arith.constant 0 : i32
    %c0_i32_0 = arith.constant 0 : i32
    %c0_i32_1 = arith.constant 0 : i32
    return %c0_i32, %c0_i32_0 : i32, i32
  }
  func.func @transform_7(%arg0: i32) -> (i32, i32) {
    %c0_i32 = arith.constant 0 : i32
    %c0_i32_0 = arith.constant 0 : i32
    %c0_i32_1 = arith.constant 0 : i32
    return %c0_i32, %c0_i32_0 : i32, i32
  }
  func.func @transform_8(%arg0: i32) -> (i32, i32) {
    %c0_i32 = arith.constant 0 : i32
    %c0_i32_0 = arith.constant 0 : i32
    %c0_i32_1 = arith.constant 0 : i32
    return %c0_i32, %c0_i32_0 : i32, i32
  }
  func.func @transform_9(%arg0: i32) -> (i32, i32) {
    %c0_i32 = arith.constant 0 : i32
    %c0_i32_0 = arith.constant 0 : i32
    return %arg0, %c0_i32 : i32, i32
  }
}

</mosaic_0001>

<bundles_post_ra>
// kernel: tpu_custom_call.1
= control target key start
LH: loop header
LB: loop body
LE: loop exit
PB: predicated region body
PF: predicated region fallthrough
CT: control target
= control target key end

     0   :  { %14 = vsyncpa [#allocation3], 0  ;;  %s5298_s0 = inlined_call_operand.hbm [shape: bf16[8,1024], index: 0, kind: input, shape index: {}]   ;;  %s5299_s1 = inlined_call_operand.hbm [shape: bf16[1024,512], index: 1, kind: input, shape index: {}]   ;;  %s5300_s2 = inlined_call_operand.vmem [shape: f32[1,512], index: 2, kind: input, shape index: {}]   ;;  %s5301_s3 = inlined_call_operand.hbm [shape: bf16[512,512], index: 3, kind: input, shape index: {}]   ;;  %s5302_s4 = inlined_call_operand.vmem [shape: f32[1,512], index: 4, kind: input, shape index: {}]   ;;  %s5303_s5 = inlined_call_operand.hbm [shape: bf16[512,256], index: 5, kind: input, shape index: {}]   ;;  %s5304_s6 = inlined_call_operand.vmem [shape: f32[1,256], index: 6, kind: input, shape index: {}]   ;;  %s5305_s7 = inlined_call_operand.hbm [shape: bf16[256,128], index: 7, kind: input, shape index: {}]   ;;  %s5306_s8 = inlined_call_operand.vmem [shape: f32[1,128], index: 8, kind: input, shape index: {}]   ;;  %s5307_s9 = inlined_call_operand.hbm [shape: f32[8,128], index: 9, kind: output, shape index: {}]  }
   0x1   :  { %15 = vsyncpa [#allocation6], 0 }
   0x2   :  { %16 = vsyncpa [#allocation9], 0 }
   0x3   :  { %17 = vsyncpa [#allocation4], 0  ;;  %s5050_s30 = smov [#allocation5]   ;;  %s4910_s13 = scalar_lea.hbm %s5299_s1, 32768 }
   0x4   :  { %s33_s10 = sshll.u32 %s5050_s30, 4  ;;  %p4911_p0 = scmp.ne.s32.totalorder %s5299_s1, %s4910_s13  ;;  %s34_s10 = int_to_ptr.vmem [resolvable:$true] %s33_s10 }
   0x5   :  { %p4914_p1 = scmp.lt.u32.totalorder %s4910_s13, %s5299_s1 }
   0x7   :  { %p4916_p2 = pnand %p4914_p1, %p4911_p0 }
   0x9   :  { %4919 = shalt.err (!%p4916_p2)
}
   0xa   :  { %s4920_s18 = scalar_lea.vmem %s34_s10, 32768  ;;  %p4925_p4 = scmp.lt.s32.totalorder %s34_s10, %s34_s10 }
   0xb   :  { %p4921_p3 = scmp.ne.s32.totalorder %s34_s10, %s4920_s18  ;;  %p4926_p5 = scmp.lt.s32.totalorder %s4920_s18, %s4920_s18 }
   0xd   :  { %p4927_p6 = por %p4926_p5, %p4925_p4 }
   0xf   :  { %p4928_p7 = pnand %p4927_p6, %p4921_p3 }
  0x11   :  { %4931 = shalt.err (!%p4928_p7)
}
  0x12   :  { %s5051_s19 = smov 256   ;;  %s5052_s20 = smov 16  }
  0x13   :  { %39 = dma.hbm_to_vmem [thread:$0]  %s5299_s1, 32768, %s34_s10, [#allocation6], %s5051_s19, %s5051_s19, %s5052_s20  }
  0x14   :  { %s5053_s23 = smov [#allocation8]   ;;  %s4932_s27 = scalar_lea.hbm %s5303_s5, 8192 }
  0x15   :  { %s61_s24 = sshll.u32 %s5053_s23, 4  ;;  %p4933_p8 = scmp.ne.s32.totalorder %s5303_s5, %s4932_s27  ;;  %s62_s24 = int_to_ptr.vmem [resolvable:$true] %s61_s24 }
  0x16   :  { %p4936_p9 = scmp.lt.u32.totalorder %s4932_s27, %s5303_s5 }
  0x18   :  { %p4938_p10 = pnand %p4936_p9, %p4933_p8 }
  0x1a   :  { %4941 = shalt.err (!%p4938_p10)
}
  0x1b   :  { %s4942_s12 = scalar_lea.vmem %s62_s24, 8192  ;;  %p4947_p12 = scmp.lt.s32.totalorder %s62_s24, %s62_s24 }
  0x1c   :  { %p4943_p11 = scmp.ne.s32.totalorder %s62_s24, %s4942_s12  ;;  %p4948_p13 = scmp.lt.s32.totalorder %s4942_s12, %s4942_s12 }
  0x1e   :  { %p4949_p0 = por %p4948_p13, %p4947_p12 }
  0x20   :  { %p4950_p1 = pnand %p4949_p0, %p4943_p11 }
  0x22   :  { %4953 = shalt.err (!%p4950_p1)
}
  0x23   :  { %s5054_s1 = smov 128   ;;  %s5055_s10 = smov 8  }
  0x24   :  { %67 = dma.hbm_to_vmem [thread:$0]  %s5303_s5, 8192, %s62_s24, [#allocation9], %s5054_s1, %s5054_s1, %s5055_s10  }
  0x25   :  { %s5056_s15 = smov [#allocation2]   ;;  %s5057_s17 = smov [#allocation7]  }
  0x26   :  { %s24_s16 = sshll.u32 %s5056_s15, 4  ;;  %s47_s18 = sshll.u32 %s5057_s17, 4  ;;  %s25_s16 = int_to_ptr.vmem [resolvable:$true] %s24_s16  ;;  %s5139_s18 = int_to_ptr.vmem [resolvable:$true] %s47_s18 }
  0x27   :  { %s4954_s23 = scalar_lea.hbm %s5298_s0, 512 }
  0x28   :  { %p4955_p2 = scmp.ne.s32.totalorder %s5298_s0, %s4954_s23  ;;  %p4958_p3 = scmp.lt.u32.totalorder %s4954_s23, %s5298_s0 }
  0x2a   :  { %p4960_p4 = pnand %p4958_p3, %p4955_p2 }
  0x2c   :  { %4963 = shalt.err (!%p4960_p4)
}
  0x2d   :  { %s4964_s5 = scalar_lea.vmem %s25_s16, 512  ;;  %p4969_p6 = scmp.lt.s32.totalorder %s25_s16, %s25_s16 }
  0x2e   :  { %p4965_p5 = scmp.ne.s32.totalorder %s25_s16, %s4964_s5  ;;  %p4970_p7 = scmp.lt.s32.totalorder %s4964_s5, %s4964_s5 }
  0x30   :  { %p4971_p8 = por %p4970_p7, %p4969_p6 }
  0x32   :  { %p4972_p9 = pnand %p4971_p8, %p4965_p5 }
  0x34   :  { %4975 = shalt.err (!%p4972_p9)
}
  0x35   :  { %27 = dma.hbm_to_vmem [thread:$0]  %s5298_s0, 512, %s25_s16, [#allocation3]  }
  0x36   :  { %s4976_s12 = scalar_lea.hbm %s5301_s3, 16384 }
  0x37   :  { %p4977_p10 = scmp.ne.s32.totalorder %s5301_s3, %s4976_s12  ;;  %p4980_p11 = scmp.lt.u32.totalorder %s4976_s12, %s5301_s3 }
  0x39   :  { %p4982_p12 = pnand %p4980_p11, %p4977_p10 }
  0x3b   :  { %4985 = shalt.err (!%p4982_p12)
}
  0x3c   :  { %s4986_s15 = scalar_lea.vmem %s5139_s18, 16384  ;;  %p4991_p0 = scmp.lt.s32.totalorder %s5139_s18, %s5139_s18 }
  0x3d   :  { %p4987_p13 = scmp.ne.s32.totalorder %s5139_s18, %s4986_s15  ;;  %p4992_p1 = scmp.lt.s32.totalorder %s4986_s15, %s4986_s15 }
  0x3f   :  { %p4993_p2 = por %p4992_p1, %p4991_p0 }
  0x41   :  { %p4994_p3 = pnand %p4993_p2, %p4987_p13 }
  0x43   :  { %4997 = shalt.err (!%p4994_p3)
}
  0x44   :  { %53 = dma.hbm_to_vmem [thread:$0]  %s5301_s3, 16384, %s5139_s18, [#allocation6], %s5051_s19, %s5051_s19, %s5052_s20  }
  0x45   :  { %s5058_s17 = smov [#allocation10]   ;;  %s4998_s25 = scalar_lea.hbm %s5305_s7, 2048 }
  0x46   :  { %s75_s21 = sshll.u32 %s5058_s17, 4  ;;  %p4999_p4 = scmp.ne.s32.totalorder %s5305_s7, %s4998_s25  ;;  %s76_s21 = int_to_ptr.vmem [resolvable:$true] %s75_s21 }
  0x47   :  { %p5002_p5 = scmp.lt.u32.totalorder %s4998_s25, %s5305_s7 }
  0x49   :  { %p5004_p6 = pnand %p5002_p5, %p4999_p4 }
  0x4b   :  { %5007 = shalt.err (!%p5004_p6)
}
  0x4c   :  { %s5008_s24 = scalar_lea.vmem %s76_s21, 2048  ;;  %p5013_p8 = scmp.lt.s32.totalorder %s76_s21, %s76_s21 }
  0x4d   :  { %p5009_p7 = scmp.ne.s32.totalorder %s76_s21, %s5008_s24  ;;  %p5014_p9 = scmp.lt.s32.totalorder %s5008_s24, %s5008_s24 }
  0x4f   :  { %p5015_p10 = por %p5014_p9, %p5013_p8 }
  0x51   :  { %p5016_p11 = pnand %p5015_p10, %p5009_p7 }
  0x53   :  { %5019 = shalt.err (!%p5016_p11)
}
  0x54   :  { %s5059_s3 = smov 64   ;;  %s5060_s19 = smov 4  }
  0x55   :  { %81 = dma.hbm_to_vmem [thread:$0]  %s5305_s7, 2048, %s76_s21, [#allocation9], %s5059_s3, %s5059_s3, %s5060_s19  }
  0x56   :  { %5042 = dma.done.wait [#allocation3], 512  }
  0x57   :  { %5043 = vsyncadd [#allocation3], 4294966784 }
  0x58   :  { %5044 = dma.done.wait [#allocation6], 49152  }
  0x59   :  { %5045 = vsyncadd [#allocation6], 4294918144 }
  0x5a   :  { %5046 = dma.done.wait [#allocation9], 10240  }
  0x5b   :  { %5047 = vsyncadd [#allocation9], 4294957056  ;;  %v4214_v0 = vld [vmem:[#allocation5 + $0x4] ss:$16 sps:$4 sm:$0xff]   ;;  %v4218_v2 = vld [vmem:[#allocation5] ss:$16 sps:$4 sm:$0xff]  }
  0x5c   :  { %v4216_v1 = vld [vmem:[#allocation5 + $0x204] ss:$16 sps:$4 sm:$0xff]   ;;  %1690 = vmatprep.subr.bf16.mxu1 %v4214_v0  ;;  %v4219_v3 = vld [vmem:[#allocation5 + $0x200] ss:$16 sps:$4 sm:$0xff]   ;;  %v101_v48 = vld [vmem:[#allocation2 + $0x8] sm:$0xff] }
  0x5d   :  { %1731 = vmatprep.subr.bf16.mxu0 %v4216_v1  ;;  %v4220_v4 = vld [vmem:[#allocation5 + $0x24] ss:$16 sps:$4 sm:$0xff]   ;;  %1691 = vmatpush1.bf16.msra.mxu1 %v4218_v2  ;;  %v4224_v6 = vld [vmem:[#allocation5 + $0x20] ss:$16 sps:$4 sm:$0xff]   ;;  %v5187_v51 = vcombine.high %v101_v48, %v101_v48 }
  0x5e   :  { %1732 = vmatpush1.bf16.msra.mxu0 %v4219_v3  ;;  %v4222_v5 = vld [vmem:[#allocation5 + $0x224] ss:$16 sps:$4 sm:$0xff]   ;;  %1692 = vmatprep.subr.bf16.mxu1 %v4220_v4  ;;  %v4225_v7 = vld [vmem:[#allocation5 + $0x220] ss:$16 sps:$4 sm:$0xff]  }
  0x5f   :  { %1733 = vmatprep.subr.bf16.mxu0 %v4222_v5  ;;  %v4226_v8 = vld [vmem:[#allocation5 + $0x44] ss:$16 sps:$4 sm:$0xff]   ;;  %v4230_v10 = vld [vmem:[#allocation5 + $0x40] ss:$16 sps:$4 sm:$0xff]   ;;  %1763 = vmatprep.mubr.bf16.mxu0 %v5187_v51  ;;  %v4319_v5 = vld [vmem:[#allocation5 + $0xc] ss:$16 sps:$4 sm:$0xff]  }
  0x60   :  { %v4228_v9 = vld [vmem:[#allocation5 + $0x244] ss:$16 sps:$4 sm:$0xff]   ;;  %v4231_v11 = vld [vmem:[#allocation5 + $0x240] ss:$16 sps:$4 sm:$0xff]  }
  0x61   :  { %1693 = vmatpush1.bf16.msra.mxu1 %v4224_v6  ;;  %v4232_v12 = vld [vmem:[#allocation5 + $0x64] ss:$16 sps:$4 sm:$0xff]   ;;  %v4236_v14 = vld [vmem:[#allocation5 + $0x60] ss:$16 sps:$4 sm:$0xff]  }
  0x62   :  { %1734 = vmatpush1.bf16.msra.mxu0 %v4225_v7  ;;  %1694 = vmatprep.subr.bf16.mxu1 %v4226_v8  ;;  %v4234_v13 = vld [vmem:[#allocation5 + $0x264] ss:$16 sps:$4 sm:$0xff]   ;;  %v4237_v15 = vld [vmem:[#allocation5 + $0x260] ss:$16 sps:$4 sm:$0xff]   ;;  %v5193_v7 = vcombine.low %v101_v48, %v101_v48 }
  0x63   :  { %1735 = vmatprep.subr.bf16.mxu0 %v4228_v9  ;;  %v4238_v16 = vld [vmem:[#allocation5 + $0x84] ss:$16 sps:$4 sm:$0xff]   ;;  %v4242_v18 = vld [vmem:[#allocation5 + $0x80] ss:$16 sps:$4 sm:$0xff]   ;;  %v4317_v9 = vld [vmem:[#allocation5 + $0x8] ss:$16 sps:$4 sm:$0xff]  }
  0x64   :  { %v4240_v17 = vld [vmem:[#allocation5 + $0x284] ss:$16 sps:$4 sm:$0xff]   ;;  %v4243_v19 = vld [vmem:[#allocation5 + $0x280] ss:$16 sps:$4 sm:$0xff]  }
  0x65   :  { %1695 = vmatpush1.bf16.msra.mxu1 %v4230_v10  ;;  %v4244_v20 = vld [vmem:[#allocation5 + $0xa4] ss:$16 sps:$4 sm:$0xff]   ;;  %v4248_v22 = vld [vmem:[#allocation5 + $0xa0] ss:$16 sps:$4 sm:$0xff]  }
  0x66   :  { %1736 = vmatpush1.bf16.msra.mxu0 %v4231_v11  ;;  %1696 = vmatprep.subr.bf16.mxu1 %v4232_v12  ;;  %v4246_v21 = vld [vmem:[#allocation5 + $0x2a4] ss:$16 sps:$4 sm:$0xff]   ;;  %v4249_v23 = vld [vmem:[#allocation5 + $0x2a0] ss:$16 sps:$4 sm:$0xff]   ;;  %v4325_v11 = vld [vmem:[#allocation5 + $0x2c] ss:$16 sps:$4 sm:$0xff]  }
  0x67   :  { %1737 = vmatprep.subr.bf16.mxu0 %v4234_v13  ;;  %v4250_v24 = vld [vmem:[#allocation5 + $0xc4] ss:$16 sps:$4 sm:$0xff]   ;;  %v4254_v26 = vld [vmem:[#allocation5 + $0xc0] ss:$16 sps:$4 sm:$0xff]   ;;  %v4323_v13 = vld [vmem:[#allocation5 + $0x28] ss:$16 sps:$4 sm:$0xff]  }
  0x68   :  { %v4252_v25 = vld [vmem:[#allocation5 + $0x2c4] ss:$16 sps:$4 sm:$0xff]   ;;  %v4255_v27 = vld [vmem:[#allocation5 + $0x2c0] ss:$16 sps:$4 sm:$0xff]  }
  0x69   :  { %1697 = vmatpush1.bf16.msra.mxu1 %v4236_v14  ;;  %v4256_v28 = vld [vmem:[#allocation5 + $0xe4] ss:$16 sps:$4 sm:$0xff]   ;;  %v4260_v30 = vld [vmem:[#allocation5 + $0xe0] ss:$16 sps:$4 sm:$0xff]  }
  0x6a   :  { %1738 = vmatpush1.bf16.msra.mxu0 %v4237_v15  ;;  %1698 = vmatprep.subr.bf16.mxu1 %v4238_v16  ;;  %v4258_v29 = vld [vmem:[#allocation5 + $0x2e4] ss:$16 sps:$4 sm:$0xff]   ;;  %v4261_v31 = vld [vmem:[#allocation5 + $0x2e0] ss:$16 sps:$4 sm:$0xff]   ;;  %v4331_v15 = vld [vmem:[#allocation5 + $0x4c] ss:$16 sps:$4 sm:$0xff]  }
  0x6b   :  { %1739 = vmatprep.subr.bf16.mxu0 %v4240_v17  ;;  %v4262_v32 = vld [vmem:[#allocation5 + $0x104] ss:$16 sps:$4 sm:$0xff]   ;;  %v4266_v34 = vld [vmem:[#allocation5 + $0x100] ss:$16 sps:$4 sm:$0xff]   ;;  %v4329_v17 = vld [vmem:[#allocation5 + $0x48] ss:$16 sps:$4 sm:$0xff]  }
  0x6c   :  { %v4264_v33 = vld [vmem:[#allocation5 + $0x304] ss:$16 sps:$4 sm:$0xff]   ;;  %v4267_v35 = vld [vmem:[#allocation5 + $0x300] ss:$16 sps:$4 sm:$0xff]  }
  0x6d   :  { %1699 = vmatpush1.bf16.msra.mxu1 %v4242_v18  ;;  %v4268_v36 = vld [vmem:[#allocation5 + $0x124] ss:$16 sps:$4 sm:$0xff]   ;;  %v4272_v38 = vld [vmem:[#allocation5 + $0x120] ss:$16 sps:$4 sm:$0xff]  }
  0x6e   :  { %1740 = vmatpush1.bf16.msra.mxu0 %v4243_v19  ;;  %1700 = vmatprep.subr.bf16.mxu1 %v4244_v20  ;;  %v4270_v37 = vld [vmem:[#allocation5 + $0x324] ss:$16 sps:$4 sm:$0xff]   ;;  %v4273_v39 = vld [vmem:[#allocation5 + $0x320] ss:$16 sps:$4 sm:$0xff]   ;;  %v4337_v19 = vld [vmem:[#allocation5 + $0x6c] ss:$16 sps:$4 sm:$0xff]  }
  0x6f   :  { %1741 = vmatprep.subr.bf16.mxu0 %v4246_v21  ;;  %v4274_v40 = vld [vmem:[#allocation5 + $0x144] ss:$16 sps:$4 sm:$0xff]   ;;  %v4278_v42 = vld [vmem:[#allocation5 + $0x140] ss:$16 sps:$4 sm:$0xff]   ;;  %v4335_v21 = vld [vmem:[#allocation5 + $0x68] ss:$16 sps:$4 sm:$0xff]  }
  0x70   :  { %v4276_v41 = vld [vmem:[#allocation5 + $0x344] ss:$16 sps:$4 sm:$0xff]   ;;  %v4279_v43 = vld [vmem:[#allocation5 + $0x340] ss:$16 sps:$4 sm:$0xff]  }
  0x71   :  { %1701 = vmatpush1.bf16.msra.mxu1 %v4248_v22  ;;  %v4280_v44 = vld [vmem:[#allocation5 + $0x164] ss:$16 sps:$4 sm:$0xff]   ;;  %v4284_v49 = vld [vmem:[#allocation5 + $0x160] ss:$16 sps:$4 sm:$0xff]  }
  0x72   :  { %1742 = vmatpush1.bf16.msra.mxu0 %v4249_v23  ;;  %1702 = vmatprep.subr.bf16.mxu1 %v4250_v24  ;;  %v4282_v45 = vld [vmem:[#allocation5 + $0x364] ss:$16 sps:$4 sm:$0xff]   ;;  %v4285_v50 = vld [vmem:[#allocation5 + $0x360] ss:$16 sps:$4 sm:$0xff]   ;;  %v4343_v23 = vld [vmem:[#allocation5 + $0x8c] ss:$16 sps:$4 sm:$0xff]  }
  0x73   :  { %1743 = vmatprep.subr.bf16.mxu0 %v4252_v25  ;;  %v100_v46 = vld [vmem:[#allocation2] sm:$0xff]  ;;  %v4341_v25 = vld [vmem:[#allocation5 + $0x88] ss:$16 sps:$4 sm:$0xff]  }
  0x74   :  { %v5185_v47 = vcombine.high %v100_v46, %v100_v46  ;;  %v4286_v52 = vld [vmem:[#allocation5 + $0x184] ss:$16 sps:$4 sm:$0xff]   ;;  %v4290_v54 = vld [vmem:[#allocation5 + $0x180] ss:$16 sps:$4 sm:$0xff]   ;;  %v5191_v6 = vcombine.low %v100_v46, %v100_v46 }
  0x75   :  { %1703 = vmatpush1.bf16.msra.mxu1 %v4254_v26  ;;  %v4288_v53 = vld [vmem:[#allocation5 + $0x384] ss:$16 sps:$4 sm:$0xff]   ;;  %v4291_v55 = vld [vmem:[#allocation5 + $0x380] ss:$16 sps:$4 sm:$0xff]  }
  0x76   :  { %1744 = vmatpush1.bf16.msra.mxu0 %v4255_v27  ;;  %1704 = vmatprep.subr.bf16.mxu1 %v4256_v28  ;;  %v4292_v56 = vld [vmem:[#allocation5 + $0x1a4] ss:$16 sps:$4 sm:$0xff]   ;;  %v4296_v58 = vld [vmem:[#allocation5 + $0x1a0] ss:$16 sps:$4 sm:$0xff]   ;;  %v4349_v27 = vld [vmem:[#allocation5 + $0xac] ss:$16 sps:$4 sm:$0xff]  }
  0x77   :  { %1745 = vmatprep.subr.bf16.mxu0 %v4258_v29  ;;  %1722 = vmatprep.mubr.bf16.mxu1 %v5185_v47  ;;  %v4294_v57 = vld [vmem:[#allocation5 + $0x3a4] ss:$16 sps:$4 sm:$0xff]   ;;  %v4297_v59 = vld [vmem:[#allocation5 + $0x3a0] ss:$16 sps:$4 sm:$0xff]   ;;  %v4347_v29 = vld [vmem:[#allocation5 + $0xa8] ss:$16 sps:$4 sm:$0xff]  }
  0x78   :  { %v4298_v60 = vld [vmem:[#allocation5 + $0x1c4] ss:$16 sps:$4 sm:$0xff]   ;;  %v4302_v62 = vld [vmem:[#allocation5 + $0x1c0] ss:$16 sps:$4 sm:$0xff]  }
  0x79   :  { %1705 = vmatpush1.bf16.msra.mxu1 %v4260_v30  ;;  %v4300_v61 = vld [vmem:[#allocation5 + $0x3c4] ss:$16 sps:$4 sm:$0xff]   ;;  %v4303_v63 = vld [vmem:[#allocation5 + $0x3c0] ss:$16 sps:$4 sm:$0xff]  }
  0x7a   :  { %1746 = vmatpush1.bf16.msra.mxu0 %v4261_v31  ;;  %1706 = vmatprep.subr.bf16.mxu1 %v4262_v32  ;;  %v4304_v0 = vld [vmem:[#allocation5 + $0x1e4] ss:$16 sps:$4 sm:$0xff]   ;;  %v4308_v2 = vld [vmem:[#allocation5 + $0x1e0] ss:$16 sps:$4 sm:$0xff]   ;;  %v4355_v31 = vld [vmem:[#allocation5 + $0xcc] ss:$16 sps:$4 sm:$0xff]  }
  0x7b   :  { %1747 = vmatprep.subr.bf16.mxu0 %v4264_v33  ;;  %v4306_v1 = vld [vmem:[#allocation5 + $0x3e4] ss:$16 sps:$4 sm:$0xff]   ;;  %v4309_v3 = vld [vmem:[#allocation5 + $0x3e0] ss:$16 sps:$4 sm:$0xff]  }
  0x7c   :  { %v4316_v4 = vld [vmem:[#allocation5 + $0x404] ss:$16 sps:$4 sm:$0xff]   ;;  %v4314_v8 = vld [vmem:[#allocation5 + $0x400] ss:$16 sps:$4 sm:$0xff]  }
  0x7d   :  { %1707 = vmatpush1.bf16.msra.mxu1 %v4266_v34  ;;  %v4322_v10 = vld [vmem:[#allocation5 + $0x424] ss:$16 sps:$4 sm:$0xff]   ;;  %v4320_v12 = vld [vmem:[#allocation5 + $0x420] ss:$16 sps:$4 sm:$0xff]  }
  0x7e   :  { %1748 = vmatpush1.bf16.msra.mxu0 %v4267_v35  ;;  %1708 = vmatprep.subr.bf16.mxu1 %v4268_v36  ;;  %v4328_v14 = vld [vmem:[#allocation5 + $0x444] ss:$16 sps:$4 sm:$0xff]   ;;  %v4326_v16 = vld [vmem:[#allocation5 + $0x440] ss:$16 sps:$4 sm:$0xff]   ;;  %v4353_v35 = vld [vmem:[#allocation5 + $0xc8] ss:$16 sps:$4 sm:$0xff]  }
  0x7f   :  { %1749 = vmatprep.subr.bf16.mxu0 %v4270_v37  ;;  %v4334_v18 = vld [vmem:[#allocation5 + $0x464] ss:$16 sps:$4 sm:$0xff]   ;;  %v4332_v20 = vld [vmem:[#allocation5 + $0x460] ss:$16 sps:$4 sm:$0xff]   ;;  %v4361_v37 = vld [vmem:[#allocation5 + $0xec] ss:$16 sps:$4 sm:$0xff]  }
  0x80   :  { %v4340_v22 = vld [vmem:[#allocation5 + $0x484] ss:$16 sps:$4 sm:$0xff]   ;;  %v4338_v24 = vld [vmem:[#allocation5 + $0x480] ss:$16 sps:$4 sm:$0xff]  }
  0x81   :  { %1709 = vmatpush1.bf16.msra.mxu1 %v4272_v38  ;;  %v4346_v26 = vld [vmem:[#allocation5 + $0x4a4] ss:$16 sps:$4 sm:$0xff]   ;;  %v4344_v28 = vld [vmem:[#allocation5 + $0x4a0] ss:$16 sps:$4 sm:$0xff]  }
  0x82   :  { %1750 = vmatpush1.bf16.msra.mxu0 %v4273_v39  ;;  %1710 = vmatprep.subr.bf16.mxu1 %v4274_v40  ;;  %v4352_v30 = vld [vmem:[#allocation5 + $0x4c4] ss:$16 sps:$4 sm:$0xff]   ;;  %v4350_v33 = vld [vmem:[#allocation5 + $0x4c0] ss:$16 sps:$4 sm:$0xff]   ;;  %v4359_v39 = vld [vmem:[#allocation5 + $0xe8] ss:$16 sps:$4 sm:$0xff]  }
  0x83   :  { %1751 = vmatprep.subr.bf16.mxu0 %v4276_v41  ;;  %v5198_v32 = vld [vmem:[#allocation2 + $0x10] sm:$0xff]  ;;  %v4367_v41 = vld [vmem:[#allocation5 + $0x10c] ss:$16 sps:$4 sm:$0xff]  }
  0x84   :  { %v5202_v34 = vcombine.high %v5198_v32, %v5198_v32  ;;  %v4358_v36 = vld [vmem:[#allocation5 + $0x4e4] ss:$16 sps:$4 sm:$0xff]   ;;  %v4356_v38 = vld [vmem:[#allocation5 + $0x4e0] ss:$16 sps:$4 sm:$0xff]  }
  0x85   :  { %1711 = vmatpush1.bf16.msra.mxu1 %v4278_v42  ;;  %v4364_v40 = vld [vmem:[#allocation5 + $0x504] ss:$16 sps:$4 sm:$0xff]   ;;  %v4362_v42 = vld [vmem:[#allocation5 + $0x500] ss:$16 sps:$4 sm:$0xff]  }
  0x86   :  { %1752 = vmatpush1.bf16.msra.mxu0 %v4279_v43  ;;  %1712 = vmatprep.subr.bf16.mxu1 %v4280_v44  ;;  %v4365_v43 = vld [vmem:[#allocation5 + $0x108] ss:$16 sps:$4 sm:$0xff]   ;;  %v4370_v44 = vld [vmem:[#allocation5 + $0x524] ss:$16 sps:$4 sm:$0xff]   ;;  %v4368_v46 = vld [vmem:[#allocation5 + $0x520] ss:$16 sps:$4 sm:$0xff]  }
  0x87   :  { %1753 = vmatprep.subr.bf16.mxu0 %v4282_v45  ;;  %v4373_v45 = vld [vmem:[#allocation5 + $0x12c] ss:$16 sps:$4 sm:$0xff]   ;;  %v4376_v48 = vld [vmem:[#allocation5 + $0x544] ss:$16 sps:$4 sm:$0xff]  }
  0x89   :  { %1713 = vmatpush1.bf16.msra.mxu1 %v4284_v49  ;;  %v4379_v49 = vld [vmem:[#allocation5 + $0x14c] ss:$16 sps:$4 sm:$0xff]  }
  0x8a   :  { %1754 = vmatpush1.bf16.msra.mxu0 %v4285_v50  ;;  %1714 = vmatprep.subr.bf16.mxu1 %v4286_v52  ;;  %v4374_v50 = vld [vmem:[#allocation5 + $0x540] ss:$16 sps:$4 sm:$0xff]   ;;  %v4377_v52 = vld [vmem:[#allocation5 + $0x148] ss:$16 sps:$4 sm:$0xff]  }
  0x8b   :  { %1755 = vmatprep.subr.bf16.mxu0 %v4288_v53  ;;  %v4382_v53 = vld [vmem:[#allocation5 + $0x564] ss:$16 sps:$4 sm:$0xff]  }
  0x8d   :  { %1715 = vmatpush1.bf16.msra.mxu1 %v4290_v54  ;;  %v4385_v54 = vld [vmem:[#allocation5 + $0x16c] ss:$16 sps:$4 sm:$0xff]  }
  0x8e   :  { %1756 = vmatpush1.bf16.msra.mxu0 %v4291_v55  ;;  %1716 = vmatprep.subr.bf16.mxu1 %v4292_v56  ;;  %v4380_v55 = vld [vmem:[#allocation5 + $0x560] ss:$16 sps:$4 sm:$0xff]   ;;  %v4383_v56 = vld [vmem:[#allocation5 + $0x168] ss:$16 sps:$4 sm:$0xff]  }
  0x8f   :  { %1757 = vmatprep.subr.bf16.mxu0 %v4294_v57  ;;  %v4388_v57 = vld [vmem:[#allocation5 + $0x584] ss:$16 sps:$4 sm:$0xff]  }
  0x91   :  { %1717 = vmatpush1.bf16.msra.mxu1 %v4296_v58  ;;  %v4391_v58 = vld [vmem:[#allocation5 + $0x18c] ss:$16 sps:$4 sm:$0xff]  }
  0x92   :  { %1758 = vmatpush1.bf16.msra.mxu0 %v4297_v59  ;;  %1718 = vmatprep.subr.bf16.mxu1 %v4298_v60  ;;  %v4386_v59 = vld [vmem:[#allocation5 + $0x580] ss:$16 sps:$4 sm:$0xff]   ;;  %v4389_v60 = vld [vmem:[#allocation5 + $0x188] ss:$16 sps:$4 sm:$0xff]  }
  0x93   :  { %1759 = vmatprep.subr.bf16.mxu0 %v4300_v61  ;;  %v4394_v61 = vld [vmem:[#allocation5 + $0x5a4] ss:$16 sps:$4 sm:$0xff]  }
  0x95   :  { %1719 = vmatpush1.bf16.msra.mxu1 %v4302_v62  ;;  %v4397_v62 = vld [vmem:[#allocation5 + $0x1ac] ss:$16 sps:$4 sm:$0xff]  }
  0x96   :  { %1760 = vmatpush1.bf16.msra.mxu0 %v4303_v63  ;;  %1720 = vmatprep.subr.bf16.mxu1 %v4304_v0  ;;  %v4392_v63 = vld [vmem:[#allocation5 + $0x5a0] ss:$16 sps:$4 sm:$0xff]   ;;  %v4395_v0 = vld [vmem:[#allocation5 + $0x1a8] ss:$16 sps:$4 sm:$0xff]  }
  0x97   :  { %1761 = vmatprep.subr.bf16.mxu0 %v4306_v1  ;;  %v4400_v1 = vld [vmem:[#allocation5 + $0x5c4] ss:$16 sps:$4 sm:$0xff]  }
  0x99   :  { %1721 = vmatpush1.bf16.msra.mxu1 %v4308_v2  ;;  %v4403_v2 = vld [vmem:[#allocation5 + $0x1cc] ss:$16 sps:$4 sm:$0xff]  }
  0x9a   :  { %1762 = vmatpush1.bf16.msra.mxu0 %v4309_v3  ;;  %1854 = vmatprep.subr.bf16.mxu1 %v4319_v5  ;;  %v4398_v3 = vld [vmem:[#allocation5 + $0x5c0] ss:$16 sps:$4 sm:$0xff]   ;;  %v4406_v5 = vld [vmem:[#allocation5 + $0x5e4] ss:$16 sps:$4 sm:$0xff]  }
  0x9b   :  { %1772 = vmatprep.subr.bf16.mxu0 %v4316_v4  ;;  %v4401_v4 = vld [vmem:[#allocation5 + $0x1c8] ss:$16 sps:$4 sm:$0xff]  }
  0x9c   :  { %1723 = vmatmul.mubr.bf16.vlgmr.msra.gmra.mrb[0].mxu1 %v5191_v6 }
  0x9d   :  { %1764 = vmatmul.mubr.bf16.vlgmr.msra.gmra.mrb[0].mxu0 %v5193_v7  ;;  %1855 = vmatpush1.bf16.msra.mxu1 %v4317_v9  ;;  %v4404_v9 = vld [vmem:[#allocation5 + $0x5e0] ss:$16 sps:$4 sm:$0xff]  }
  0x9e   :  { %1773 = vmatpush1.bf16.msra.mxu0 %v4314_v8  ;;  %1856 = vmatprep.subr.bf16.mxu1 %v4325_v11  ;;  %v4409_v8 = vld [vmem:[#allocation5 + $0x1ec] ss:$16 sps:$4 sm:$0xff]   ;;  %v4414_v11 = vld [vmem:[#allocation5 + $0x604] ss:$16 sps:$4 sm:$0xff]  }
  0x9f   :  { %1774 = vmatprep.subr.bf16.mxu0 %v4322_v10  ;;  %1886 = vmatprep.mubr.bf16.mxu1 %v5185_v47  ;;  %v4371_v47 = vld [vmem:[#allocation5 + $0x128] ss:$16 sps:$4 sm:$0xff]  }
  0xa0   :  { %1804 = vmatprep.mubr.bf16.mxu0 %v5202_v34  ;;  %v4407_v10 = vld [vmem:[#allocation5 + $0x1e8] ss:$16 sps:$4 sm:$0xff]  }
  0xa1   :  { %1857 = vmatpush1.bf16.msra.mxu1 %v4323_v13  ;;  %v5207_v13 = vcombine.low %v5198_v32, %v5198_v32  ;;  %v4439_v32 = vld [vmem:[#allocation5 + $0x288] ss:$16 sps:$4 sm:$0xff]  }
  0xa2   :  { %1775 = vmatpush1.bf16.msra.mxu0 %v4320_v12  ;;  %1858 = vmatprep.subr.bf16.mxu1 %v4331_v15  ;;  %v4417_v12 = vld [vmem:[#allocation5 + $0x20c] ss:$16 sps:$4 sm:$0xff]   ;;  %v4415_v15 = vld [vmem:[#allocation5 + $0x208] ss:$16 sps:$4 sm:$0xff]  }
  0xa3   :  { %1776 = vmatprep.subr.bf16.mxu0 %v4328_v14  ;;  %v4412_v14 = vld [vmem:[#allocation5 + $0x600] ss:$16 sps:$4 sm:$0xff]  }
  0xa5   :  { %1859 = vmatpush1.bf16.msra.mxu1 %v4329_v17  ;;  %v4423_v17 = vld [vmem:[#allocation5 + $0x22c] ss:$16 sps:$4 sm:$0xff]  }
  0xa6   :  { %1777 = vmatpush1.bf16.msra.mxu0 %v4326_v16  ;;  %1860 = vmatprep.subr.bf16.mxu1 %v4337_v19  ;;  %v4420_v16 = vld [vmem:[#allocation5 + $0x624] ss:$16 sps:$4 sm:$0xff]  }
  0xa7   :  { %1778 = vmatprep.subr.bf16.mxu0 %v4334_v18  ;;  %v5209_v18 = vld [vmem:[#allocation2 + $0x18] sm:$0xff] }
  0xa8   :  { %v5213_v19 = vcombine.high %v5209_v18, %v5209_v18 }
  0xa9   :  { %1861 = vmatpush1.bf16.msra.mxu1 %v4335_v21  ;;  %v4421_v21 = vld [vmem:[#allocation5 + $0x228] ss:$16 sps:$4 sm:$0xff]  }
  0xaa   :  { %1779 = vmatpush1.bf16.msra.mxu0 %v4332_v20  ;;  %1862 = vmatprep.subr.bf16.mxu1 %v4343_v23  ;;  %v4418_v20 = vld [vmem:[#allocation5 + $0x620] ss:$16 sps:$4 sm:$0xff]   ;;  %v4429_v23 = vld [vmem:[#allocation5 + $0x24c] ss:$16 sps:$4 sm:$0xff]  }
  0xab   :  { %1780 = vmatprep.subr.bf16.mxu0 %v4340_v22  ;;  %v4426_v22 = vld [vmem:[#allocation5 + $0x644] ss:$16 sps:$4 sm:$0xff]  }
  0xad   :  { %1863 = vmatpush1.bf16.msra.mxu1 %v4341_v25  ;;  %v4427_v25 = vld [vmem:[#allocation5 + $0x248] ss:$16 sps:$4 sm:$0xff]  }
  0xae   :  { %1781 = vmatpush1.bf16.msra.mxu0 %v4338_v24  ;;  %1864 = vmatprep.subr.bf16.mxu1 %v4349_v27  ;;  %v4424_v24 = vld [vmem:[#allocation5 + $0x640] ss:$16 sps:$4 sm:$0xff]  }
  0xaf   :  { %1782 = vmatprep.subr.bf16.mxu0 %v4346_v26  ;;  %v4432_v26 = vld [vmem:[#allocation5 + $0x664] ss:$16 sps:$4 sm:$0xff]   ;;  %v4430_v27 = vld [vmem:[#allocation5 + $0x660] ss:$16 sps:$4 sm:$0xff]  }
  0xb1   :  { %1865 = vmatpush1.bf16.msra.mxu1 %v4347_v29  ;;  %v4438_v29 = vld [vmem:[#allocation5 + $0x684] ss:$16 sps:$4 sm:$0xff]  }
  0xb2   :  { %1783 = vmatpush1.bf16.msra.mxu0 %v4344_v28  ;;  %1866 = vmatprep.subr.bf16.mxu1 %v4355_v31  ;;  %v4433_v28 = vld [vmem:[#allocation5 + $0x268] ss:$16 sps:$4 sm:$0xff]   ;;  %v4436_v31 = vld [vmem:[#allocation5 + $0x680] ss:$16 sps:$4 sm:$0xff]  }
  0xb3   :  { %1784 = vmatprep.subr.bf16.mxu0 %v4352_v30  ;;  %v4441_v30 = vld [vmem:[#allocation5 + $0x28c] ss:$16 sps:$4 sm:$0xff]  }
  0xb5   :  { %1867 = vmatpush1.bf16.msra.mxu1 %v4353_v35  ;;  %v4442_v35 = vld [vmem:[#allocation5 + $0x6a0] ss:$16 sps:$4 sm:$0xff]  }
  0xb6   :  { %1785 = vmatpush1.bf16.msra.mxu0 %v4350_v33  ;;  %1868 = vmatprep.subr.bf16.mxu1 %v4361_v37  ;;  %v4447_v33 = vld [vmem:[#allocation5 + $0x2ac] ss:$16 sps:$4 sm:$0xff]   ;;  %v4450_v37 = vld [vmem:[#allocation5 + $0x6c4] ss:$16 sps:$4 sm:$0xff]  }
  0xb7   :  { %1786 = vmatprep.subr.bf16.mxu0 %v4358_v36  ;;  %v4445_v36 = vld [vmem:[#allocation5 + $0x2a8] ss:$16 sps:$4 sm:$0xff]  }
  0xb9   :  { %1869 = vmatpush1.bf16.msra.mxu1 %v4359_v39  ;;  %v4448_v39 = vld [vmem:[#allocation5 + $0x6c0] ss:$16 sps:$4 sm:$0xff]  }
  0xba   :  { %1787 = vmatpush1.bf16.msra.mxu0 %v4356_v38  ;;  %1870 = vmatprep.subr.bf16.mxu1 %v4367_v41  ;;  %v4453_v38 = vld [vmem:[#allocation5 + $0x2cc] ss:$16 sps:$4 sm:$0xff]   ;;  %v4456_v41 = vld [vmem:[#allocation5 + $0x6e4] ss:$16 sps:$4 sm:$0xff]  }
  0xbb   :  { %1788 = vmatprep.subr.bf16.mxu0 %v4364_v40  ;;  %v4451_v40 = vld [vmem:[#allocation5 + $0x2c8] ss:$16 sps:$4 sm:$0xff]  }
  0xbd   :  { %1871 = vmatpush1.bf16.msra.mxu1 %v4365_v43  ;;  %v4454_v43 = vld [vmem:[#allocation5 + $0x6e0] ss:$16 sps:$4 sm:$0xff]  }
  0xbe   :  { %1789 = vmatpush1.bf16.msra.mxu0 %v4362_v42  ;;  %1872 = vmatprep.subr.bf16.mxu1 %v4373_v45  ;;  %v4459_v42 = vld [vmem:[#allocation5 + $0x2ec] ss:$16 sps:$4 sm:$0xff]   ;;  %v4462_v45 = vld [vmem:[#allocation5 + $0x704] ss:$16 sps:$4 sm:$0xff]  }
  0xbf   :  { %1790 = vmatprep.subr.bf16.mxu0 %v4370_v44  ;;  %v4457_v44 = vld [vmem:[#allocation5 + $0x2e8] ss:$16 sps:$4 sm:$0xff]  }
  0xc1   :  { %1873 = vmatpush1.bf16.msra.mxu1 %v4371_v47  ;;  %v4460_v47 = vld [vmem:[#allocation5 + $0x700] ss:$16 sps:$4 sm:$0xff]  }
  0xc2   :  { %1791 = vmatpush1.bf16.msra.mxu0 %v4368_v46  ;;  %1874 = vmatprep.subr.bf16.mxu1 %v4379_v49  ;;  %v4465_v46 = vld [vmem:[#allocation5 + $0x30c] ss:$16 sps:$4 sm:$0xff]   ;;  %v4468_v49 = vld [vmem:[#allocation5 + $0x724] ss:$16 sps:$4 sm:$0xff]  }
  0xc3   :  { %1792 = vmatprep.subr.bf16.mxu0 %v4376_v48  ;;  %v4463_v48 = vld [vmem:[#allocation5 + $0x308] ss:$16 sps:$4 sm:$0xff]  }
  0xc5   :  { %1875 = vmatpush1.bf16.msra.mxu1 %v4377_v52  ;;  %v4466_v52 = vld [vmem:[#allocation5 + $0x720] ss:$16 sps:$4 sm:$0xff]  }
  0xc6   :  { %1793 = vmatpush1.bf16.msra.mxu0 %v4374_v50  ;;  %1876 = vmatprep.subr.bf16.mxu1 %v4385_v54  ;;  %v4471_v50 = vld [vmem:[#allocation5 + $0x32c] ss:$16 sps:$4 sm:$0xff]   ;;  %v4474_v54 = vld [vmem:[#allocation5 + $0x744] ss:$16 sps:$4 sm:$0xff]  }
  0xc7   :  { %1794 = vmatprep.subr.bf16.mxu0 %v4382_v53  ;;  %v4469_v53 = vld [vmem:[#allocation5 + $0x328] ss:$16 sps:$4 sm:$0xff]  }
  0xc9   :  { %1877 = vmatpush1.bf16.msra.mxu1 %v4383_v56  ;;  %v4472_v56 = vld [vmem:[#allocation5 + $0x740] ss:$16 sps:$4 sm:$0xff]  }
  0xca   :  { %1795 = vmatpush1.bf16.msra.mxu0 %v4380_v55  ;;  %1878 = vmatprep.subr.bf16.mxu1 %v4391_v58  ;;  %v4477_v55 = vld [vmem:[#allocation5 + $0x34c] ss:$16 sps:$4 sm:$0xff]   ;;  %v4480_v58 = vld [vmem:[#allocation5 + $0x764] ss:$16 sps:$4 sm:$0xff]  }
  0xcb   :  { %1796 = vmatprep.subr.bf16.mxu0 %v4388_v57  ;;  %v4475_v57 = vld [vmem:[#allocation5 + $0x348] ss:$16 sps:$4 sm:$0xff]  }
  0xcd   :  { %1879 = vmatpush1.bf16.msra.mxu1 %v4389_v60  ;;  %v4478_v60 = vld [vmem:[#allocation5 + $0x760] ss:$16 sps:$4 sm:$0xff]  }
  0xce   :  { %1797 = vmatpush1.bf16.msra.mxu0 %v4386_v59  ;;  %1880 = vmatprep.subr.bf16.mxu1 %v4397_v62  ;;  %v4483_v59 = vld [vmem:[#allocation5 + $0x36c] ss:$16 sps:$4 sm:$0xff]   ;;  %v4486_v62 = vld [vmem:[#allocation5 + $0x784] ss:$16 sps:$4 sm:$0xff]  }
  0xcf   :  { %1798 = vmatprep.subr.bf16.mxu0 %v4394_v61  ;;  %v4481_v61 = vld [vmem:[#allocation5 + $0x368] ss:$16 sps:$4 sm:$0xff]  }
  0xd1   :  { %1881 = vmatpush1.bf16.msra.mxu1 %v4395_v0  ;;  %v4484_v0 = vld [vmem:[#allocation5 + $0x780] ss:$16 sps:$4 sm:$0xff]  }
  0xd2   :  { %1799 = vmatpush1.bf16.msra.mxu0 %v4392_v63  ;;  %1882 = vmatprep.subr.bf16.mxu1 %v4403_v2  ;;  %v4489_v63 = vld [vmem:[#allocation5 + $0x38c] ss:$16 sps:$4 sm:$0xff]   ;;  %v4492_v2 = vld [vmem:[#allocation5 + $0x7a4] ss:$16 sps:$4 sm:$0xff]  }
  0xd3   :  { %1800 = vmatprep.subr.bf16.mxu0 %v4400_v1  ;;  %v4487_v1 = vld [vmem:[#allocation5 + $0x388] ss:$16 sps:$4 sm:$0xff]  }
  0xd5   :  { %1883 = vmatpush1.bf16.msra.mxu1 %v4401_v4  ;;  %v4490_v4 = vld [vmem:[#allocation5 + $0x7a0] ss:$16 sps:$4 sm:$0xff]  }
  0xd6   :  { %1801 = vmatpush1.bf16.msra.mxu0 %v4398_v3  ;;  %1884 = vmatprep.subr.bf16.mxu1 %v4409_v8  ;;  %v4495_v3 = vld [vmem:[#allocation5 + $0x3ac] ss:$16 sps:$4 sm:$0xff]   ;;  %v4498_v8 = vld [vmem:[#allocation5 + $0x7c4] ss:$16 sps:$4 sm:$0xff]  }
  0xd7   :  { %1802 = vmatprep.subr.bf16.mxu0 %v4406_v5  ;;  %v4493_v5 = vld [vmem:[#allocation5 + $0x3a8] ss:$16 sps:$4 sm:$0xff]  }
  0xd9   :  { %1885 = vmatpush1.bf16.msra.mxu1 %v4407_v10  ;;  %v4496_v10 = vld [vmem:[#allocation5 + $0x7c0] ss:$16 sps:$4 sm:$0xff]  }
  0xda   :  { %1803 = vmatpush1.bf16.msra.mxu0 %v4404_v9  ;;  %1895 = vmatprep.subr.bf16.mxu1 %v4417_v12  ;;  %v4501_v9 = vld [vmem:[#allocation5 + $0x3cc] ss:$16 sps:$4 sm:$0xff]   ;;  %v4504_v12 = vld [vmem:[#allocation5 + $0x7e4] ss:$16 sps:$4 sm:$0xff]  }
  0xdb   :  { %1813 = vmatprep.subr.bf16.mxu0 %v4414_v11  ;;  %v4499_v11 = vld [vmem:[#allocation5 + $0x3c8] ss:$16 sps:$4 sm:$0xff]  }
  0xdc   :  { %1887 = vmatmul.mubr.bf16.vlgmr.msra.gmra.mrb[4].mxu1 %v5191_v6  ;;  %v4435_v6 = vld [vmem:[#allocation5 + $0x26c] ss:$16 sps:$4 sm:$0xff]  }
  0xdd   :  { %1805 = vmatmul.mubr.bf16.vlgmr.msra.gmra.mrb[0].mxu0 %v5207_v13  ;;  %1896 = vmatpush1.bf16.msra.mxu1 %v4415_v15  ;;  %v4502_v15 = vld [vmem:[#allocation5 + $0x7e0] ss:$16 sps:$4 sm:$0xff]  }
  0xde   :  { %1814 = vmatpush1.bf16.msra.mxu0 %v4412_v14  ;;  %1897 = vmatprep.subr.bf16.mxu1 %v4423_v17  ;;  %v4507_v14 = vld [vmem:[#allocation5 + $0x3ec] ss:$16 sps:$4 sm:$0xff]  }
  0xdf   :  { %1815 = vmatprep.subr.bf16.mxu0 %v4420_v16  ;;  %1845 = vmatprep.mubr.bf16.mxu0 %v5213_v19  ;;  %v4505_v16 = vld [vmem:[#allocation5 + $0x3e8] ss:$16 sps:$4 sm:$0xff]   ;;  %v4512_v17 = vld [vmem:[#allocation5 + $0x40c] ss:$16 sps:$4 sm:$0xff]  }
  0xe0   :  { %1927 = vmatprep.mubr.bf16.mxu1 %v5187_v51  ;;  %v4444_v51 = vld [vmem:[#allocation5 + $0x6a4] ss:$16 sps:$4 sm:$0xff]  }
  0xe1   :  { %1898 = vmatpush1.bf16.msra.mxu1 %v4421_v21  ;;  %v5221_v21 = vcombine.low %v5209_v18, %v5209_v18  ;;  %v4612_v18 = vld [vmem:[#allocation7 + $0x20] ss:$16 sps:$4 sm:$0xff]  }
  0xe2   :  { %1816 = vmatpush1.bf16.msra.mxu0 %v4418_v20  ;;  %1899 = vmatprep.subr.bf16.mxu1 %v4429_v23  ;;  %v4510_v20 = vld [vmem:[#allocation5 + $0x408] ss:$16 sps:$4 sm:$0xff]   ;;  %v4606_v23 = vld [vmem:[#allocation7] ss:$16 sps:$4 sm:$0xff]  }
  0xe3   :  { %1817 = vmatprep.subr.bf16.mxu0 %v4426_v22  ;;  %v4515_v22 = vld [vmem:[#allocation5 + $0x42c] ss:$16 sps:$4 sm:$0xff]  }
  0xe5   :  { %1900 = vmatpush1.bf16.msra.mxu1 %v4427_v25  ;;  %v4513_v25 = vld [vmem:[#allocation5 + $0x428] ss:$16 sps:$4 sm:$0xff]  }
  0xe6   :  { %1818 = vmatpush1.bf16.msra.mxu0 %v4424_v24  ;;  %1901 = vmatprep.subr.bf16.mxu1 %v4435_v6  ;;  %v4608_v24 = vld [vmem:[#allocation7 + $0x4] ss:$16 sps:$4 sm:$0xff]   ;;  %v4518_v6 = vld [vmem:[#allocation5 + $0x44c] ss:$16 sps:$4 sm:$0xff]  }
  0xe7   :  { %1819 = vmatprep.subr.bf16.mxu0 %v4432_v26  ;;  %v4614_v26 = vld [vmem:[#allocation7 + $0x24] ss:$16 sps:$4 sm:$0xff]  }
  0xe9   :  { %1902 = vmatpush1.bf16.msra.mxu1 %v4433_v28  ;;  %v4521_v28 = vld [vmem:[#allocation5 + $0x46c] ss:$16 sps:$4 sm:$0xff]  }
  0xea   :  { %1820 = vmatpush1.bf16.msra.mxu0 %v4430_v27  ;;  %1903 = vmatprep.subr.bf16.mxu1 %v4441_v30  ;;  %v4516_v27 = vld [vmem:[#allocation5 + $0x448] ss:$16 sps:$4 sm:$0xff]   ;;  %v4618_v30 = vld [vmem:[#allocation7 + $0x40] ss:$16 sps:$4 sm:$0xff]  }
  0xeb   :  { %1821 = vmatprep.subr.bf16.mxu0 %v4438_v29  ;;  %v4620_v29 = vld [vmem:[#allocation7 + $0x44] ss:$16 sps:$4 sm:$0xff]  }
  0xed   :  { %1904 = vmatpush1.bf16.msra.mxu1 %v4439_v32  ;;  %v4626_v32 = vld [vmem:[#allocation7 + $0x64] ss:$16 sps:$4 sm:$0xff]  }
  0xee   :  { %1822 = vmatpush1.bf16.msra.mxu0 %v4436_v31  ;;  %1905 = vmatprep.subr.bf16.mxu1 %v4447_v33  ;;  %v4524_v31 = vld [vmem:[#allocation5 + $0x48c] ss:$16 sps:$4 sm:$0xff]  }
  0xef   :  { %1823 = vmatprep.subr.bf16.mxu0 %v4444_v51  ;;  %v4522_v51 = vld [vmem:[#allocation5 + $0x488] ss:$16 sps:$4 sm:$0xff]   ;;  %v4527_v33 = vld [vmem:[#allocation5 + $0x4ac] ss:$16 sps:$4 sm:$0xff]  }
  0xf1   :  { %1906 = vmatpush1.bf16.msra.mxu1 %v4445_v36  ;;  %v4630_v36 = vld [vmem:[#allocation7 + $0x80] ss:$16 sps:$4 sm:$0xff]  }
  0xf2   :  { %1824 = vmatpush1.bf16.msra.mxu0 %v4442_v35  ;;  %1907 = vmatprep.subr.bf16.mxu1 %v4453_v38  ;;  %v4632_v35 = vld [vmem:[#allocation7 + $0x84] ss:$16 sps:$4 sm:$0xff]   ;;  %v4530_v38 = vld [vmem:[#allocation5 + $0x4cc] ss:$16 sps:$4 sm:$0xff]  }
  0xf3   :  { %1825 = vmatprep.subr.bf16.mxu0 %v4450_v37  ;;  %v4525_v37 = vld [vmem:[#allocation5 + $0x4a8] ss:$16 sps:$4 sm:$0xff]  }
  0xf5   :  { %1908 = vmatpush1.bf16.msra.mxu1 %v4451_v40  ;;  %v4636_v40 = vld [vmem:[#allocation7 + $0xa0] ss:$16 sps:$4 sm:$0xff]  }
  0xf6   :  { %1826 = vmatpush1.bf16.msra.mxu0 %v4448_v39  ;;  %1909 = vmatprep.subr.bf16.mxu1 %v4459_v42  ;;  %v4638_v39 = vld [vmem:[#allocation7 + $0xa4] ss:$16 sps:$4 sm:$0xff]   ;;  %v4533_v42 = vld [vmem:[#allocation5 + $0x4ec] ss:$16 sps:$4 sm:$0xff]  }
  0xf7   :  { %1827 = vmatprep.subr.bf16.mxu0 %v4456_v41  ;;  %v4528_v41 = vld [vmem:[#allocation5 + $0x4c8] ss:$16 sps:$4 sm:$0xff]  }
  0xf9   :  { %1910 = vmatpush1.bf16.msra.mxu1 %v4457_v44  ;;  %v4642_v44 = vld [vmem:[#allocation7 + $0xc0] ss:$16 sps:$4 sm:$0xff]  }
  0xfa   :  { %1828 = vmatpush1.bf16.msra.mxu0 %v4454_v43  ;;  %1911 = vmatprep.subr.bf16.mxu1 %v4465_v46  ;;  %v4644_v43 = vld [vmem:[#allocation7 + $0xc4] ss:$16 sps:$4 sm:$0xff]   ;;  %v4536_v46 = vld [vmem:[#allocation5 + $0x50c] ss:$16 sps:$4 sm:$0xff]  }
  0xfb   :  { %1829 = vmatprep.subr.bf16.mxu0 %v4462_v45  ;;  %v4531_v45 = vld [vmem:[#allocation5 + $0x4e8] ss:$16 sps:$4 sm:$0xff]  }
  0xfd   :  { %1912 = vmatpush1.bf16.msra.mxu1 %v4463_v48  ;;  %v4648_v48 = vld [vmem:[#allocation7 + $0xe0] ss:$16 sps:$4 sm:$0xff]  }
  0xfe   :  { %1830 = vmatpush1.bf16.msra.mxu0 %v4460_v47  ;;  %1913 = vmatprep.subr.bf16.mxu1 %v4471_v50  ;;  %v4650_v47 = vld [vmem:[#allocation7 + $0xe4] ss:$16 sps:$4 sm:$0xff]   ;;  %v4539_v50 = vld [vmem:[#allocation5 + $0x52c] ss:$16 sps:$4 sm:$0xff]  }
  0xff   :  { %1831 = vmatprep.subr.bf16.mxu0 %v4468_v49  ;;  %v4534_v49 = vld [vmem:[#allocation5 + $0x508] ss:$16 sps:$4 sm:$0xff]  }
 0x101   :  { %1914 = vmatpush1.bf16.msra.mxu1 %v4469_v53  ;;  %v4654_v53 = vld [vmem:[#allocation7 + $0x100] ss:$16 sps:$4 sm:$0xff]  }
 0x102   :  { %1832 = vmatpush1.bf16.msra.mxu0 %v4466_v52  ;;  %1915 = vmatprep.subr.bf16.mxu1 %v4477_v55  ;;  %v4656_v52 = vld [vmem:[#allocation7 + $0x104] ss:$16 sps:$4 sm:$0xff]   ;;  %v4542_v55 = vld [vmem:[#allocation5 + $0x54c] ss:$16 sps:$4 sm:$0xff]  }
 0x103   :  { %1833 = vmatprep.subr.bf16.mxu0 %v4474_v54  ;;  %v4537_v54 = vld [vmem:[#allocation5 + $0x528] ss:$16 sps:$4 sm:$0xff]  }
 0x105   :  { %1916 = vmatpush1.bf16.msra.mxu1 %v4475_v57  ;;  %v4660_v57 = vld [vmem:[#allocation7 + $0x120] ss:$16 sps:$4 sm:$0xff]  }
 0x106   :  { %1834 = vmatpush1.bf16.msra.mxu0 %v4472_v56  ;;  %1917 = vmatprep.subr.bf16.mxu1 %v4483_v59  ;;  %v4662_v56 = vld [vmem:[#allocation7 + $0x124] ss:$16 sps:$4 sm:$0xff]   ;;  %v4545_v59 = vld [vmem:[#allocation5 + $0x56c] ss:$16 sps:$4 sm:$0xff]  }
 0x107   :  { %1835 = vmatprep.subr.bf16.mxu0 %v4480_v58  ;;  %v4540_v58 = vld [vmem:[#allocation5 + $0x548] ss:$16 sps:$4 sm:$0xff]  }
 0x109   :  { %1918 = vmatpush1.bf16.msra.mxu1 %v4481_v61  ;;  %v4666_v61 = vld [vmem:[#allocation7 + $0x140] ss:$16 sps:$4 sm:$0xff]  }
 0x10a   :  { %1836 = vmatpush1.bf16.msra.mxu0 %v4478_v60  ;;  %1919 = vmatprep.subr.bf16.mxu1 %v4489_v63  ;;  %v4668_v60 = vld [vmem:[#allocation7 + $0x144] ss:$16 sps:$4 sm:$0xff]   ;;  %v4548_v63 = vld [vmem:[#allocation5 + $0x58c] ss:$16 sps:$4 sm:$0xff]  }
 0x10b   :  { %1837 = vmatprep.subr.bf16.mxu0 %v4486_v62  ;;  %v4543_v62 = vld [vmem:[#allocation5 + $0x568] ss:$16 sps:$4 sm:$0xff]  }
 0x10d   :  { %1920 = vmatpush1.bf16.msra.mxu1 %v4487_v1  ;;  %v4672_v1 = vld [vmem:[#allocation7 + $0x160] ss:$16 sps:$4 sm:$0xff]  }
 0x10e   :  { %1838 = vmatpush1.bf16.msra.mxu0 %v4484_v0  ;;  %1921 = vmatprep.subr.bf16.mxu1 %v4495_v3  ;;  %v4674_v0 = vld [vmem:[#allocation7 + $0x164] ss:$16 sps:$4 sm:$0xff]   ;;  %v4551_v3 = vld [vmem:[#allocation5 + $0x5ac] ss:$16 sps:$4 sm:$0xff]  }
 0x10f   :  { %1839 = vmatprep.subr.bf16.mxu0 %v4492_v2  ;;  %v4546_v2 = vld [vmem:[#allocation5 + $0x588] ss:$16 sps:$4 sm:$0xff]  }
 0x111   :  { %1922 = vmatpush1.bf16.msra.mxu1 %v4493_v5  ;;  %v4678_v5 = vld [vmem:[#allocation7 + $0x180] ss:$16 sps:$4 sm:$0xff]  }
 0x112   :  { %1840 = vmatpush1.bf16.msra.mxu0 %v4490_v4  ;;  %1923 = vmatprep.subr.bf16.mxu1 %v4501_v9  ;;  %v4680_v4 = vld [vmem:[#allocation7 + $0x184] ss:$16 sps:$4 sm:$0xff]   ;;  %v4554_v9 = vld [vmem:[#allocation5 + $0x5cc] ss:$16 sps:$4 sm:$0xff]  }
 0x113   :  { %1841 = vmatprep.subr.bf16.mxu0 %v4498_v8  ;;  %v4549_v8 = vld [vmem:[#allocation5 + $0x5a8] ss:$16 sps:$4 sm:$0xff]  }
 0x115   :  { %1924 = vmatpush1.bf16.msra.mxu1 %v4499_v11  ;;  %v4684_v11 = vld [vmem:[#allocation7 + $0x1a0] ss:$16 sps:$4 sm:$0xff]  }
 0x116   :  { %1842 = vmatpush1.bf16.msra.mxu0 %v4496_v10  ;;  %1925 = vmatprep.subr.bf16.mxu1 %v4507_v14  ;;  %v4686_v10 = vld [vmem:[#allocation7 + $0x1a4] ss:$16 sps:$4 sm:$0xff]   ;;  %v4557_v14 = vld [vmem:[#allocation5 + $0x5ec] ss:$16 sps:$4 sm:$0xff]  }
 0x117   :  { %1843 = vmatprep.subr.bf16.mxu0 %v4504_v12  ;;  %v4552_v12 = vld [vmem:[#allocation5 + $0x5c8] ss:$16 sps:$4 sm:$0xff]  }
 0x119   :  { %1926 = vmatpush1.bf16.msra.mxu1 %v4505_v16  ;;  %v4560_v16 = vld [vmem:[#allocation5 + $0x60c] ss:$16 sps:$4 sm:$0xff]  }
 0x11a   :  { %1844 = vmatpush1.bf16.msra.mxu0 %v4502_v15  ;;  %1936 = vmatprep.subr.bf16.mxu1 %v4512_v17  ;;  %v4555_v15 = vld [vmem:[#allocation5 + $0x5e8] ss:$16 sps:$4 sm:$0xff]  }
 0x11b   :  { %2816 = vmatprep.subr.bf16.mxu0 %v4608_v24  ;;  %v4558_v17 = vld [vmem:[#allocation5 + $0x608] ss:$16 sps:$4 sm:$0xff]  }
 0x11c   :  { %1928 = vmatmul.mubr.bf16.vlgmr.msra.gmra.mrb[4].mxu1 %v5193_v7  ;;  %v4519_v7 = vld [vmem:[#allocation5 + $0x468] ss:$16 sps:$4 sm:$0xff]  }
 0x11d   :  { %1846 = vmatmul.mubr.bf16.vlgmr.msra.gmra.mrb[0].mxu0 %v5221_v21  ;;  %1937 = vmatpush1.bf16.msra.mxu1 %v4510_v20  ;;  %v4563_v20 = vld [vmem:[#allocation5 + $0x62c] ss:$16 sps:$4 sm:$0xff]   ;;  %v4564_v24 = vld [vmem:[#allocation5 + $0x648] ss:$16 sps:$4 sm:$0xff]  }
 0x11e   :  { %1968 = vmatprep.mubr.bf16.mxu1 %v5202_v34  ;;  %1938 = vmatprep.subr.bf16.mxu1 %v4515_v22  ;;  %v4624_v34 = vld [vmem:[#allocation7 + $0x60] ss:$16 sps:$4 sm:$0xff]   ;;  %v4561_v22 = vld [vmem:[#allocation5 + $0x628] ss:$16 sps:$4 sm:$0xff]  }
 0x11f   :  { %2817 = vmatpush1.bf16.msra.mxu0 %v4606_v23  ;;  %v4566_v23 = vld [vmem:[#allocation5 + $0x64c] ss:$16 sps:$4 sm:$0xff]  }
 0x120   :  { %2818 = vmatprep.subr.bf16.mxu0 %v4614_v26  ;;  %v4567_v26 = vld [vmem:[#allocation5 + $0x668] ss:$16 sps:$4 sm:$0xff]  }
 0x121   :  { %1939 = vmatpush1.bf16.msra.mxu1 %v4513_v25  ;;  %v4569_v25 = vld [vmem:[#allocation5 + $0x66c] ss:$16 sps:$4 sm:$0xff]  }
 0x122   :  { %1940 = vmatprep.subr.bf16.mxu1 %v4518_v6  ;;  %v4572_v6 = vld [vmem:[#allocation5 + $0x68c] ss:$16 sps:$4 sm:$0xff]  }
 0x123   :  { %2819 = vmatpush1.bf16.msra.mxu0 %v4612_v18  ;;  %v4570_v18 = vld [vmem:[#allocation5 + $0x688] ss:$16 sps:$4 sm:$0xff]  }
 0x124   :  { %2820 = vmatprep.subr.bf16.mxu0 %v4620_v29  ;;  %v4692_v29 = vld [vmem:[#allocation7 + $0x1c4] ss:$16 sps:$4 sm:$0xff]  }
 0x125   :  { %1941 = vmatpush1.bf16.msra.mxu1 %v4516_v27  ;;  %v4575_v27 = vld [vmem:[#allocation5 + $0x6ac] ss:$16 sps:$4 sm:$0xff]  }
 0x126   :  { %1942 = vmatprep.subr.bf16.mxu1 %v4521_v28  ;;  %v4573_v28 = vld [vmem:[#allocation5 + $0x6a8] ss:$16 sps:$4 sm:$0xff]  }
 0x127   :  { %2821 = vmatpush1.bf16.msra.mxu0 %v4618_v30 }
 0x128   :  { %2822 = vmatprep.subr.bf16.mxu0 %v4626_v32  ;;  %v4576_v32 = vld [vmem:[#allocation5 + $0x6c8] ss:$16 sps:$4 sm:$0xff]  }
 0x129   :  { %1943 = vmatpush1.bf16.msra.mxu1 %v4519_v7 }
 0x12a   :  { %1944 = vmatprep.subr.bf16.mxu1 %v4524_v31 }
 0x12b   :  { %2823 = vmatpush1.bf16.msra.mxu0 %v4624_v34 }
 0x12c   :  { %2824 = vmatprep.subr.bf16.mxu0 %v4632_v35  ;;  %v4696_v35 = vld [vmem:[#allocation7 + $0x1e0] ss:$16 sps:$4 sm:$0xff]  }
 0x12d   :  { %1945 = vmatpush1.bf16.msra.mxu1 %v4522_v51  ;;  %v4581_v51 = vld [vmem:[#allocation5 + $0x6ec] ss:$16 sps:$4 sm:$0xff]  }
 0x12e   :  { %1946 = vmatprep.subr.bf16.mxu1 %v4527_v33  ;;  %v4698_v33 = vld [vmem:[#allocation7 + $0x1e4] ss:$16 sps:$4 sm:$0xff]  }
 0x12f   :  { %2825 = vmatpush1.bf16.msra.mxu0 %v4630_v36  ;;  %v4579_v36 = vld [vmem:[#allocation5 + $0x6e8] ss:$16 sps:$4 sm:$0xff]  }
 0x130   :  { %2826 = vmatprep.subr.bf16.mxu0 %v4638_v39  ;;  %v4582_v39 = vld [vmem:[#allocation5 + $0x708] ss:$16 sps:$4 sm:$0xff]  }
 0x131   :  { %1947 = vmatpush1.bf16.msra.mxu1 %v4525_v37  ;;  %v4584_v37 = vld [vmem:[#allocation5 + $0x70c] ss:$16 sps:$4 sm:$0xff]  }
 0x132   :  { %1948 = vmatprep.subr.bf16.mxu1 %v4530_v38  ;;  %v4704_v38 = vld [vmem:[#allocation7 + $0x204] ss:$16 sps:$4 sm:$0xff]  }
 0x133   :  { %2827 = vmatpush1.bf16.msra.mxu0 %v4636_v40  ;;  %v4587_v40 = vld [vmem:[#allocation5 + $0x72c] ss:$16 sps:$4 sm:$0xff]  }
 0x134   :  { %2828 = vmatprep.subr.bf16.mxu0 %v4644_v43  ;;  %v4588_v43 = vld [vmem:[#allocation5 + $0x748] ss:$16 sps:$4 sm:$0xff]  }
 0x135   :  { %1949 = vmatpush1.bf16.msra.mxu1 %v4528_v41  ;;  %v4585_v41 = vld [vmem:[#allocation5 + $0x728] ss:$16 sps:$4 sm:$0xff]  }
 0x136   :  { %1950 = vmatprep.subr.bf16.mxu1 %v4533_v42  ;;  %v4590_v42 = vld [vmem:[#allocation5 + $0x74c] ss:$16 sps:$4 sm:$0xff]  }
 0x137   :  { %2829 = vmatpush1.bf16.msra.mxu0 %v4642_v44  ;;  %v4593_v44 = vld [vmem:[#allocation5 + $0x76c] ss:$16 sps:$4 sm:$0xff]  }
 0x138   :  { %2830 = vmatprep.subr.bf16.mxu0 %v4650_v47  ;;  %v4594_v47 = vld [vmem:[#allocation5 + $0x788] ss:$16 sps:$4 sm:$0xff]  }
 0x139   :  { %1951 = vmatpush1.bf16.msra.mxu1 %v4531_v45  ;;  %v4591_v45 = vld [vmem:[#allocation5 + $0x768] ss:$16 sps:$4 sm:$0xff]  }
 0x13a   :  { %1952 = vmatprep.subr.bf16.mxu1 %v4536_v46  ;;  %v4596_v46 = vld [vmem:[#allocation5 + $0x78c] ss:$16 sps:$4 sm:$0xff]  }
 0x13b   :  { %2831 = vmatpush1.bf16.msra.mxu0 %v4648_v48  ;;  %v4599_v48 = vld [vmem:[#allocation5 + $0x7ac] ss:$16 sps:$4 sm:$0xff]  }
 0x13c   :  { %2832 = vmatprep.subr.bf16.mxu0 %v4656_v52  ;;  %v4600_v52 = vld [vmem:[#allocation5 + $0x7c8] ss:$16 sps:$4 sm:$0xff]  }
 0x13d   :  { %1953 = vmatpush1.bf16.msra.mxu1 %v4534_v49  ;;  %v4597_v49 = vld [vmem:[#allocation5 + $0x7a8] ss:$16 sps:$4 sm:$0xff]  }
 0x13e   :  { %1954 = vmatprep.subr.bf16.mxu1 %v4539_v50  ;;  %v4602_v50 = vld [vmem:[#allocation5 + $0x7cc] ss:$16 sps:$4 sm:$0xff]  }
 0x13f   :  { %2833 = vmatpush1.bf16.msra.mxu0 %v4654_v53  ;;  %v4605_v53 = vld [vmem:[#allocation5 + $0x7ec] ss:$16 sps:$4 sm:$0xff]  }
 0x140   :  { %2834 = vmatprep.subr.bf16.mxu0 %v4662_v56  ;;  %v4609_v56 = vld [vmem:[#allocation7 + $0x8] ss:$16 sps:$4 sm:$0xff]  }
 0x141   :  { %1955 = vmatpush1.bf16.msra.mxu1 %v4537_v54  ;;  %v4603_v54 = vld [vmem:[#allocation5 + $0x7e8] ss:$16 sps:$4 sm:$0xff]  }
 0x142   :  { %1956 = vmatprep.subr.bf16.mxu1 %v4542_v55  ;;  %v4611_v55 = vld [vmem:[#allocation7 + $0xc] ss:$16 sps:$4 sm:$0xff]  }
 0x143   :  { %2835 = vmatpush1.bf16.msra.mxu0 %v4660_v57  ;;  %v4617_v57 = vld [vmem:[#allocation7 + $0x2c] ss:$16 sps:$4 sm:$0xff]  }
 0x144   :  { %2836 = vmatprep.subr.bf16.mxu0 %v4668_v60  ;;  %v4621_v60 = vld [vmem:[#allocation7 + $0x48] ss:$16 sps:$4 sm:$0xff]  }
 0x145   :  { %1957 = vmatpush1.bf16.msra.mxu1 %v4540_v58  ;;  %v4615_v58 = vld [vmem:[#allocation7 + $0x28] ss:$16 sps:$4 sm:$0xff]  }
 0x146   :  { %1958 = vmatprep.subr.bf16.mxu1 %v4545_v59  ;;  %v4623_v59 = vld [vmem:[#allocation7 + $0x4c] ss:$16 sps:$4 sm:$0xff]  }
 0x147   :  { %2837 = vmatpush1.bf16.msra.mxu0 %v4666_v61  ;;  %v4629_v61 = vld [vmem:[#allocation7 + $0x6c] ss:$16 sps:$4 sm:$0xff]  }
 0x148   :  { %2838 = vmatprep.subr.bf16.mxu0 %v4674_v0  ;;  %v4633_v0 = vld [vmem:[#allocation7 + $0x88] ss:$16 sps:$4 sm:$0xff]  }
 0x149   :  { %1959 = vmatpush1.bf16.msra.mxu1 %v4543_v62  ;;  %v4627_v62 = vld [vmem:[#allocation7 + $0x68] ss:$16 sps:$4 sm:$0xff]  }
 0x14a   :  { %1960 = vmatprep.subr.bf16.mxu1 %v4548_v63  ;;  %v4635_v63 = vld [vmem:[#allocation7 + $0x8c] ss:$16 sps:$4 sm:$0xff]  }
 0x14b   :  { %2839 = vmatpush1.bf16.msra.mxu0 %v4672_v1  ;;  %v4641_v1 = vld [vmem:[#allocation7 + $0xac] ss:$16 sps:$4 sm:$0xff]  }
 0x14c   :  { %2840 = vmatprep.subr.bf16.mxu0 %v4680_v4  ;;  %v4653_v4 = vld [vmem:[#allocation7 + $0xec] ss:$16 sps:$4 sm:$0xff]  }
 0x14d   :  { %1961 = vmatpush1.bf16.msra.mxu1 %v4546_v2  ;;  %v4639_v2 = vld [vmem:[#allocation7 + $0xa8] ss:$16 sps:$4 sm:$0xff]  }
 0x14e   :  { %1962 = vmatprep.subr.bf16.mxu1 %v4551_v3  ;;  %v4645_v3 = vld [vmem:[#allocation7 + $0xc8] ss:$16 sps:$4 sm:$0xff]  }
 0x14f   :  { %2841 = vmatpush1.bf16.msra.mxu0 %v4678_v5  ;;  %v4651_v5 = vld [vmem:[#allocation7 + $0xe8] ss:$16 sps:$4 sm:$0xff]  }
 0x150   :  { %2842 = vmatprep.subr.bf16.mxu0 %v4686_v10  ;;  %v4665_v10 = vld [vmem:[#allocation7 + $0x12c] ss:$16 sps:$4 sm:$0xff]  }
 0x151   :  { %1963 = vmatpush1.bf16.msra.mxu1 %v4549_v8  ;;  %v4659_v8 = vld [vmem:[#allocation7 + $0x10c] ss:$16 sps:$4 sm:$0xff]  }
 0x152   :  { %1964 = vmatprep.subr.bf16.mxu1 %v4554_v9  ;;  %v4657_v9 = vld [vmem:[#allocation7 + $0x108] ss:$16 sps:$4 sm:$0xff]  }
 0x153   :  { %2843 = vmatpush1.bf16.msra.mxu0 %v4684_v11  ;;  %v4663_v11 = vld [vmem:[#allocation7 + $0x128] ss:$16 sps:$4 sm:$0xff]  }
 0x154   :  { %2844 = vmatprep.subr.bf16.mxu0 %v4692_v29  ;;  %v5241_v29 = vld [vmem:[%s5300_s2] sm:$0xf] }
 0x155   :  { %1965 = vmatpush1.bf16.msra.mxu1 %v4552_v12  ;;  %v4671_v12 = vld [vmem:[#allocation7 + $0x14c] ss:$16 sps:$4 sm:$0xff]  }
 0x156   :  { %1966 = vmatprep.subr.bf16.mxu1 %v4557_v14  ;;  %v4669_v14 = vld [vmem:[#allocation7 + $0x148] ss:$16 sps:$4 sm:$0xff]  }
 0x159   :  { %1967 = vmatpush1.bf16.msra.mxu1 %v4555_v15  ;;  %v4677_v15 = vld [vmem:[#allocation7 + $0x16c] ss:$16 sps:$4 sm:$0xff]  }
 0x15a   :  { %1977 = vmatprep.subr.bf16.mxu1 %v4560_v16  ;;  %v4675_v16 = vld [vmem:[#allocation7 + $0x168] ss:$16 sps:$4 sm:$0xff]  }
 0x15c   :  { %1969 = vmatmul.mubr.bf16.vlgmr.msra.gmra.mrb[4].mxu1 %v5207_v13  ;;  %v4578_v13 = vld [vmem:[#allocation5 + $0x6cc] ss:$16 sps:$4 sm:$0xff]  }
 0x15d   :  { %1978 = vmatpush1.bf16.msra.mxu1 %v4558_v17  ;;  %2009 = vmatprep.mubr.bf16.mxu1 %v5213_v19  ;;  %v4690_v19 = vld [vmem:[#allocation7 + $0x1c0] ss:$16 sps:$4 sm:$0xff]   ;;  %v4683_v17 = vld [vmem:[#allocation7 + $0x18c] ss:$16 sps:$4 sm:$0xff]  }
 0x15e   :  { %1979 = vmatprep.subr.bf16.mxu1 %v4563_v20  ;;  %2845 = vmatpush1.bf16.msra.mxu0 %v4690_v19  ;;  %v4681_v20 = vld [vmem:[#allocation7 + $0x188] ss:$16 sps:$4 sm:$0xff]  }
 0x15f   :  { %2846 = vmatprep.subr.bf16.mxu0 %v4698_v33 }
 0x161   :  { %1980 = vmatpush1.bf16.msra.mxu1 %v4561_v22  ;;  %v4689_v22 = vld [vmem:[#allocation7 + $0x1ac] ss:$16 sps:$4 sm:$0xff]  }
 0x162   :  { %1981 = vmatprep.subr.bf16.mxu1 %v4566_v23  ;;  %2847 = vmatpush1.bf16.msra.mxu0 %v4696_v35  ;;  %v4687_v23 = vld [vmem:[#allocation7 + $0x1a8] ss:$16 sps:$4 sm:$0xff]  }
 0x163   :  { %2857 = vmatprep.subr.bf16.mxu0 %v4704_v38 }
 0x165   :  { %1982 = vmatpush1.bf16.msra.mxu1 %v4564_v24  ;;  %v4695_v24 = vld [vmem:[#allocation7 + $0x1cc] ss:$16 sps:$4 sm:$0xff]  }
 0x166   :  { %1983 = vmatprep.subr.bf16.mxu1 %v4569_v25  ;;  %v4693_v25 = vld [vmem:[#allocation7 + $0x1c8] ss:$16 sps:$4 sm:$0xff]  }
 0x169   :  { %1984 = vmatpush1.bf16.msra.mxu1 %v4567_v26  ;;  %v4701_v26 = vld [vmem:[#allocation7 + $0x1ec] ss:$16 sps:$4 sm:$0xff]  }
 0x16a   :  { %1985 = vmatprep.subr.bf16.mxu1 %v4572_v6  ;;  %v4699_v6 = vld [vmem:[#allocation7 + $0x1e8] ss:$16 sps:$4 sm:$0xff]  }
 0x16d   :  { %1986 = vmatpush1.bf16.msra.mxu1 %v4570_v18  ;;  %v4707_v18 = vld [vmem:[#allocation7 + $0x20c] ss:$16 sps:$4 sm:$0xff]  }
 0x16e   :  { %1987 = vmatprep.subr.bf16.mxu1 %v4575_v27  ;;  %v362_v27 = vlaneseq }
 0x16f   :  { %v5228_v30 = vpop.f32.mrb[0].mxu1 }
 0x170   :  { %v5230_v7 = vpop.f32.mrb[1].mxu1 }
 0x171   :  { %v1728_v31 = vpop.f32.mrb[2].mxu1  ;;  %1988 = vmatpush1.bf16.msra.mxu1 %v4573_v28  ;;  %v5233_v28 = vshrl.u32 %v362_v27, 7  ;;  %v4771_v27 = vld [vmem:[#allocation7 + $0x368] ss:$16 sps:$4 sm:$0xff]  }
 0x172   :  { %v1729_v34 = vpop.f32.mrb[3].mxu1  ;;  %1989 = vmatprep.subr.bf16.mxu1 %v4578_v13 }
 0x173   :  { %v5236_v13 = vsub.s32 0, %v5233_v28  ;;  %v5244_v19 = vsub.s32 1, %v5233_v28 }
 0x175   :  { %1990 = vmatpush1.bf16.msra.mxu1 %v4576_v32  ;;  %v365_v31 = vrot.slane %v5241_v29, %v5236_v13  ;;  %v369_v32 = vrot.slane %v5241_v29, %v5244_v19 }
 0x176   :  { %1991 = vmatprep.subr.bf16.mxu1 %v4581_v51 }
 0x177   :  { %v1725_v34 = vadd.f32 %v5228_v30, %v365_v31  ;;  %v1727_v51 = vadd.f32 %v5230_v7, %v369_v32  ;;  %v4708_v30 = vld [vmem:[#allocation7 + $0x220] ss:$16 sps:$4 sm:$0xff]   ;;  %v4711_v7 = vld [vmem:[#allocation7 + $0x228] ss:$16 sps:$4 sm:$0xff]   ;;  %v4776_v31 = vld [vmem:[#allocation7 + $0x384] ss:$16 sps:$4 sm:$0xff]  }
 0x178   :  { %v4779_v32 = vld [vmem:[#allocation7 + $0x38c] ss:$16 sps:$4 sm:$0xff]  }
 0x179   :  { %1992 = vmatpush1.bf16.msra.mxu1 %v4579_v36 }
 0x17a   :  { %1993 = vmatprep.subr.bf16.mxu1 %v4584_v37 }
 0x17d   :  { %1994 = vmatpush1.bf16.msra.mxu1 %v4582_v39 }
 0x17e   :  { %1995 = vmatprep.subr.bf16.mxu1 %v4587_v40 }
 0x181   :  { %1996 = vmatpush1.bf16.msra.mxu1 %v4585_v41 }
 0x182   :  { %1997 = vmatprep.subr.bf16.mxu1 %v4590_v42 }
 0x185   :  { %1998 = vmatpush1.bf16.msra.mxu1 %v4588_v43  ;;  %v4702_v43 = vld [vmem:[#allocation7 + $0x200] ss:$16 sps:$4 sm:$0xff]  }
 0x186   :  { %1999 = vmatprep.subr.bf16.mxu1 %v4593_v44  ;;  %v4705_v44 = vld [vmem:[#allocation7 + $0x208] ss:$16 sps:$4 sm:$0xff]  }
 0x189   :  { %2000 = vmatpush1.bf16.msra.mxu1 %v4591_v45 }
 0x18a   :  { %2001 = vmatprep.subr.bf16.mxu1 %v4596_v46  ;;  %v4710_v46 = vld [vmem:[#allocation7 + $0x224] ss:$16 sps:$4 sm:$0xff]  }
 0x18d   :  { %2002 = vmatpush1.bf16.msra.mxu1 %v4594_v47  ;;  %v4713_v47 = vld [vmem:[#allocation7 + $0x22c] ss:$16 sps:$4 sm:$0xff]  }
 0x18e   :  { %2003 = vmatprep.subr.bf16.mxu1 %v4599_v48  ;;  %v4716_v48 = vld [vmem:[#allocation7 + $0x244] ss:$16 sps:$4 sm:$0xff]  }
 0x191   :  { %2004 = vmatpush1.bf16.msra.mxu1 %v4597_v49  ;;  %v4719_v49 = vld [vmem:[#allocation7 + $0x24c] ss:$16 sps:$4 sm:$0xff]  }
 0x192   :  { %2005 = vmatprep.subr.bf16.mxu1 %v4602_v50  ;;  %v4714_v50 = vld [vmem:[#allocation7 + $0x240] ss:$16 sps:$4 sm:$0xff]  }
 0x195   :  { %2006 = vmatpush1.bf16.msra.mxu1 %v4600_v52  ;;  %v4717_v52 = vld [vmem:[#allocation7 + $0x248] ss:$16 sps:$4 sm:$0xff]  }
 0x196   :  { %2007 = vmatprep.subr.bf16.mxu1 %v4605_v53  ;;  %v4722_v53 = vld [vmem:[#allocation7 + $0x264] ss:$16 sps:$4 sm:$0xff]  }
 0x199   :  { %2008 = vmatpush1.bf16.msra.mxu1 %v4603_v54  ;;  %v4725_v54 = vld [vmem:[#allocation7 + $0x26c] ss:$16 sps:$4 sm:$0xff]  }
 0x19a   :  { %2898 = vmatprep.subr.bf16.mxu1 %v4611_v55  ;;  %v4720_v55 = vld [vmem:[#allocation7 + $0x260] ss:$16 sps:$4 sm:$0xff]  }
 0x19c   :  { %2010 = vmatmul.mubr.bf16.vlgmr.msra.gmra.mrb[4].mxu1 %v5221_v21  ;;  %v4647_v21 = vld [vmem:[#allocation7 + $0xcc] ss:$16 sps:$4 sm:$0xff]  }
 0x19d   :  { %2899 = vmatpush1.bf16.msra.mxu1 %v4609_v56  ;;  %v4723_v56 = vld [vmem:[#allocation7 + $0x268] ss:$16 sps:$4 sm:$0xff]  }
 0x19e   :  { %2900 = vmatprep.subr.bf16.mxu1 %v4617_v57  ;;  %v4728_v57 = vld [vmem:[#allocation7 + $0x284] ss:$16 sps:$4 sm:$0xff]  }
 0x1a1   :  { %2901 = vmatpush1.bf16.msra.mxu1 %v4615_v58  ;;  %v4731_v58 = vld [vmem:[#allocation7 + $0x28c] ss:$16 sps:$4 sm:$0xff]  }
 0x1a2   :  { %2902 = vmatprep.subr.bf16.mxu1 %v4623_v59  ;;  %v4726_v59 = vld [vmem:[#allocation7 + $0x280] ss:$16 sps:$4 sm:$0xff]  }
 0x1a5   :  { %2903 = vmatpush1.bf16.msra.mxu1 %v4621_v60  ;;  %v4729_v60 = vld [vmem:[#allocation7 + $0x288] ss:$16 sps:$4 sm:$0xff]  }
 0x1a6   :  { %2904 = vmatprep.subr.bf16.mxu1 %v4629_v61  ;;  %v4734_v61 = vld [vmem:[#allocation7 + $0x2a4] ss:$16 sps:$4 sm:$0xff]  }
 0x1a9   :  { %2905 = vmatpush1.bf16.msra.mxu1 %v4627_v62  ;;  %v4737_v62 = vld [vmem:[#allocation7 + $0x2ac] ss:$16 sps:$4 sm:$0xff]  }
 0x1aa   :  { %2906 = vmatprep.subr.bf16.mxu1 %v4635_v63  ;;  %v4732_v63 = vld [vmem:[#allocation7 + $0x2a0] ss:$16 sps:$4 sm:$0xff]  }
 0x1ad   :  { %2907 = vmatpush1.bf16.msra.mxu1 %v4633_v0  ;;  %v4735_v0 = vld [vmem:[#allocation7 + $0x2a8] ss:$16 sps:$4 sm:$0xff]  }
 0x1ae   :  { %2908 = vmatprep.subr.bf16.mxu1 %v4641_v1  ;;  %v4740_v1 = vld [vmem:[#allocation7 + $0x2c4] ss:$16 sps:$4 sm:$0xff]  }
 0x1b1   :  { %2909 = vmatpush1.bf16.msra.mxu1 %v4639_v2  ;;  %v4743_v2 = vld [vmem:[#allocation7 + $0x2cc] ss:$16 sps:$4 sm:$0xff]  }
 0x1b2   :  { %2910 = vmatprep.subr.bf16.mxu1 %v4647_v21  ;;  %v4738_v21 = vld [vmem:[#allocation7 + $0x2c0] ss:$16 sps:$4 sm:$0xff]  }
 0x1b5   :  { %2911 = vmatpush1.bf16.msra.mxu1 %v4645_v3  ;;  %v4741_v3 = vld [vmem:[#allocation7 + $0x2c8] ss:$16 sps:$4 sm:$0xff]  }
 0x1b6   :  { %2912 = vmatprep.subr.bf16.mxu1 %v4653_v4  ;;  %v4746_v4 = vld [vmem:[#allocation7 + $0x2e4] ss:$16 sps:$4 sm:$0xff]  }
 0x1b9   :  { %2913 = vmatpush1.bf16.msra.mxu1 %v4651_v5  ;;  %v4749_v5 = vld [vmem:[#allocation7 + $0x2ec] ss:$16 sps:$4 sm:$0xff]  }
 0x1ba   :  { %2914 = vmatprep.subr.bf16.mxu1 %v4659_v8  ;;  %v4744_v8 = vld [vmem:[#allocation7 + $0x2e0] ss:$16 sps:$4 sm:$0xff]  }
 0x1bd   :  { %2915 = vmatpush1.bf16.msra.mxu1 %v4657_v9  ;;  %v4747_v9 = vld [vmem:[#allocation7 + $0x2e8] ss:$16 sps:$4 sm:$0xff]  }
 0x1be   :  { %2916 = vmatprep.subr.bf16.mxu1 %v4665_v10  ;;  %v4752_v10 = vld [vmem:[#allocation7 + $0x304] ss:$16 sps:$4 sm:$0xff]  }
 0x1c1   :  { %2917 = vmatpush1.bf16.msra.mxu1 %v4663_v11  ;;  %v4755_v11 = vld [vmem:[#allocation7 + $0x30c] ss:$16 sps:$4 sm:$0xff]  }
 0x1c2   :  { %2918 = vmatprep.subr.bf16.mxu1 %v4671_v12  ;;  %v4750_v12 = vld [vmem:[#allocation7 + $0x300] ss:$16 sps:$4 sm:$0xff]  }
 0x1c5   :  { %2919 = vmatpush1.bf16.msra.mxu1 %v4669_v14  ;;  %v4753_v14 = vld [vmem:[#allocation7 + $0x308] ss:$16 sps:$4 sm:$0xff]  }
 0x1c6   :  { %2920 = vmatprep.subr.bf16.mxu1 %v4677_v15  ;;  %v4758_v15 = vld [vmem:[#allocation7 + $0x324] ss:$16 sps:$4 sm:$0xff]  }
 0x1c9   :  { %2921 = vmatpush1.bf16.msra.mxu1 %v4675_v16  ;;  %v4761_v16 = vld [vmem:[#allocation7 + $0x32c] ss:$16 sps:$4 sm:$0xff]  }
 0x1ca   :  { %2922 = vmatprep.subr.bf16.mxu1 %v4683_v17  ;;  %v4756_v17 = vld [vmem:[#allocation7 + $0x320] ss:$16 sps:$4 sm:$0xff]  }
 0x1cd   :  { %2923 = vmatpush1.bf16.msra.mxu1 %v4681_v20  ;;  %v4759_v20 = vld [vmem:[#allocation7 + $0x328] ss:$16 sps:$4 sm:$0xff]  }
 0x1ce   :  { %2924 = vmatprep.subr.bf16.mxu1 %v4689_v22  ;;  %v4764_v22 = vld [vmem:[#allocation7 + $0x344] ss:$16 sps:$4 sm:$0xff]  }
 0x1d1   :  { %2925 = vmatpush1.bf16.msra.mxu1 %v4687_v23  ;;  %v4767_v23 = vld [vmem:[#allocation7 + $0x34c] ss:$16 sps:$4 sm:$0xff]  }
 0x1d2   :  { %2926 = vmatprep.subr.bf16.mxu1 %v4695_v24  ;;  %v4762_v24 = vld [vmem:[#allocation7 + $0x340] ss:$16 sps:$4 sm:$0xff]  }
 0x1d5   :  { %2927 = vmatpush1.bf16.msra.mxu1 %v4693_v25  ;;  %v4765_v25 = vld [vmem:[#allocation7 + $0x348] ss:$16 sps:$4 sm:$0xff]  }
 0x1d6   :  { %2928 = vmatprep.subr.bf16.mxu1 %v4701_v26  ;;  %v4770_v26 = vld [vmem:[#allocation7 + $0x364] ss:$16 sps:$4 sm:$0xff]  }
 0x1d9   :  { %2929 = vmatpush1.bf16.msra.mxu1 %v4699_v6  ;;  %v4773_v6 = vld [vmem:[#allocation7 + $0x36c] ss:$16 sps:$4 sm:$0xff]  }
 0x1da   :  { %2939 = vmatprep.subr.bf16.mxu1 %v4707_v18  ;;  %v4768_v18 = vld [vmem:[#allocation7 + $0x360] ss:$16 sps:$4 sm:$0xff]  }
 0x1f0   :  { %v1847_v33 = vpop.f32.mrb[0].mxu0 }
 0x1f1   :  { %v4159_v35 = vadd.f32 %v1847_v33, %v1725_v34  ;;  %v1849_v36 = vpop.f32.mrb[1].mxu0  ;;  %v4774_v34 = vld [vmem:[#allocation7 + $0x380] ss:$16 sps:$4 sm:$0xff]   ;;  %v4782_v33 = vld [vmem:[#allocation7 + $0x3a4] ss:$16 sps:$4 sm:$0xff]  }
 0x1f2   :  { %v4161_v37 = vadd.f32 %v1849_v36, %v1727_v51  ;;  %v1851_v38 = vpop.f32.mrb[2].mxu0  ;;  %v4777_v51 = vld [vmem:[#allocation7 + $0x388] ss:$16 sps:$4 sm:$0xff]   ;;  %v4780_v36 = vld [vmem:[#allocation7 + $0x3a0] ss:$16 sps:$4 sm:$0xff]  }
 0x1f3   :  { %v2018_v39 = vmax.f32 %v4159_v35, 0.0  ;;  %v1852_v40 = vpop.f32.mrb[3].mxu0  ;;  %v4785_v35 = vld [vmem:[#allocation7 + $0x3ac] ss:$16 sps:$4 sm:$0xff]   ;;  %v4788_v38 = vld [vmem:[#allocation7 + $0x3c4] ss:$16 sps:$4 sm:$0xff]  }
 0x1f4   :  { %v2019_v41 = vmax.f32 %v4161_v37, 0.0  ;;  %v4783_v37 = vld [vmem:[#allocation7 + $0x3a8] ss:$16 sps:$4 sm:$0xff]   ;;  %v4786_v40 = vld [vmem:[#allocation7 + $0x3c0] ss:$16 sps:$4 sm:$0xff]  }
 0x1f5   :  { %v2022_v45 = vpack.c.bf16 %v2018_v39, %v2018_v39  ;;  %v4791_v39 = vld [vmem:[#allocation7 + $0x3cc] ss:$16 sps:$4 sm:$0xff]  }
 0x1f6   :  { %v2023_v42 = vpack.c.bf16 %v2019_v41, %v2019_v41  ;;  %v4789_v41 = vld [vmem:[#allocation7 + $0x3c8] ss:$16 sps:$4 sm:$0xff]  }
 0x1f8   :  { %2848 = vmatprep.mubr.bf16.mxu0 %v2023_v42  ;;  %2930 = vmatprep.mubr.bf16.mxu1 %v2023_v42  ;;  %v4794_v42 = vld [vmem:[#allocation7 + $0x3e4] ss:$16 sps:$4 sm:$0xff]  }
 0x1f9   :  { %2849 = vmatmul.mubr.bf16.vlgmr.msra.gmra.mrb[4].mxu0 %v2022_v45  ;;  %2931 = vmatmul.mubr.bf16.vlgmr.msra.gmra.mrb[8].mxu1 %v2022_v45  ;;  %v4795_v45 = vld [vmem:[#allocation7 + $0x3e8] ss:$16 sps:$4 sm:$0xff]  }
 0x1fa   :  { %2858 = vmatpush1.bf16.msra.mxu0 %v4702_v43  ;;  %2940 = vmatpush1.bf16.msra.mxu1 %v4705_v44  ;;  %v4797_v43 = vld [vmem:[#allocation7 + $0x3ec] ss:$16 sps:$4 sm:$0xff]   ;;  %v4792_v44 = vld [vmem:[#allocation7 + $0x3e0] ss:$16 sps:$4 sm:$0xff]  }
 0x1fb   :  { %2859 = vmatprep.subr.bf16.mxu0 %v4710_v46  ;;  %2941 = vmatprep.subr.bf16.mxu1 %v4713_v47  ;;  %v4800_v46 = vld [vmem:[#allocation8 + $0x4] ss:$8 sps:$4 sm:$0xff]   ;;  %v372_v47 = vsub.s32 2, %v5233_v28 }
 0x1fe   :  { %2860 = vmatpush1.bf16.msra.mxu0 %v4708_v30  ;;  %2942 = vmatpush1.bf16.msra.mxu1 %v4711_v7  ;;  %v376_v30 = vsub.s32 3, %v5233_v28  ;;  %v373_v7 = vrot.slane %v5241_v29, %v372_v47  ;;  %v4908_v28 = vld [vmem:[#allocation10 + $0x78] sm:$0xff]  }
 0x1ff   :  { %2861 = vmatprep.subr.bf16.mxu0 %v4716_v48  ;;  %2943 = vmatprep.subr.bf16.mxu1 %v4719_v49 }
 0x200   :  { %v377_v48 = vrot.slane %v5241_v29, %v376_v30  ;;  %v4806_v29 = vld [vmem:[#allocation8 + $0x24] ss:$8 sps:$4 sm:$0xff]  }
 0x202   :  { %2862 = vmatpush1.bf16.msra.mxu0 %v4714_v50  ;;  %2944 = vmatpush1.bf16.msra.mxu1 %v4717_v52 }
 0x203   :  { %2863 = vmatprep.subr.bf16.mxu0 %v4722_v53  ;;  %2945 = vmatprep.subr.bf16.mxu1 %v4725_v54 }
 0x206   :  { %2864 = vmatpush1.bf16.msra.mxu0 %v4720_v55  ;;  %2946 = vmatpush1.bf16.msra.mxu1 %v4723_v56 }
 0x207   :  { %2865 = vmatprep.subr.bf16.mxu0 %v4728_v57  ;;  %2947 = vmatprep.subr.bf16.mxu1 %v4731_v58 }
 0x20a   :  { %2866 = vmatpush1.bf16.msra.mxu0 %v4726_v59  ;;  %2948 = vmatpush1.bf16.msra.mxu1 %v4729_v60  ;;  %v4798_v59 = vld [vmem:[#allocation8] ss:$8 sps:$4 sm:$0xff]  }
 0x20b   :  { %2867 = vmatprep.subr.bf16.mxu0 %v4734_v61  ;;  %2949 = vmatprep.subr.bf16.mxu1 %v4737_v62  ;;  %v4803_v61 = vld [vmem:[#allocation8 + $0x14] ss:$8 sps:$4 sm:$0xff]   ;;  %v4801_v62 = vld [vmem:[#allocation8 + $0x10] ss:$8 sps:$4 sm:$0xff]  }
 0x20e   :  { %2868 = vmatpush1.bf16.msra.mxu0 %v4732_v63  ;;  %2950 = vmatpush1.bf16.msra.mxu1 %v4735_v0  ;;  %v4804_v63 = vld [vmem:[#allocation8 + $0x20] ss:$8 sps:$4 sm:$0xff]   ;;  %v4809_v0 = vld [vmem:[#allocation8 + $0x34] ss:$8 sps:$4 sm:$0xff]  }
 0x20f   :  { %2869 = vmatprep.subr.bf16.mxu0 %v4740_v1  ;;  %2951 = vmatprep.subr.bf16.mxu1 %v4743_v2  ;;  %v4807_v1 = vld [vmem:[#allocation8 + $0x30] ss:$8 sps:$4 sm:$0xff]   ;;  %v4812_v2 = vld [vmem:[#allocation8 + $0x44] ss:$8 sps:$4 sm:$0xff]  }
 0x212   :  { %2870 = vmatpush1.bf16.msra.mxu0 %v4738_v21  ;;  %2952 = vmatpush1.bf16.msra.mxu1 %v4741_v3  ;;  %v4810_v21 = vld [vmem:[#allocation8 + $0x40] ss:$8 sps:$4 sm:$0xff]   ;;  %v4815_v3 = vld [vmem:[#allocation8 + $0x54] ss:$8 sps:$4 sm:$0xff]  }
 0x213   :  { %2871 = vmatprep.subr.bf16.mxu0 %v4746_v4  ;;  %2953 = vmatprep.subr.bf16.mxu1 %v4749_v5  ;;  %v4813_v4 = vld [vmem:[#allocation8 + $0x50] ss:$8 sps:$4 sm:$0xff]   ;;  %v4818_v5 = vld [vmem:[#allocation8 + $0x64] ss:$8 sps:$4 sm:$0xff]  }
 0x216   :  { %2872 = vmatpush1.bf16.msra.mxu0 %v4744_v8  ;;  %2954 = vmatpush1.bf16.msra.mxu1 %v4747_v9  ;;  %v4816_v8 = vld [vmem:[#allocation8 + $0x60] ss:$8 sps:$4 sm:$0xff]   ;;  %v4821_v9 = vld [vmem:[#allocation8 + $0x74] ss:$8 sps:$4 sm:$0xff]  }
 0x217   :  { %2873 = vmatprep.subr.bf16.mxu0 %v4752_v10  ;;  %2955 = vmatprep.subr.bf16.mxu1 %v4755_v11  ;;  %v4819_v10 = vld [vmem:[#allocation8 + $0x70] ss:$8 sps:$4 sm:$0xff]   ;;  %v4824_v11 = vld [vmem:[#allocation8 + $0x84] ss:$8 sps:$4 sm:$0xff]  }
 0x21a   :  { %2874 = vmatpush1.bf16.msra.mxu0 %v4750_v12  ;;  %2956 = vmatpush1.bf16.msra.mxu1 %v4753_v14  ;;  %v4822_v12 = vld [vmem:[#allocation8 + $0x80] ss:$8 sps:$4 sm:$0xff]   ;;  %v4827_v14 = vld [vmem:[#allocation8 + $0x94] ss:$8 sps:$4 sm:$0xff]  }
 0x21b   :  { %2875 = vmatprep.subr.bf16.mxu0 %v4758_v15  ;;  %2957 = vmatprep.subr.bf16.mxu1 %v4761_v16  ;;  %v4825_v15 = vld [vmem:[#allocation8 + $0x90] ss:$8 sps:$4 sm:$0xff]   ;;  %v4830_v16 = vld [vmem:[#allocation8 + $0xa4] ss:$8 sps:$4 sm:$0xff]  }
 0x21e   :  { %2876 = vmatpush1.bf16.msra.mxu0 %v4756_v17  ;;  %2958 = vmatpush1.bf16.msra.mxu1 %v4759_v20  ;;  %v4828_v17 = vld [vmem:[#allocation8 + $0xa0] ss:$8 sps:$4 sm:$0xff]   ;;  %v4833_v20 = vld [vmem:[#allocation8 + $0xb4] ss:$8 sps:$4 sm:$0xff]  }
 0x21f   :  { %2877 = vmatprep.subr.bf16.mxu0 %v4764_v22  ;;  %2959 = vmatprep.subr.bf16.mxu1 %v4767_v23  ;;  %v4831_v22 = vld [vmem:[#allocation8 + $0xb0] ss:$8 sps:$4 sm:$0xff]   ;;  %v4836_v23 = vld [vmem:[#allocation8 + $0xc4] ss:$8 sps:$4 sm:$0xff]  }
 0x222   :  { %2878 = vmatpush1.bf16.msra.mxu0 %v4762_v24  ;;  %2960 = vmatpush1.bf16.msra.mxu1 %v4765_v25  ;;  %v4834_v24 = vld [vmem:[#allocation8 + $0xc0] ss:$8 sps:$4 sm:$0xff]   ;;  %v4839_v25 = vld [vmem:[#allocation8 + $0xd4] ss:$8 sps:$4 sm:$0xff]  }
 0x223   :  { %2879 = vmatprep.subr.bf16.mxu0 %v4770_v26  ;;  %2961 = vmatprep.subr.bf16.mxu1 %v4773_v6  ;;  %v4837_v26 = vld [vmem:[#allocation8 + $0xd0] ss:$8 sps:$4 sm:$0xff]   ;;  %v4842_v6 = vld [vmem:[#allocation8 + $0xe4] ss:$8 sps:$4 sm:$0xff]  }
 0x226   :  { %2880 = vmatpush1.bf16.msra.mxu0 %v4768_v18  ;;  %2962 = vmatpush1.bf16.msra.mxu1 %v4771_v27  ;;  %v4840_v18 = vld [vmem:[#allocation8 + $0xe0] ss:$8 sps:$4 sm:$0xff]   ;;  %v4845_v27 = vld [vmem:[#allocation8 + $0xf4] ss:$8 sps:$4 sm:$0xff]  }
 0x227   :  { %2881 = vmatprep.subr.bf16.mxu0 %v4776_v31  ;;  %2963 = vmatprep.subr.bf16.mxu1 %v4779_v32  ;;  %v4843_v31 = vld [vmem:[#allocation8 + $0xf0] ss:$8 sps:$4 sm:$0xff]   ;;  %v4848_v32 = vld [vmem:[#allocation8 + $0x104] ss:$8 sps:$4 sm:$0xff]  }
 0x22a   :  { %2882 = vmatpush1.bf16.msra.mxu0 %v4774_v34  ;;  %2964 = vmatpush1.bf16.msra.mxu1 %v4777_v51  ;;  %v4894_v34 = vld [vmem:[#allocation10 + $0x40] sm:$0xff]  }
 0x22b   :  { %2883 = vmatprep.subr.bf16.mxu0 %v4782_v33  ;;  %2965 = vmatprep.subr.bf16.mxu1 %v4785_v35  ;;  %v4895_v51 = vld [vmem:[#allocation10] sm:$0xff]   ;;  %v4896_v33 = vld [vmem:[#allocation10 + $0x48] sm:$0xff]  }
 0x22c   :  { %v4897_v35 = vld [vmem:[#allocation10 + $0x8] sm:$0xff]  }
 0x22e   :  { %2884 = vmatpush1.bf16.msra.mxu0 %v4780_v36  ;;  %2966 = vmatpush1.bf16.msra.mxu1 %v4783_v37  ;;  %v4898_v36 = vld [vmem:[#allocation10 + $0x50] sm:$0xff]  }
 0x22f   :  { %2885 = vmatprep.subr.bf16.mxu0 %v4788_v38  ;;  %2967 = vmatprep.subr.bf16.mxu1 %v4791_v39  ;;  %v4899_v37 = vld [vmem:[#allocation10 + $0x10] sm:$0xff]   ;;  %v4900_v38 = vld [vmem:[#allocation10 + $0x58] sm:$0xff]  }
 0x230   :  { %v4901_v39 = vld [vmem:[#allocation10 + $0x18] sm:$0xff]  }
 0x232   :  { %2886 = vmatpush1.bf16.msra.mxu0 %v4786_v40  ;;  %2968 = vmatpush1.bf16.msra.mxu1 %v4789_v41  ;;  %v4902_v40 = vld [vmem:[#allocation10 + $0x60] sm:$0xff]  }
 0x233   :  { %2887 = vmatprep.subr.bf16.mxu0 %v4794_v42  ;;  %2969 = vmatprep.subr.bf16.mxu1 %v4797_v43  ;;  %v4903_v41 = vld [vmem:[#allocation10 + $0x20] sm:$0xff]   ;;  %v4904_v42 = vld [vmem:[#allocation10 + $0x68] sm:$0xff]  }
 0x234   :  { %v4905_v43 = vld [vmem:[#allocation10 + $0x28] sm:$0xff]  }
 0x236   :  { %2888 = vmatpush1.bf16.msra.mxu0 %v4792_v44  ;;  %2970 = vmatpush1.bf16.msra.mxu1 %v4795_v45  ;;  %v5263_v44 = vld [vmem:[%s5302_s4] sm:$0xf] }
 0x237   :  { %3384 = vmatprep.subr.bf16.mxu0 %v4800_v46  ;;  %4136 = vmatprep.subr.bf16.mxu1 %v4894_v34  ;;  %v2159_v45 = vrot.slane %v5263_v44, %v5236_v13  ;;  %v2163_v46 = vrot.slane %v5263_v44, %v5244_v19  ;;  %v2167_v34 = vrot.slane %v5263_v44, %v372_v47  ;;  %v4909_v47 = vld [vmem:[#allocation10 + $0x38] sm:$0xff]  }
 0x26f   :  { %v2011_v49 = vpop.f32.mrb[4].mxu1 }
 0x270   :  { %v4162_v50 = vadd.f32 %v2011_v49, %v373_v7  ;;  %v2013_v52 = vpop.f32.mrb[5].mxu1  ;;  %v2171_v7 = vrot.slane %v5263_v44, %v376_v30 }
 0x271   :  { %v4163_v53 = vadd.f32 %v2013_v52, %v377_v48  ;;  %v2015_v54 = vpop.f32.mrb[6].mxu1 }
 0x272   :  { %v2020_v55 = vmax.f32 %v4162_v50, 0.0  ;;  %v2016_v56 = vpop.f32.mrb[7].mxu1 }
 0x273   :  { %v2021_v57 = vmax.f32 %v4163_v53, 0.0 }
 0x274   :  { %v2024_v60 = vpack.c.bf16 %v2020_v55, %v2020_v55 }
 0x275   :  { %v2025_v58 = vpack.c.bf16 %v2021_v57, %v2021_v57 }
 0x277   :  { %2889 = vmatprep.mubr.bf16.mxu0 %v2025_v58  ;;  %2971 = vmatprep.mubr.bf16.mxu1 %v2025_v58 }
 0x278   :  { %2890 = vmatmul.mubr.bf16.vlgmr.msra.gmra.mrb[4].mxu0 %v2024_v60  ;;  %2972 = vmatmul.mubr.bf16.vlgmr.msra.gmra.mrb[8].mxu1 %v2024_v60 }
 0x279   :  { %3385 = vmatpush1.bf16.msra.mxu0 %v4798_v59  ;;  %4137 = vmatpush3.bf16.msra.mxu1 %v4895_v51  ;;  %v4890_v51 = vld [vmem:[#allocation8 + $0x1e4] ss:$8 sps:$4 sm:$0xff]  }
 0x27a   :  { %3386 = vmatprep.subr.bf16.mxu0 %v4803_v61  ;;  %4138 = vmatprep.subr.bf16.mxu1 %v4896_v33  ;;  %v4888_v33 = vld [vmem:[#allocation8 + $0x1e0] ss:$8 sps:$4 sm:$0xff]  }
 0x27d   :  { %3387 = vmatpush1.bf16.msra.mxu0 %v4801_v62  ;;  %4139 = vmatpush3.bf16.msra.mxu1 %v4897_v35 }
 0x27e   :  { %3388 = vmatprep.subr.bf16.mxu0 %v4806_v29  ;;  %4140 = vmatprep.subr.bf16.mxu1 %v4898_v36  ;;  %v4893_v36 = vld [vmem:[#allocation8 + $0x1f4] ss:$8 sps:$4 sm:$0xff]  }
 0x281   :  { %3389 = vmatpush1.bf16.msra.mxu0 %v4804_v63  ;;  %4141 = vmatpush3.bf16.msra.mxu1 %v4899_v37  ;;  %v4846_v63 = vld [vmem:[#allocation8 + $0x100] ss:$8 sps:$4 sm:$0xff]   ;;  %v4891_v37 = vld [vmem:[#allocation8 + $0x1f0] ss:$8 sps:$4 sm:$0xff]  }
 0x282   :  { %3390 = vmatprep.subr.bf16.mxu0 %v4809_v0  ;;  %4142 = vmatprep.subr.bf16.mxu1 %v4900_v38 }
 0x285   :  { %3391 = vmatpush1.bf16.msra.mxu0 %v4807_v1  ;;  %4143 = vmatpush3.bf16.msra.mxu1 %v4901_v39  ;;  %v4851_v1 = vld [vmem:[#allocation8 + $0x114] ss:$8 sps:$4 sm:$0xff]  }
 0x286   :  { %3392 = vmatprep.subr.bf16.mxu0 %v4812_v2  ;;  %4144 = vmatprep.subr.bf16.mxu1 %v4902_v40  ;;  %v4849_v2 = vld [vmem:[#allocation8 + $0x110] ss:$8 sps:$4 sm:$0xff]  }
 0x287   :  { %v4906_v40 = vld [vmem:[#allocation10 + $0x70] sm:$0xff]  }
 0x289   :  { %3393 = vmatpush1.bf16.msra.mxu0 %v4810_v21  ;;  %4145 = vmatpush3.bf16.msra.mxu1 %v4903_v41  ;;  %v4854_v21 = vld [vmem:[#allocation8 + $0x124] ss:$8 sps:$4 sm:$0xff]   ;;  %v4907_v41 = vld [vmem:[#allocation10 + $0x30] sm:$0xff]  }
 0x28a   :  { %3394 = vmatprep.subr.bf16.mxu0 %v4815_v3  ;;  %4146 = vmatprep.subr.bf16.mxu1 %v4904_v42  ;;  %v4852_v3 = vld [vmem:[#allocation8 + $0x120] ss:$8 sps:$4 sm:$0xff]  }
 0x28b   :  { %v3052_v42 = vld [vmem:[%s5304_s6] sm:$0x3]  ;;  %s5061_s6 = smov [#allocation11]  }
 0x28c   :  { %v3061_v44 = vrot.slane %v3052_v42, %v5244_v19  ;;  %s3652_s10 = sshll.u32 %s5061_s6, 4  ;;  %s3653_s10 = int_to_ptr.vmem [resolvable:$true] %s3652_s10 }
 0x28d   :  { %3395 = vmatpush1.bf16.msra.mxu0 %v4813_v4  ;;  %4147 = vmatpush3.bf16.msra.mxu1 %v4905_v43  ;;  %v4857_v4 = vld [vmem:[#allocation8 + $0x134] ss:$8 sps:$4 sm:$0xff]   ;;  %v3057_v43 = vrot.slane %v3052_v42, %v5236_v13  ;;  %s5020_s13 = scalar_lea.vmem %s3653_s10, 128  ;;  %p5025_p13 = scmp.lt.s32.totalorder %s3653_s10, %s3653_s10 }
 0x28e   :  { %3396 = vmatprep.subr.bf16.mxu0 %v4818_v5  ;;  %v4855_v5 = vld [vmem:[#allocation8 + $0x130] ss:$8 sps:$4 sm:$0xff]   ;;  %4148 = vmatprep.subr.bf16.mxu1 %v4906_v40  ;;  %p5021_p12 = scmp.ne.s32.totalorder %s3653_s10, %s5020_s13  ;;  %p5026_p0 = scmp.lt.s32.totalorder %s5020_s13, %s5020_s13 }
 0x290   :  { %p5027_p1 = por %p5026_p0, %p5025_p13 }
 0x291   :  { %3397 = vmatpush1.bf16.msra.mxu0 %v4816_v8  ;;  %v4860_v8 = vld [vmem:[#allocation8 + $0x144] ss:$8 sps:$4 sm:$0xff]   ;;  %4149 = vmatpush3.bf16.msra.mxu1 %v4907_v41 }
 0x292   :  { %3398 = vmatprep.subr.bf16.mxu0 %v4821_v9  ;;  %v4858_v9 = vld [vmem:[#allocation8 + $0x140] ss:$8 sps:$4 sm:$0xff]   ;;  %4150 = vmatprep.subr.bf16.mxu1 %v4908_v28  ;;  %p5028_p2 = pnand %p5027_p1, %p5021_p12 }
 0x295   :  { %3399 = vmatpush1.bf16.msra.mxu0 %v4819_v10  ;;  %v4863_v10 = vld [vmem:[#allocation8 + $0x154] ss:$8 sps:$4 sm:$0xff]   ;;  %4151 = vmatpush3.bf16.msra.mxu1 %v4909_v47 }
 0x296   :  { %3400 = vmatprep.subr.bf16.mxu0 %v4824_v11  ;;  %v4861_v11 = vld [vmem:[#allocation8 + $0x150] ss:$8 sps:$4 sm:$0xff]  }
 0x299   :  { %3401 = vmatpush1.bf16.msra.mxu0 %v4822_v12  ;;  %v4866_v12 = vld [vmem:[#allocation8 + $0x164] ss:$8 sps:$4 sm:$0xff]  }
 0x29a   :  { %3402 = vmatprep.subr.bf16.mxu0 %v4827_v14  ;;  %v4864_v14 = vld [vmem:[#allocation8 + $0x160] ss:$8 sps:$4 sm:$0xff]  }
 0x29d   :  { %3403 = vmatpush1.bf16.msra.mxu0 %v4825_v15  ;;  %v4869_v15 = vld [vmem:[#allocation8 + $0x174] ss:$8 sps:$4 sm:$0xff]  }
 0x29e   :  { %3404 = vmatprep.subr.bf16.mxu0 %v4830_v16  ;;  %v4867_v16 = vld [vmem:[#allocation8 + $0x170] ss:$8 sps:$4 sm:$0xff]  }
 0x2a1   :  { %3405 = vmatpush1.bf16.msra.mxu0 %v4828_v17  ;;  %v4872_v17 = vld [vmem:[#allocation8 + $0x184] ss:$8 sps:$4 sm:$0xff]  }
 0x2a2   :  { %3406 = vmatprep.subr.bf16.mxu0 %v4833_v20  ;;  %v4870_v20 = vld [vmem:[#allocation8 + $0x180] ss:$8 sps:$4 sm:$0xff]  }
 0x2a5   :  { %3407 = vmatpush1.bf16.msra.mxu0 %v4831_v22  ;;  %v4875_v22 = vld [vmem:[#allocation8 + $0x194] ss:$8 sps:$4 sm:$0xff]  }
 0x2a6   :  { %3408 = vmatprep.subr.bf16.mxu0 %v4836_v23  ;;  %v4873_v23 = vld [vmem:[#allocation8 + $0x190] ss:$8 sps:$4 sm:$0xff]  }
 0x2a9   :  { %3409 = vmatpush1.bf16.msra.mxu0 %v4834_v24  ;;  %v4878_v24 = vld [vmem:[#allocation8 + $0x1a4] ss:$8 sps:$4 sm:$0xff]  }
 0x2aa   :  { %3410 = vmatprep.subr.bf16.mxu0 %v4839_v25  ;;  %v4876_v25 = vld [vmem:[#allocation8 + $0x1a0] ss:$8 sps:$4 sm:$0xff]  }
 0x2ad   :  { %3411 = vmatpush1.bf16.msra.mxu0 %v4837_v26  ;;  %v4881_v26 = vld [vmem:[#allocation8 + $0x1b4] ss:$8 sps:$4 sm:$0xff]  }
 0x2ae   :  { %3412 = vmatprep.subr.bf16.mxu0 %v4842_v6  ;;  %v4879_v6 = vld [vmem:[#allocation8 + $0x1b0] ss:$8 sps:$4 sm:$0xff]  }
 0x2b1   :  { %3413 = vmatpush1.bf16.msra.mxu0 %v4840_v18  ;;  %v4884_v18 = vld [vmem:[#allocation8 + $0x1c4] ss:$8 sps:$4 sm:$0xff]  }
 0x2b2   :  { %3414 = vmatprep.subr.bf16.mxu0 %v4845_v27  ;;  %v4882_v27 = vld [vmem:[#allocation8 + $0x1c0] ss:$8 sps:$4 sm:$0xff]  }
 0x2b5   :  { %3415 = vmatpush1.bf16.msra.mxu0 %v4843_v31  ;;  %v4887_v31 = vld [vmem:[#allocation8 + $0x1d4] ss:$8 sps:$4 sm:$0xff]  }
 0x2b6   :  { %3425 = vmatprep.subr.bf16.mxu0 %v4848_v32  ;;  %v4885_v32 = vld [vmem:[#allocation8 + $0x1d0] ss:$8 sps:$4 sm:$0xff]  }
 0x34b   :  { %v2891_v48 = vpop.f32.mrb[4].mxu0  ;;  %v5272_v49 = vpop.f32.mrb[8].mxu1 }
 0x34c   :  { %v4164_v50 = vadd.f32 %v2891_v48, %v2159_v45  ;;  %v2893_v52 = vpop.f32.mrb[5].mxu0  ;;  %v2975_v53 = vpop.f32.mrb[9].mxu1  ;;  %v4166_v35 = vadd.f32 %v5272_v49, %v2167_v34 }
 0x34d   :  { %v4165_v54 = vadd.f32 %v2893_v52, %v2163_v46  ;;  %v4167_v55 = vadd.f32 %v2975_v53, %v2171_v7  ;;  %v2895_v56 = vpop.f32.mrb[6].mxu0  ;;  %v2977_v57 = vpop.f32.mrb[10].mxu1 }
 0x34e   :  { %v2980_v58 = vmax.f32 %v4164_v50, 0.0  ;;  %v2896_v59 = vpop.f32.mrb[7].mxu0  ;;  %v2978_v60 = vpop.f32.mrb[11].mxu1  ;;  %v2982_v38 = vmax.f32 %v4166_v35, 0.0  ;;  %v4119_v57 = vld [vmem:[%s5306_s8] ss:$0 sm:$0xff] }
 0x34f   :  { %v2981_v61 = vmax.f32 %v4165_v54, 0.0  ;;  %v2983_v62 = vmax.f32 %v4167_v55, 0.0 }
 0x350   :  { %v2984_v0 = vpack.c.bf16 %v2980_v58, %v2980_v58  ;;  %v2986_v39 = vpack.c.bf16 %v2982_v38, %v2982_v38 }
 0x351   :  { %v2985_v29 = vpack.c.bf16 %v2981_v61, %v2981_v61  ;;  %v2987_v30 = vpack.c.bf16 %v2983_v62, %v2983_v62 }
 0x353   :  { %3416 = vmatprep.mubr.bf16.mxu0 %v2985_v29 }
 0x354   :  { %3417 = vmatmul.mubr.bf16.vlgmr.msra.gmra.mrb[8].mxu0 %v2984_v0 }
 0x355   :  { %3426 = vmatpush1.bf16.msra.mxu0 %v4846_v63  ;;  %3457 = vmatprep.mubr.bf16.mxu0 %v2987_v30 }
 0x356   :  { %3427 = vmatprep.subr.bf16.mxu0 %v4851_v1 }
 0x359   :  { %3428 = vmatpush1.bf16.msra.mxu0 %v4849_v2 }
 0x35a   :  { %3429 = vmatprep.subr.bf16.mxu0 %v4854_v21 }
 0x35d   :  { %3430 = vmatpush1.bf16.msra.mxu0 %v4852_v3 }
 0x35e   :  { %3431 = vmatprep.subr.bf16.mxu0 %v4857_v4 }
 0x361   :  { %3432 = vmatpush1.bf16.msra.mxu0 %v4855_v5 }
 0x362   :  { %3433 = vmatprep.subr.bf16.mxu0 %v4860_v8 }
 0x365   :  { %3434 = vmatpush1.bf16.msra.mxu0 %v4858_v9 }
 0x366   :  { %3435 = vmatprep.subr.bf16.mxu0 %v4863_v10 }
 0x369   :  { %3436 = vmatpush1.bf16.msra.mxu0 %v4861_v11 }
 0x36a   :  { %3437 = vmatprep.subr.bf16.mxu0 %v4866_v12 }
 0x36d   :  { %3438 = vmatpush1.bf16.msra.mxu0 %v4864_v14 }
 0x36e   :  { %3439 = vmatprep.subr.bf16.mxu0 %v4869_v15 }
 0x371   :  { %3440 = vmatpush1.bf16.msra.mxu0 %v4867_v16 }
 0x372   :  { %3441 = vmatprep.subr.bf16.mxu0 %v4872_v17 }
 0x375   :  { %3442 = vmatpush1.bf16.msra.mxu0 %v4870_v20 }
 0x376   :  { %3443 = vmatprep.subr.bf16.mxu0 %v4875_v22 }
 0x379   :  { %3444 = vmatpush1.bf16.msra.mxu0 %v4873_v23 }
 0x37a   :  { %3445 = vmatprep.subr.bf16.mxu0 %v4878_v24 }
 0x37d   :  { %3446 = vmatpush1.bf16.msra.mxu0 %v4876_v25 }
 0x37e   :  { %3447 = vmatprep.subr.bf16.mxu0 %v4881_v26 }
 0x381   :  { %3448 = vmatpush1.bf16.msra.mxu0 %v4879_v6 }
 0x382   :  { %3449 = vmatprep.subr.bf16.mxu0 %v4884_v18 }
 0x385   :  { %3450 = vmatpush1.bf16.msra.mxu0 %v4882_v27 }
 0x386   :  { %3451 = vmatprep.subr.bf16.mxu0 %v4887_v31 }
 0x389   :  { %3452 = vmatpush1.bf16.msra.mxu0 %v4885_v32 }
 0x38a   :  { %3453 = vmatprep.subr.bf16.mxu0 %v4890_v51 }
 0x38d   :  { %3454 = vmatpush1.bf16.msra.mxu0 %v4888_v33 }
 0x38e   :  { %3455 = vmatprep.subr.bf16.mxu0 %v4893_v36 }
 0x391   :  { %3456 = vmatpush1.bf16.msra.mxu0 %v4891_v37 }
 0x394   :  { %3458 = vmatmul.mubr.bf16.vlgmr.msra.gmra.mrb[8].mxu0 %v2986_v39 }
 0x467   :  { %v3459_v45 = vpop.f32.mrb[8].mxu0 }
 0x468   :  { %v4168_v46 = vadd.f32 %v3459_v45, %v3057_v43  ;;  %v3461_v7 = vpop.f32.mrb[9].mxu0 }
 0x469   :  { %v4169_v48 = vadd.f32 %v3461_v7, %v3061_v44  ;;  %v3463_v49 = vpop.f32.mrb[10].mxu0 }
 0x46a   :  { %v3466_v50 = vmax.f32 %v4168_v46, 0.0  ;;  %v3464_v52 = vpop.f32.mrb[11].mxu0 }
 0x46b   :  { %v3467_v53 = vmax.f32 %v4169_v48, 0.0 }
 0x46c   :  { %v3468_v55 = vpack.c.bf16 %v3466_v50, %v3466_v50 }
 0x46d   :  { %v3469_v54 = vpack.c.bf16 %v3467_v53, %v3467_v53 }
 0x46f   :  { %3637 = vmatprep.mubr.bf16.mxu1 %v3469_v54 }
 0x470   :  { %3638 = vmatmul.mubr.bf16.vlgmr.msra.gmra.mrb[12].mxu1 %v3468_v55 }
 0x543   :  { %v4152_v56 = vpop.f32.mrb[12].mxu1 }
 0x544   :  { %v4153_v13 = vpop.f32.mrb[13].mxu1 }
 0x545   :  { %v4154_v19 = vadd.f32 %v4153_v13, %v4152_v56  ;;  %v4155_v58 = vpop.f32.mrb[14].mxu1 }
 0x546   :  { %v4156_v59 = vpop.f32.mrb[15].mxu1 }
 0x547   :  { %v3640_v60 = vadd.f32 %v4154_v19, %v4119_v57 }
 0x549   :  { %3645 = vst [vmem:[#allocation11] sm:$0xff] %v3640_v60 }
 0x54a   :  { %5031 = shalt.err (!%p5028_p2)
}
 0x54b   :  { %s5032_s8 = scalar_lea.hbm %s5307_s9, 128 }
 0x54c   :  { %p5033_p3 = scmp.ne.s32.totalorder %s5307_s9, %s5032_s8  ;;  %p5036_p4 = scmp.lt.u32.totalorder %s5032_s8, %s5307_s9 }
 0x54e   :  { %p5038_p5 = pnand %p5036_p4, %p5033_p3 }
 0x550   :  { %5041 = shalt.err (!%p5038_p5)
}
 0x551   :  { %3655 = dma.vmem_to_hbm [thread:$0]  %s3653_s10, 128, %s5307_s9, [#allocation4]  }
 0x552   :  { %5048 = dma.done.wait [#allocation4], 128  }
 0x553   :  { %5049 = vsyncadd [#allocation4], 4294967168 }
 0x554   :  { %3659 = vsyncpa [#allocation3], 1 }
 0x555   :  { %3660 = vsyncpa [#allocation6], 1 }
 0x556   :  { %3661 = vsyncpa [#allocation9], 1 }
 0x557   :  { %3662 = vsyncpa [#allocation4], 1 }

// kernel: tpu_custom_call.1
= control target key start
LH: loop header
LB: loop body
LE: loop exit
PB: predicated region body
PF: predicated region fallthrough
CT: control target
= control target key end

     0   :  { %14 = vsyncpa [#allocation3], 0  ;;  %s5298_s0 = inlined_call_operand.hbm [shape: bf16[8,1024], index: 0, kind: input, shape index: {}]   ;;  %s5299_s1 = inlined_call_operand.hbm [shape: bf16[1024,512], index: 1, kind: input, shape index: {}]   ;;  %s5300_s2 = inlined_call_operand.vmem [shape: f32[1,512], index: 2, kind: input, shape index: {}]   ;;  %s5301_s3 = inlined_call_operand.hbm [shape: bf16[512,512], index: 3, kind: input, shape index: {}]   ;;  %s5302_s4 = inlined_call_operand.vmem [shape: f32[1,512], index: 4, kind: input, shape index: {}]   ;;  %s5303_s5 = inlined_call_operand.hbm [shape: bf16[512,256], index: 5, kind: input, shape index: {}]   ;;  %s5304_s6 = inlined_call_operand.vmem [shape: f32[1,256], index: 6, kind: input, shape index: {}]   ;;  %s5305_s7 = inlined_call_operand.hbm [shape: bf16[256,128], index: 7, kind: input, shape index: {}]   ;;  %s5306_s8 = inlined_call_operand.vmem [shape: f32[1,128], index: 8, kind: input, shape index: {}]   ;;  %s5307_s9 = inlined_call_operand.hbm [shape: f32[8,128], index: 9, kind: output, shape index: {}]  }
   0x1   :  { %15 = vsyncpa [#allocation6], 0 }
   0x2   :  { %16 = vsyncpa [#allocation9], 0 }
   0x3   :  { %17 = vsyncpa [#allocation4], 0  ;;  %s5050_s30 = smov [#allocation5]   ;;  %s4910_s13 = scalar_lea.hbm %s5299_s1, 32768 }
   0x4   :  { %s33_s10 = sshll.u32 %s5050_s30, 4  ;;  %p4911_p0 = scmp.ne.s32.totalorder %s5299_s1, %s4910_s13  ;;  %s34_s10 = int_to_ptr.vmem [resolvable:$true] %s33_s10 }
   0x5   :  { %p4914_p1 = scmp.lt.u32.totalorder %s4910_s13, %s5299_s1 }
   0x7   :  { %p4916_p2 = pnand %p4914_p1, %p4911_p0 }
   0x9   :  { %4919 = shalt.err (!%p4916_p2)
}
   0xa   :  { %s4920_s18 = scalar_lea.vmem %s34_s10, 32768  ;;  %p4925_p4 = scmp.lt.s32.totalorder %s34_s10, %s34_s10 }
   0xb   :  { %p4921_p3 = scmp.ne.s32.totalorder %s34_s10, %s4920_s18  ;;  %p4926_p5 = scmp.lt.s32.totalorder %s4920_s18, %s4920_s18 }
   0xd   :  { %p4927_p6 = por %p4926_p5, %p4925_p4 }
   0xf   :  { %p4928_p7 = pnand %p4927_p6, %p4921_p3 }
  0x11   :  { %4931 = shalt.err (!%p4928_p7)
}
  0x12   :  { %s5051_s19 = smov 256   ;;  %s5052_s20 = smov 16  }
  0x13   :  { %39 = dma.hbm_to_vmem [thread:$0]  %s5299_s1, 32768, %s34_s10, [#allocation6], %s5051_s19, %s5051_s19, %s5052_s20  }
  0x14   :  { %s5053_s23 = smov [#allocation8]   ;;  %s4932_s27 = scalar_lea.hbm %s5303_s5, 8192 }
  0x15   :  { %s61_s24 = sshll.u32 %s5053_s23, 4  ;;  %p4933_p8 = scmp.ne.s32.totalorder %s5303_s5, %s4932_s27  ;;  %s62_s24 = int_to_ptr.vmem [resolvable:$true] %s61_s24 }
  0x16   :  { %p4936_p9 = scmp.lt.u32.totalorder %s4932_s27, %s5303_s5 }
  0x18   :  { %p4938_p10 = pnand %p4936_p9, %p4933_p8 }
  0x1a   :  { %4941 = shalt.err (!%p4938_p10)
}
  0x1b   :  { %s4942_s12 = scalar_lea.vmem %s62_s24, 8192  ;;  %p4947_p12 = scmp.lt.s32.totalorder %s62_s24, %s62_s24 }
  0x1c   :  { %p4943_p11 = scmp.ne.s32.totalorder %s62_s24, %s4942_s12  ;;  %p4948_p13 = scmp.lt.s32.totalorder %s4942_s12, %s4942_s12 }
  0x1e   :  { %p4949_p0 = por %p4948_p13, %p4947_p12 }
  0x20   :  { %p4950_p1 = pnand %p4949_p0, %p4943_p11 }
  0x22   :  { %4953 = shalt.err (!%p4950_p1)
}
  0x23   :  { %s5054_s1 = smov 128   ;;  %s5055_s10 = smov 8  }
  0x24   :  { %67 = dma.hbm_to_vmem [thread:$0]  %s5303_s5, 8192, %s62_s24, [#allocation9], %s5054_s1, %s5054_s1, %s5055_s10  }
  0x25   :  { %s5056_s15 = smov [#allocation2]   ;;  %s5057_s17 = smov [#allocation7]  }
  0x26   :  { %s24_s16 = sshll.u32 %s5056_s15, 4  ;;  %s47_s18 = sshll.u32 %s5057_s17, 4  ;;  %s25_s16 = int_to_ptr.vmem [resolvable:$true] %s24_s16  ;;  %s5139_s18 = int_to_ptr.vmem [resolvable:$true] %s47_s18 }
  0x27   :  { %s4954_s23 = scalar_lea.hbm %s5298_s0, 512 }
  0x28   :  { %p4955_p2 = scmp.ne.s32.totalorder %s5298_s0, %s4954_s23  ;;  %p4958_p3 = scmp.lt.u32.totalorder %s4954_s23, %s5298_s0 }
  0x2a   :  { %p4960_p4 = pnand %p4958_p3, %p4955_p2 }
  0x2c   :  { %4963 = shalt.err (!%p4960_p4)
}
  0x2d   :  { %s4964_s5 = scalar_lea.vmem %s25_s16, 512  ;;  %p4969_p6 = scmp.lt.s32.totalorder %s25_s16, %s25_s16 }
  0x2e   :  { %p4965_p5 = scmp.ne.s32.totalorder %s25_s16, %s4964_s5  ;;  %p4970_p7 = scmp.lt.s32.totalorder %s4964_s5, %s4964_s5 }
  0x30   :  { %p4971_p8 = por %p4970_p7, %p4969_p6 }
  0x32   :  { %p4972_p9 = pnand %p4971_p8, %p4965_p5 }
  0x34   :  { %4975 = shalt.err (!%p4972_p9)
}
  0x35   :  { %27 = dma.hbm_to_vmem [thread:$0]  %s5298_s0, 512, %s25_s16, [#allocation3]  }
  0x36   :  { %s4976_s12 = scalar_lea.hbm %s5301_s3, 16384 }
  0x37   :  { %p4977_p10 = scmp.ne.s32.totalorder %s5301_s3, %s4976_s12  ;;  %p4980_p11 = scmp.lt.u32.totalorder %s4976_s12, %s5301_s3 }
  0x39   :  { %p4982_p12 = pnand %p4980_p11, %p4977_p10 }
  0x3b   :  { %4985 = shalt.err (!%p4982_p12)
}
  0x3c   :  { %s4986_s15 = scalar_lea.vmem %s5139_s18, 16384  ;;  %p4991_p0 = scmp.lt.s32.totalorder %s5139_s18, %s5139_s18 }
  0x3d   :  { %p4987_p13 = scmp.ne.s32.totalorder %s5139_s18, %s4986_s15  ;;  %p4992_p1 = scmp.lt.s32.totalorder %s4986_s15, %s4986_s15 }
  0x3f   :  { %p4993_p2 = por %p4992_p1, %p4991_p0 }
  0x41   :  { %p4994_p3 = pnand %p4993_p2, %p4987_p13 }
  0x43   :  { %4997 = shalt.err (!%p4994_p3)
}
  0x44   :  { %53 = dma.hbm_to_vmem [thread:$0]  %s5301_s3, 16384, %s5139_s18, [#allocation6], %s5051_s19, %s5051_s19, %s5052_s20  }
  0x45   :  { %s5058_s17 = smov [#allocation10]   ;;  %s4998_s25 = scalar_lea.hbm %s5305_s7, 2048 }
  0x46   :  { %s75_s21 = sshll.u32 %s5058_s17, 4  ;;  %p4999_p4 = scmp.ne.s32.totalorder %s5305_s7, %s4998_s25  ;;  %s76_s21 = int_to_ptr.vmem [resolvable:$true] %s75_s21 }
  0x47   :  { %p5002_p5 = scmp.lt.u32.totalorder %s4998_s25, %s5305_s7 }
  0x49   :  { %p5004_p6 = pnand %p5002_p5, %p4999_p4 }
  0x4b   :  { %5007 = shalt.err (!%p5004_p6)
}
  0x4c   :  { %s5008_s24 = scalar_lea.vmem %s76_s21, 2048  ;;  %p5013_p8 = scmp.lt.s32.totalorder %s76_s21, %s76_s21 }
  0x4d   :  { %p5009_p7 = scmp.ne.s32.totalorder %s76_s21, %s5008_s24  ;;  %p5014_p9 = scmp.lt.s32.totalorder %s5008_s24, %s5008_s24 }
  0x4f   :  { %p5015_p10 = por %p5014_p9, %p5013_p8 }
  0x51   :  { %p5016_p11 = pnand %p5015_p10, %p5009_p7 }
  0x53   :  { %5019 = shalt.err (!%p5016_p11)
}
  0x54   :  { %s5059_s3 = smov 64   ;;  %s5060_s19 = smov 4  }
  0x55   :  { %81 = dma.hbm_to_vmem [thread:$0]  %s5305_s7, 2048, %s76_s21, [#allocation9], %s5059_s3, %s5059_s3, %s5060_s19  }
  0x56   :  { %5042 = dma.done.wait [#allocation3], 512  }
  0x57   :  { %5043 = vsyncadd [#allocation3], 4294966784 }
  0x58   :  { %5044 = dma.done.wait [#allocation6], 49152  }
  0x59   :  { %5045 = vsyncadd [#allocation6], 4294918144 }
  0x5a   :  { %5046 = dma.done.wait [#allocation9], 10240  }
  0x5b   :  { %5047 = vsyncadd [#allocation9], 4294957056  ;;  %v4214_v0 = vld [vmem:[#allocation5 + $0x4] ss:$16 sps:$4 sm:$0xff]   ;;  %v4218_v2 = vld [vmem:[#allocation5] ss:$16 sps:$4 sm:$0xff]  }
  0x5c   :  { %v4216_v1 = vld [vmem:[#allocation5 + $0x204] ss:$16 sps:$4 sm:$0xff]   ;;  %1690 = vmatprep.subr.bf16.mxu1 %v4214_v0  ;;  %v4219_v3 = vld [vmem:[#allocation5 + $0x200] ss:$16 sps:$4 sm:$0xff]   ;;  %v101_v48 = vld [vmem:[#allocation2 + $0x8] sm:$0xff] }
  0x5d   :  { %1731 = vmatprep.subr.bf16.mxu0 %v4216_v1  ;;  %v4220_v4 = vld [vmem:[#allocation5 + $0x24] ss:$16 sps:$4 sm:$0xff]   ;;  %1691 = vmatpush1.bf16.msra.mxu1 %v4218_v2  ;;  %v4224_v6 = vld [vmem:[#allocation5 + $0x20] ss:$16 sps:$4 sm:$0xff]   ;;  %v5187_v51 = vcombine.high %v101_v48, %v101_v48 }
  0x5e   :  { %1732 = vmatpush1.bf16.msra.mxu0 %v4219_v3  ;;  %v4222_v5 = vld [vmem:[#allocation5 + $0x224] ss:$16 sps:$4 sm:$0xff]   ;;  %1692 = vmatprep.subr.bf16.mxu1 %v4220_v4  ;;  %v4225_v7 = vld [vmem:[#allocation5 + $0x220] ss:$16 sps:$4 sm:$0xff]  }
  0x5f   :  { %1733 = vmatprep.subr.bf16.mxu0 %v4222_v5  ;;  %v4226_v8 = vld [vmem:[#allocation5 + $0x44] ss:$16 sps:$4 sm:$0xff]   ;;  %v4230_v10 = vld [vmem:[#allocation5 + $0x40] ss:$16 sps:$4 sm:$0xff]   ;;  %1763 = vmatprep.mubr.bf16.mxu0 %v5187_v51  ;;  %v4319_v5 = vld [vmem:[#allocation5 + $0xc] ss:$16 sps:$4 sm:$0xff]  }
  0x60   :  { %v4228_v9 = vld [vmem:[#allocation5 + $0x244] ss:$16 sps:$4 sm:$0xff]   ;;  %v4231_v11 = vld [vmem:[#allocation5 + $0x240] ss:$16 sps:$4 sm:$0xff]  }
  0x61   :  { %1693 = vmatpush1.bf16.msra.mxu1 %v4224_v6  ;;  %v4232_v12 = vld [vmem:[#allocation5 + $0x64] ss:$16 sps:$4 sm:$0xff]   ;;  %v4236_v14 = vld [vmem:[#allocation5 + $0x60] ss:$16 sps:$4 sm:$0xff]  }
  0x62   :  { %1734 = vmatpush1.bf16.msra.mxu0 %v4225_v7  ;;  %1694 = vmatprep.subr.bf16.mxu1 %v4226_v8  ;;  %v4234_v13 = vld [vmem:[#allocation5 + $0x264] ss:$16 sps:$4 sm:$0xff]   ;;  %v4237_v15 = vld [vmem:[#allocation5 + $0x260] ss:$16 sps:$4 sm:$0xff]   ;;  %v5193_v7 = vcombine.low %v101_v48, %v101_v48 }
  0x63   :  { %1735 = vmatprep.subr.bf16.mxu0 %v4228_v9  ;;  %v4238_v16 = vld [vmem:[#allocation5 + $0x84] ss:$16 sps:$4 sm:$0xff]   ;;  %v4242_v18 = vld [vmem:[#allocation5 + $0x80] ss:$16 sps:$4 sm:$0xff]   ;;  %v4317_v9 = vld [vmem:[#allocation5 + $0x8] ss:$16 sps:$4 sm:$0xff]  }
  0x64   :  { %v4240_v17 = vld [vmem:[#allocation5 + $0x284] ss:$16 sps:$4 sm:$0xff]   ;;  %v4243_v19 = vld [vmem:[#allocation5 + $0x280] ss:$16 sps:$4 sm:$0xff]  }
  0x65   :  { %1695 = vmatpush1.bf16.msra.mxu1 %v4230_v10  ;;  %v4244_v20 = vld [vmem:[#allocation5 + $0xa4] ss:$16 sps:$4 sm:$0xff]   ;;  %v4248_v22 = vld [vmem:[#allocation5 + $0xa0] ss:$16 sps:$4 sm:$0xff]  }
  0x66   :  { %1736 = vmatpush1.bf16.msra.mxu0 %v4231_v11  ;;  %1696 = vmatprep.subr.bf16.mxu1 %v4232_v12  ;;  %v4246_v21 = vld [vmem:[#allocation5 + $0x2a4] ss:$16 sps:$4 sm:$0xff]   ;;  %v4249_v23 = vld [vmem:[#allocation5 + $0x2a0] ss:$16 sps:$4 sm:$0xff]   ;;  %v4325_v11 = vld [vmem:[#allocation5 + $0x2c] ss:$16 sps:$4 sm:$0xff]  }
  0x67   :  { %1737 = vmatprep.subr.bf16.mxu0 %v4234_v13  ;;  %v4250_v24 = vld [vmem:[#allocation5 + $0xc4] ss:$16 sps:$4 sm:$0xff]   ;;  %v4254_v26 = vld [vmem:[#allocation5 + $0xc0] ss:$16 sps:$4 sm:$0xff]   ;;  %v4323_v13 = vld [vmem:[#allocation5 + $0x28] ss:$16 sps:$4 sm:$0xff]  }
  0x68   :  { %v4252_v25 = vld [vmem:[#allocation5 + $0x2c4] ss:$16 sps:$4 sm:$0xff]   ;;  %v4255_v27 = vld [vmem:[#allocation5 + $0x2c0] ss:$16 sps:$4 sm:$0xff]  }
  0x69   :  { %1697 = vmatpush1.bf16.msra.mxu1 %v4236_v14  ;;  %v4256_v28 = vld [vmem:[#allocation5 + $0xe4] ss:$16 sps:$4 sm:$0xff]   ;;  %v4260_v30 = vld [vmem:[#allocation5 + $0xe0] ss:$16 sps:$4 sm:$0xff]  }
  0x6a   :  { %1738 = vmatpush1.bf16.msra.mxu0 %v4237_v15  ;;  %1698 = vmatprep.subr.bf16.mxu1 %v4238_v16  ;;  %v4258_v29 = vld [vmem:[#allocation5 + $0x2e4] ss:$16 sps:$4 sm:$0xff]   ;;  %v4261_v31 = vld [vmem:[#allocation5 + $0x2e0] ss:$16 sps:$4 sm:$0xff]   ;;  %v4331_v15 = vld [vmem:[#allocation5 + $0x4c] ss:$16 sps:$4 sm:$0xff]  }
  0x6b   :  { %1739 = vmatprep.subr.bf16.mxu0 %v4240_v17  ;;  %v4262_v32 = vld [vmem:[#allocation5 + $0x104] ss:$16 sps:$4 sm:$0xff]   ;;  %v4266_v34 = vld [vmem:[#allocation5 + $0x100] ss:$16 sps:$4 sm:$0xff]   ;;  %v4329_v17 = vld [vmem:[#allocation5 + $0x48] ss:$16 sps:$4 sm:$0xff]  }
  0x6c   :  { %v4264_v33 = vld [vmem:[#allocation5 + $0x304] ss:$16 sps:$4 sm:$0xff]   ;;  %v4267_v35 = vld [vmem:[#allocation5 + $0x300] ss:$16 sps:$4 sm:$0xff]  }
  0x6d   :  { %1699 = vmatpush1.bf16.msra.mxu1 %v4242_v18  ;;  %v4268_v36 = vld [vmem:[#allocation5 + $0x124] ss:$16 sps:$4 sm:$0xff]   ;;  %v4272_v38 = vld [vmem:[#allocation5 + $0x120] ss:$16 sps:$4 sm:$0xff]  }
  0x6e   :  { %1740 = vmatpush1.bf16.msra.mxu0 %v4243_v19  ;;  %1700 = vmatprep.subr.bf16.mxu1 %v4244_v20  ;;  %v4270_v37 = vld [vmem:[#allocation5 + $0x324] ss:$16 sps:$4 sm:$0xff]   ;;  %v4273_v39 = vld [vmem:[#allocation5 + $0x320] ss:$16 sps:$4 sm:$0xff]   ;;  %v4337_v19 = vld [vmem:[#allocation5 + $0x6c] ss:$16 sps:$4 sm:$0xff]  }
  0x6f   :  { %1741 = vmatprep.subr.bf16.mxu0 %v4246_v21  ;;  %v4274_v40 = vld [vmem:[#allocation5 + $0x144] ss:$16 sps:$4 sm:$0xff]   ;;  %v4278_v42 = vld [vmem:[#allocation5 + $0x140] ss:$16 sps:$4 sm:$0xff]   ;;  %v4335_v21 = vld [vmem:[#allocation5 + $0x68] ss:$16 sps:$4 sm:$0xff]  }
  0x70   :  { %v4276_v41 = vld [vmem:[#allocation5 + $0x344] ss:$16 sps:$4 sm:$0xff]   ;;  %v4279_v43 = vld [vmem:[#allocation5 + $0x340] ss:$16 sps:$4 sm:$0xff]  }
  0x71   :  { %1701 = vmatpush1.bf16.msra.mxu1 %v4248_v22  ;;  %v4280_v44 = vld [vmem:[#allocation5 + $0x164] ss:$16 sps:$4 sm:$0xff]   ;;  %v4284_v49 = vld [vmem:[#allocation5 + $0x160] ss:$16 sps:$4 sm:$0xff]  }
  0x72   :  { %1742 = vmatpush1.bf16.msra.mxu0 %v4249_v23  ;;  %1702 = vmatprep.subr.bf16.mxu1 %v4250_v24  ;;  %v4282_v45 = vld [vmem:[#allocation5 + $0x364] ss:$16 sps:$4 sm:$0xff]   ;;  %v4285_v50 = vld [vmem:[#allocation5 + $0x360] ss:$16 sps:$4 sm:$0xff]   ;;  %v4343_v23 = vld [vmem:[#allocation5 + $0x8c] ss:$16 sps:$4 sm:$0xff]  }
  0x73   :  { %1743 = vmatprep.subr.bf16.mxu0 %v4252_v25  ;;  %v100_v46 = vld [vmem:[#allocation2] sm:$0xff]  ;;  %v4341_v25 = vld [vmem:[#allocation5 + $0x88] ss:$16 sps:$4 sm:$0xff]  }
  0x74   :  { %v5185_v47 = vcombine.high %v100_v46, %v100_v46  ;;  %v4286_v52 = vld [vmem:[#allocation5 + $0x184] ss:$16 sps:$4 sm:$0xff]   ;;  %v4290_v54 = vld [vmem:[#allocation5 + $0x180] ss:$16 sps:$4 sm:$0xff]   ;;  %v5191_v6 = vcombine.low %v100_v46, %v100_v46 }
  0x75   :  { %1703 = vmatpush1.bf16.msra.mxu1 %v4254_v26  ;;  %v4288_v53 = vld [vmem:[#allocation5 + $0x384] ss:$16 sps:$4 sm:$0xff]   ;;  %v4291_v55 = vld [vmem:[#allocation5 + $0x380] ss:$16 sps:$4 sm:$0xff]  }
  0x76   :  { %1744 = vmatpush1.bf16.msra.mxu0 %v4255_v27  ;;  %1704 = vmatprep.subr.bf16.mxu1 %v4256_v28  ;;  %v4292_v56 = vld [vmem:[#allocation5 + $0x1a4] ss:$16 sps:$4 sm:$0xff]   ;;  %v4296_v58 = vld [vmem:[#allocation5 + $0x1a0] ss:$16 sps:$4 sm:$0xff]   ;;  %v4349_v27 = vld [vmem:[#allocation5 + $0xac] ss:$16 sps:$4 sm:$0xff]  }
  0x77   :  { %1745 = vmatprep.subr.bf16.mxu0 %v4258_v29  ;;  %1722 = vmatprep.mubr.bf16.mxu1 %v5185_v47  ;;  %v4294_v57 = vld [vmem:[#allocation5 + $0x3a4] ss:$16 sps:$4 sm:$0xff]   ;;  %v4297_v59 = vld [vmem:[#allocation5 + $0x3a0] ss:$16 sps:$4 sm:$0xff]   ;;  %v4347_v29 = vld [vmem:[#allocation5 + $0xa8] ss:$16 sps:$4 sm:$0xff]  }
  0x78   :  { %v4298_v60 = vld [vmem:[#allocation5 + $0x1c4] ss:$16 sps:$4 sm:$0xff]   ;;  %v4302_v62 = vld [vmem:[#allocation5 + $0x1c0] ss:$16 sps:$4 sm:$0xff]  }
  0x79   :  { %1705 = vmatpush1.bf16.msra.mxu1 %v4260_v30  ;;  %v4300_v61 = vld [vmem:[#allocation5 + $0x3c4] ss:$16 sps:$4 sm:$0xff]   ;;  %v4303_v63 = vld [vmem:[#allocation5 + $0x3c0] ss:$16 sps:$4 sm:$0xff]  }
  0x7a   :  { %1746 = vmatpush1.bf16.msra.mxu0 %v4261_v31  ;;  %1706 = vmatprep.subr.bf16.mxu1 %v4262_v32  ;;  %v4304_v0 = vld [vmem:[#allocation5 + $0x1e4] ss:$16 sps:$4 sm:$0xff]   ;;  %v4308_v2 = vld [vmem:[#allocation5 + $0x1e0] ss:$16 sps:$4 sm:$0xff]   ;;  %v4355_v31 = vld [vmem:[#allocation5 + $0xcc] ss:$16 sps:$4 sm:$0xff]  }
  0x7b   :  { %1747 = vmatprep.subr.bf16.mxu0 %v4264_v33  ;;  %v4306_v1 = vld [vmem:[#allocation5 + $0x3e4] ss:$16 sps:$4 sm:$0xff]   ;;  %v4309_v3 = vld [vmem:[#allocation5 + $0x3e0] ss:$16 sps:$4 sm:$0xff]  }
  0x7c   :  { %v4316_v4 = vld [vmem:[#allocation5 + $0x404] ss:$16 sps:$4 sm:$0xff]   ;;  %v4314_v8 = vld [vmem:[#allocation5 + $0x400] ss:$16 sps:$4 sm:$0xff]  }
  0x7d   :  { %1707 = vmatpush1.bf16.msra.mxu1 %v4266_v34  ;;  %v4322_v10 = vld [vmem:[#allocation5 + $0x424] ss:$16 sps:$4 sm:$0xff]   ;;  %v4320_v12 = vld [vmem:[#allocation5 + $0x420] ss:$16 sps:$4 sm:$0xff]  }
  0x7e   :  { %1748 = vmatpush1.bf16.msra.mxu0 %v4267_v35  ;;  %1708 = vmatprep.subr.bf16.mxu1 %v4268_v36  ;;  %v4328_v14 = vld [vmem:[#allocation5 + $0x444] ss:$16 sps:$4 sm:$0xff]   ;;  %v4326_v16 = vld [vmem:[#allocation5 + $0x440] ss:$16 sps:$4 sm:$0xff]   ;;  %v4353_v35 = vld [vmem:[#allocation5 + $0xc8] ss:$16 sps:$4 sm:$0xff]  }
  0x7f   :  { %1749 = vmatprep.subr.bf16.mxu0 %v4270_v37  ;;  %v4334_v18 = vld [vmem:[#allocation5 + $0x464] ss:$16 sps:$4 sm:$0xff]   ;;  %v4332_v20 = vld [vmem:[#allocation5 + $0x460] ss:$16 sps:$4 sm:$0xff]   ;;  %v4361_v37 = vld [vmem:[#allocation5 + $0xec] ss:$16 sps:$4 sm:$0xff]  }
  0x80   :  { %v4340_v22 = vld [vmem:[#allocation5 + $0x484] ss:$16 sps:$4 sm:$0xff]   ;;  %v4338_v24 = vld [vmem:[#allocation5 + $0x480] ss:$16 sps:$4 sm:$0xff]  }
  0x81   :  { %1709 = vmatpush1.bf16.msra.mxu1 %v4272_v38  ;;  %v4346_v26 = vld [vmem:[#allocation5 + $0x4a4] ss:$16 sps:$4 sm:$0xff]   ;;  %v4344_v28 = vld [vmem:[#allocation5 + $0x4a0] ss:$16 sps:$4 sm:$0xff]  }
  0x82   :  { %1750 = vmatpush1.bf16.msra.mxu0 %v4273_v39  ;;  %1710 = vmatprep.subr.bf16.mxu1 %v4274_v40  ;;  %v4352_v30 = vld [vmem:[#allocation5 + $0x4c4] ss:$16 sps:$4 sm:$0xff]   ;;  %v4350_v33 = vld [vmem:[#allocation5 + $0x4c0] ss:$16 sps:$4 sm:$0xff]   ;;  %v4359_v39 = vld [vmem:[#allocation5 + $0xe8] ss:$16 sps:$4 sm:$0xff]  }
  0x83   :  { %1751 = vmatprep.subr.bf16.mxu0 %v4276_v41  ;;  %v5198_v32 = vld [vmem:[#allocation2 + $0x10] sm:$0xff]  ;;  %v4367_v41 = vld [vmem:[#allocation5 + $0x10c] ss:$16 sps:$4 sm:$0xff]  }
  0x84   :  { %v5202_v34 = vcombine.high %v5198_v32, %v5198_v32  ;;  %v4358_v36 = vld [vmem:[#allocation5 + $0x4e4] ss:$16 sps:$4 sm:$0xff]   ;;  %v4356_v38 = vld [vmem:[#allocation5 + $0x4e0] ss:$16 sps:$4 sm:$0xff]  }
  0x85   :  { %1711 = vmatpush1.bf16.msra.mxu1 %v4278_v42  ;;  %v4364_v40 = vld [vmem:[#allocation5 + $0x504] ss:$16 sps:$4 sm:$0xff]   ;;  %v4362_v42 = vld [vmem:[#allocation5 + $0x500] ss:$16 sps:$4 sm:$0xff]  }
  0x86   :  { %1752 = vmatpush1.bf16.msra.mxu0 %v4279_v43  ;;  %1712 = vmatprep.subr.bf16.mxu1 %v4280_v44  ;;  %v4365_v43 = vld [vmem:[#allocation5 + $0x108] ss:$16 sps:$4 sm:$0xff]   ;;  %v4370_v44 = vld [vmem:[#allocation5 + $0x524] ss:$16 sps:$4 sm:$0xff]   ;;  %v4368_v46 = vld [vmem:[#allocation5 + $0x520] ss:$16 sps:$4 sm:$0xff]  }
  0x87   :  { %1753 = vmatprep.subr.bf16.mxu0 %v4282_v45  ;;  %v4373_v45 = vld [vmem:[#allocation5 + $0x12c] ss:$16 sps:$4 sm:$0xff]   ;;  %v4376_v48 = vld [vmem:[#allocation5 + $0x544] ss:$16 sps:$4 sm:$0xff]  }
  0x89   :  { %1713 = vmatpush1.bf16.msra.mxu1 %v4284_v49  ;;  %v4379_v49 = vld [vmem:[#allocation5 + $0x14c] ss:$16 sps:$4 sm:$0xff]  }
  0x8a   :  { %1754 = vmatpush1.bf16.msra.mxu0 %v4285_v50  ;;  %1714 = vmatprep.subr.bf16.mxu1 %v4286_v52  ;;  %v4374_v50 = vld [vmem:[#allocation5 + $0x540] ss:$16 sps:$4 sm:$0xff]   ;;  %v4377_v52 = vld [vmem:[#allocation5 + $0x148] ss:$16 sps:$4 sm:$0xff]  }
  0x8b   :  { %1755 = vmatprep.subr.bf16.mxu0 %v4288_v53  ;;  %v4382_v53 = vld [vmem:[#allocation5 + $0x564] ss:$16 sps:$4 sm:$0xff]  }
  0x8d   :  { %1715 = vmatpush1.bf16.msra.mxu1 %v4290_v54  ;;  %v4385_v54 = vld [vmem:[#allocation5 + $0x16c] ss:$16 sps:$4 sm:$0xff]  }
  0x8e   :  { %1756 = vmatpush1.bf16.msra.mxu0 %v4291_v55  ;;  %1716 = vmatprep.subr.bf16.mxu1 %v4292_v56  ;;  %v4380_v55 = vld [vmem:[#allocation5 + $0x560] ss:$16 sps:$4 sm:$0xff]   ;;  %v4383_v56 = vld [vmem:[#allocation5 + $0x168] ss:$16 sps:$4 sm:$0xff]  }
  0x8f   :  { %1757 = vmatprep.subr.bf16.mxu0 %v4294_v57  ;;  %v4388_v57 = vld [vmem:[#allocation5 + $0x584] ss:$16 sps:$4 sm:$0xff]  }
  0x91   :  { %1717 = vmatpush1.bf16.msra.mxu1 %v4296_v58  ;;  %v4391_v58 = vld [vmem:[#allocation5 + $0x18c] ss:$16 sps:$4 sm:$0xff]  }
  0x92   :  { %1758 = vmatpush1.bf16.msra.mxu0 %v4297_v59  ;;  %1718 = vmatprep.subr.bf16.mxu1 %v4298_v60  ;;  %v4386_v59 = vld [vmem:[#allocation5 + $0x580] ss:$16 sps:$4 sm:$0xff]   ;;  %v4389_v60 = vld [vmem:[#allocation5 + $0x188] ss:$16 sps:$4 sm:$0xff]  }
  0x93   :  { %1759 = vmatprep.subr.bf16.mxu0 %v4300_v61  ;;  %v4394_v61 = vld [vmem:[#allocation5 + $0x5a4] ss:$16 sps:$4 sm:$0xff]  }
  0x95   :  { %1719 = vmatpush1.bf16.msra.mxu1 %v4302_v62  ;;  %v4397_v62 = vld [vmem:[#allocation5 + $0x1ac] ss:$16 sps:$4 sm:$0xff]  }
  0x96   :  { %1760 = vmatpush1.bf16.msra.mxu0 %v4303_v63  ;;  %1720 = vmatprep.subr.bf16.mxu1 %v4304_v0  ;;  %v4392_v63 = vld [vmem:[#allocation5 + $0x5a0] ss:$16 sps:$4 sm:$0xff]   ;;  %v4395_v0 = vld [vmem:[#allocation5 + $0x1a8] ss:$16 sps:$4 sm:$0xff]  }
  0x97   :  { %1761 = vmatprep.subr.bf16.mxu0 %v4306_v1  ;;  %v4400_v1 = vld [vmem:[#allocation5 + $0x5c4] ss:$16 sps:$4 sm:$0xff]  }
  0x99   :  { %1721 = vmatpush1.bf16.msra.mxu1 %v4308_v2  ;;  %v4403_v2 = vld [vmem:[#allocation5 + $0x1cc] ss:$16 sps:$4 sm:$0xff]  }
  0x9a   :  { %1762 = vmatpush1.bf16.msra.mxu0 %v4309_v3  ;;  %1854 = vmatprep.subr.bf16.mxu1 %v4319_v5  ;;  %v4398_v3 = vld [vmem:[#allocation5 + $0x5c0] ss:$16 sps:$4 sm:$0xff]   ;;  %v4406_v5 = vld [vmem:[#allocation5 + $0x5e4] ss:$16 sps:$4 sm:$0xff]  }
  0x9b   :  { %1772 = vmatprep.subr.bf16.mxu0 %v4316_v4  ;;  %v4401_v4 = vld [vmem:[#allocation5 + $0x1c8] ss:$16 sps:$4 sm:$0xff]  }
  0x9c   :  { %1723 = vmatmul.mubr.bf16.vlgmr.msra.gmra.mrb[0].mxu1 %v5191_v6 }
  0x9d   :  { %1764 = vmatmul.mubr.bf16.vlgmr.msra.gmra.mrb[0].mxu0 %v5193_v7  ;;  %1855 = vmatpush1.bf16.msra.mxu1 %v4317_v9  ;;  %v4404_v9 = vld [vmem:[#allocation5 + $0x5e0] ss:$16 sps:$4 sm:$0xff]  }
  0x9e   :  { %1773 = vmatpush1.bf16.msra.mxu0 %v4314_v8  ;;  %1856 = vmatprep.subr.bf16.mxu1 %v4325_v11  ;;  %v4409_v8 = vld [vmem:[#allocation5 + $0x1ec] ss:$16 sps:$4 sm:$0xff]   ;;  %v4414_v11 = vld [vmem:[#allocation5 + $0x604] ss:$16 sps:$4 sm:$0xff]  }
  0x9f   :  { %1774 = vmatprep.subr.bf16.mxu0 %v4322_v10  ;;  %1886 = vmatprep.mubr.bf16.mxu1 %v5185_v47  ;;  %v4371_v47 = vld [vmem:[#allocation5 + $0x128] ss:$16 sps:$4 sm:$0xff]  }
  0xa0   :  { %1804 = vmatprep.mubr.bf16.mxu0 %v5202_v34  ;;  %v4407_v10 = vld [vmem:[#allocation5 + $0x1e8] ss:$16 sps:$4 sm:$0xff]  }
  0xa1   :  { %1857 = vmatpush1.bf16.msra.mxu1 %v4323_v13  ;;  %v5207_v13 = vcombine.low %v5198_v32, %v5198_v32  ;;  %v4439_v32 = vld [vmem:[#allocation5 + $0x288] ss:$16 sps:$4 sm:$0xff]  }
  0xa2   :  { %1775 = vmatpush1.bf16.msra.mxu0 %v4320_v12  ;;  %1858 = vmatprep.subr.bf16.mxu1 %v4331_v15  ;;  %v4417_v12 = vld [vmem:[#allocation5 + $0x20c] ss:$16 sps:$4 sm:$0xff]   ;;  %v4415_v15 = vld [vmem:[#allocation5 + $0x208] ss:$16 sps:$4 sm:$0xff]  }
  0xa3   :  { %1776 = vmatprep.subr.bf16.mxu0 %v4328_v14  ;;  %v4412_v14 = vld [vmem:[#allocation5 + $0x600] ss:$16 sps:$4 sm:$0xff]  }
  0xa5   :  { %1859 = vmatpush1.bf16.msra.mxu1 %v4329_v17  ;;  %v4423_v17 = vld [vmem:[#allocation5 + $0x22c] ss:$16 sps:$4 sm:$0xff]  }
  0xa6   :  { %1777 = vmatpush1.bf16.msra.mxu0 %v4326_v16  ;;  %1860 = vmatprep.subr.bf16.mxu1 %v4337_v19  ;;  %v4420_v16 = vld [vmem:[#allocation5 + $0x624] ss:$16 sps:$4 sm:$0xff]  }
  0xa7   :  { %1778 = vmatprep.subr.bf16.mxu0 %v4334_v18  ;;  %v5209_v18 = vld [vmem:[#allocation2 + $0x18] sm:$0xff] }
  0xa8   :  { %v5213_v19 = vcombine.high %v5209_v18, %v5209_v18 }
  0xa9   :  { %1861 = vmatpush1.bf16.msra.mxu1 %v4335_v21  ;;  %v4421_v21 = vld [vmem:[#allocation5 + $0x228] ss:$16 sps:$4 sm:$0xff]  }
  0xaa   :  { %1779 = vmatpush1.bf16.msra.mxu0 %v4332_v20  ;;  %1862 = vmatprep.subr.bf16.mxu1 %v4343_v23  ;;  %v4418_v20 = vld [vmem:[#allocation5 + $0x620] ss:$16 sps:$4 sm:$0xff]   ;;  %v4429_v23 = vld [vmem:[#allocation5 + $0x24c] ss:$16 sps:$4 sm:$0xff]  }
  0xab   :  { %1780 = vmatprep.subr.bf16.mxu0 %v4340_v22  ;;  %v4426_v22 = vld [vmem:[#allocation5 + $0x644] ss:$16 sps:$4 sm:$0xff]  }
  0xad   :  { %1863 = vmatpush1.bf16.msra.mxu1 %v4341_v25  ;;  %v4427_v25 = vld [vmem:[#allocation5 + $0x248] ss:$16 sps:$4 sm:$0xff]  }
  0xae   :  { %1781 = vmatpush1.bf16.msra.mxu0 %v4338_v24  ;;  %1864 = vmatprep.subr.bf16.mxu1 %v4349_v27  ;;  %v4424_v24 = vld [vmem:[#allocation5 + $0x640] ss:$16 sps:$4 sm:$0xff]  }
  0xaf   :  { %1782 = vmatprep.subr.bf16.mxu0 %v4346_v26  ;;  %v4432_v26 = vld [vmem:[#allocation5 + $0x664] ss:$16 sps:$4 sm:$0xff]   ;;  %v4430_v27 = vld [vmem:[#allocation5 + $0x660] ss:$16 sps:$4 sm:$0xff]  }
  0xb1   :  { %1865 = vmatpush1.bf16.msra.mxu1 %v4347_v29  ;;  %v4438_v29 = vld [vmem:[#allocation5 + $0x684] ss:$16 sps:$4 sm:$0xff]  }
  0xb2   :  { %1783 = vmatpush1.bf16.msra.mxu0 %v4344_v28  ;;  %1866 = vmatprep.subr.bf16.mxu1 %v4355_v31  ;;  %v4433_v28 = vld [vmem:[#allocation5 + $0x268] ss:$16 sps:$4 sm:$0xff]   ;;  %v4436_v31 = vld [vmem:[#allocation5 + $0x680] ss:$16 sps:$4 sm:$0xff]  }
  0xb3   :  { %1784 = vmatprep.subr.bf16.mxu0 %v4352_v30  ;;  %v4441_v30 = vld [vmem:[#allocation5 + $0x28c] ss:$16 sps:$4 sm:$0xff]  }
  0xb5   :  { %1867 = vmatpush1.bf16.msra.mxu1 %v4353_v35  ;;  %v4442_v35 = vld [vmem:[#allocation5 + $0x6a0] ss:$16 sps:$4 sm:$0xff]  }
  0xb6   :  { %1785 = vmatpush1.bf16.msra.mxu0 %v4350_v33  ;;  %1868 = vmatprep.subr.bf16.mxu1 %v4361_v37  ;;  %v4447_v33 = vld [vmem:[#allocation5 + $0x2ac] ss:$16 sps:$4 sm:$0xff]   ;;  %v4450_v37 = vld [vmem:[#allocation5 + $0x6c4] ss:$16 sps:$4 sm:$0xff]  }
  0xb7   :  { %1786 = vmatprep.subr.bf16.mxu0 %v4358_v36  ;;  %v4445_v36 = vld [vmem:[#allocation5 + $0x2a8] ss:$16 sps:$4 sm:$0xff]  }
  0xb9   :  { %1869 = vmatpush1.bf16.msra.mxu1 %v4359_v39  ;;  %v4448_v39 = vld [vmem:[#allocation5 + $0x6c0] ss:$16 sps:$4 sm:$0xff]  }
  0xba   :  { %1787 = vmatpush1.bf16.msra.mxu0 %v4356_v38  ;;  %1870 = vmatprep.subr.bf16.mxu1 %v4367_v41  ;;  %v4453_v38 = vld [vmem:[#allocation5 + $0x2cc] ss:$16 sps:$4 sm:$0xff]   ;;  %v4456_v41 = vld [vmem:[#allocation5 + $0x6e4] ss:$16 sps:$4 sm:$0xff]  }
  0xbb   :  { %1788 = vmatprep.subr.bf16.mxu0 %v4364_v40  ;;  %v4451_v40 = vld [vmem:[#allocation5 + $0x2c8] ss:$16 sps:$4 sm:$0xff]  }
  0xbd   :  { %1871 = vmatpush1.bf16.msra.mxu1 %v4365_v43  ;;  %v4454_v43 = vld [vmem:[#allocation5 + $0x6e0] ss:$16 sps:$4 sm:$0xff]  }
  0xbe   :  { %1789 = vmatpush1.bf16.msra.mxu0 %v4362_v42  ;;  %1872 = vmatprep.subr.bf16.mxu1 %v4373_v45  ;;  %v4459_v42 = vld [vmem:[#allocation5 + $0x2ec] ss:$16 sps:$4 sm:$0xff]   ;;  %v4462_v45 = vld [vmem:[#allocation5 + $0x704] ss:$16 sps:$4 sm:$0xff]  }
  0xbf   :  { %1790 = vmatprep.subr.bf16.mxu0 %v4370_v44  ;;  %v4457_v44 = vld [vmem:[#allocation5 + $0x2e8] ss:$16 sps:$4 sm:$0xff]  }
  0xc1   :  { %1873 = vmatpush1.bf16.msra.mxu1 %v4371_v47  ;;  %v4460_v47 = vld [vmem:[#allocation5 + $0x700] ss:$16 sps:$4 sm:$0xff]  }
  0xc2   :  { %1791 = vmatpush1.bf16.msra.mxu0 %v4368_v46  ;;  %1874 = vmatprep.subr.bf16.mxu1 %v4379_v49  ;;  %v4465_v46 = vld [vmem:[#allocation5 + $0x30c] ss:$16 sps:$4 sm:$0xff]   ;;  %v4468_v49 = vld [vmem:[#allocation5 + $0x724] ss:$16 sps:$4 sm:$0xff]  }
  0xc3   :  { %1792 = vmatprep.subr.bf16.mxu0 %v4376_v48  ;;  %v4463_v48 = vld [vmem:[#allocation5 + $0x308] ss:$16 sps:$4 sm:$0xff]  }
  0xc5   :  { %1875 = vmatpush1.bf16.msra.mxu1 %v4377_v52  ;;  %v4466_v52 = vld [vmem:[#allocation5 + $0x720] ss:$16 sps:$4 sm:$0xff]  }
  0xc6   :  { %1793 = vmatpush1.bf16.msra.mxu0 %v4374_v50  ;;  %1876 = vmatprep.subr.bf16.mxu1 %v4385_v54  ;;  %v4471_v50 = vld [vmem:[#allocation5 + $0x32c] ss:$16 sps:$4 sm:$0xff]   ;;  %v4474_v54 = vld [vmem:[#allocation5 + $0x744] ss:$16 sps:$4 sm:$0xff]  }
  0xc7   :  { %1794 = vmatprep.subr.bf16.mxu0 %v4382_v53  ;;  %v4469_v53 = vld [vmem:[#allocation5 + $0x328] ss:$16 sps:$4 sm:$0xff]  }
  0xc9   :  { %1877 = vmatpush1.bf16.msra.mxu1 %v4383_v56  ;;  %v4472_v56 = vld [vmem:[#allocation5 + $0x740] ss:$16 sps:$4 sm:$0xff]  }
  0xca   :  { %1795 = vmatpush1.bf16.msra.mxu0 %v4380_v55  ;;  %1878 = vmatprep.subr.bf16.mxu1 %v4391_v58  ;;  %v4477_v55 = vld [vmem:[#allocation5 + $0x34c] ss:$16 sps:$4 sm:$0xff]   ;;  %v4480_v58 = vld [vmem:[#allocation5 + $0x764] ss:$16 sps:$4 sm:$0xff]  }
  0xcb   :  { %1796 = vmatprep.subr.bf16.mxu0 %v4388_v57  ;;  %v4475_v57 = vld [vmem:[#allocation5 + $0x348] ss:$16 sps:$4 sm:$0xff]  }
  0xcd   :  { %1879 = vmatpush1.bf16.msra.mxu1 %v4389_v60  ;;  %v4478_v60 = vld [vmem:[#allocation5 + $0x760] ss:$16 sps:$4 sm:$0xff]  }
  0xce   :  { %1797 = vmatpush1.bf16.msra.mxu0 %v4386_v59  ;;  %1880 = vmatprep.subr.bf16.mxu1 %v4397_v62  ;;  %v4483_v59 = vld [vmem:[#allocation5 + $0x36c] ss:$16 sps:$4 sm:$0xff]   ;;  %v4486_v62 = vld [vmem:[#allocation5 + $0x784] ss:$16 sps:$4 sm:$0xff]  }
  0xcf   :  { %1798 = vmatprep.subr.bf16.mxu0 %v4394_v61  ;;  %v4481_v61 = vld [vmem:[#allocation5 + $0x368] ss:$16 sps:$4 sm:$0xff]  }
  0xd1   :  { %1881 = vmatpush1.bf16.msra.mxu1 %v4395_v0  ;;  %v4484_v0 = vld [vmem:[#allocation5 + $0x780] ss:$16 sps:$4 sm:$0xff]  }
  0xd2   :  { %1799 = vmatpush1.bf16.msra.mxu0 %v4392_v63  ;;  %1882 = vmatprep.subr.bf16.mxu1 %v4403_v2  ;;  %v4489_v63 = vld [vmem:[#allocation5 + $0x38c] ss:$16 sps:$4 sm:$0xff]   ;;  %v4492_v2 = vld [vmem:[#allocation5 + $0x7a4] ss:$16 sps:$4 sm:$0xff]  }
  0xd3   :  { %1800 = vmatprep.subr.bf16.mxu0 %v4400_v1  ;;  %v4487_v1 = vld [vmem:[#allocation5 + $0x388] ss:$16 sps:$4 sm:$0xff]  }
  0xd5   :  { %1883 = vmatpush1.bf16.msra.mxu1 %v4401_v4  ;;  %v4490_v4 = vld [vmem:[#allocation5 + $0x7a0] ss:$16 sps:$4 sm:$0xff]  }
  0xd6   :  { %1801 = vmatpush1.bf16.msra.mxu0 %v4398_v3  ;;  %1884 = vmatprep.subr.bf16.mxu1 %v4409_v8  ;;  %v4495_v3 = vld [vmem:[#allocation5 + $0x3ac] ss:$16 sps:$4 sm:$0xff]   ;;  %v4498_v8 = vld [vmem:[#allocation5 + $0x7c4] ss:$16 sps:$4 sm:$0xff]  }
  0xd7   :  { %1802 = vmatprep.subr.bf16.mxu0 %v4406_v5  ;;  %v4493_v5 = vld [vmem:[#allocation5 + $0x3a8] ss:$16 sps:$4 sm:$0xff]  }
  0xd9   :  { %1885 = vmatpush1.bf16.msra.mxu1 %v4407_v10  ;;  %v4496_v10 = vld [vmem:[#allocation5 + $0x7c0] ss:$16 sps:$4 sm:$0xff]  }
  0xda   :  { %1803 = vmatpush1.bf16.msra.mxu0 %v4404_v9  ;;  %1895 = vmatprep.subr.bf16.mxu1 %v4417_v12  ;;  %v4501_v9 = vld [vmem:[#allocation5 + $0x3cc] ss:$16 sps:$4 sm:$0xff]   ;;  %v4504_v12 = vld [vmem:[#allocation5 + $0x7e4] ss:$16 sps:$4 sm:$0xff]  }
  0xdb   :  { %1813 = vmatprep.subr.bf16.mxu0 %v4414_v11  ;;  %v4499_v11 = vld [vmem:[#allocation5 + $0x3c8] ss:$16 sps:$4 sm:$0xff]  }
  0xdc   :  { %1887 = vmatmul.mubr.bf16.vlgmr.msra.gmra.mrb[4].mxu1 %v5191_v6  ;;  %v4435_v6 = vld [vmem:[#allocation5 + $0x26c] ss:$16 sps:$4 sm:$0xff]  }
  0xdd   :  { %1805 = vmatmul.mubr.bf16.vlgmr.msra.gmra.mrb[0].mxu0 %v5207_v13  ;;  %1896 = vmatpush1.bf16.msra.mxu1 %v4415_v15  ;;  %v4502_v15 = vld [vmem:[#allocation5 + $0x7e0] ss:$16 sps:$4 sm:$0xff]  }
  0xde   :  { %1814 = vmatpush1.bf16.msra.mxu0 %v4412_v14  ;;  %1897 = vmatprep.subr.bf16.mxu1 %v4423_v17  ;;  %v4507_v14 = vld [vmem:[#allocation5 + $0x3ec] ss:$16 sps:$4 sm:$0xff]  }
  0xdf   :  { %1815 = vmatprep.subr.bf16.mxu0 %v4420_v16  ;;  %1845 = vmatprep.mubr.bf16.mxu0 %v5213_v19  ;;  %v4505_v16 = vld [vmem:[#allocation5 + $0x3e8] ss:$16 sps:$4 sm:$0xff]   ;;  %v4512_v17 = vld [vmem:[#allocation5 + $0x40c] ss:$16 sps:$4 sm:$0xff]  }
  0xe0   :  { %1927 = vmatprep.mubr.bf16.mxu1 %v5187_v51  ;;  %v4444_v51 = vld [vmem:[#allocation5 + $0x6a4] ss:$16 sps:$4 sm:$0xff]  }
  0xe1   :  { %1898 = vmatpush1.bf16.msra.mxu1 %v4421_v21  ;;  %v5221_v21 = vcombine.low %v5209_v18, %v5209_v18  ;;  %v4612_v18 = vld [vmem:[#allocation7 + $0x20] ss:$16 sps:$4 sm:$0xff]  }
  0xe2   :  { %1816 = vmatpush1.bf16.msra.mxu0 %v4418_v20  ;;  %1899 = vmatprep.subr.bf16.mxu1 %v4429_v23  ;;  %v4510_v20 = vld [vmem:[#allocation5 + $0x408] ss:$16 sps:$4 sm:$0xff]   ;;  %v4606_v23 = vld [vmem:[#allocation7] ss:$16 sps:$4 sm:$0xff]  }
  0xe3   :  { %1817 = vmatprep.subr.bf16.mxu0 %v4426_v22  ;;  %v4515_v22 = vld [vmem:[#allocation5 + $0x42c] ss:$16 sps:$4 sm:$0xff]  }
  0xe5   :  { %1900 = vmatpush1.bf16.msra.mxu1 %v4427_v25  ;;  %v4513_v25 = vld [vmem:[#allocation5 + $0x428] ss:$16 sps:$4 sm:$0xff]  }
  0xe6   :  { %1818 = vmatpush1.bf16.msra.mxu0 %v4424_v24  ;;  %1901 = vmatprep.subr.bf16.mxu1 %v4435_v6  ;;  %v4608_v24 = vld [vmem:[#allocation7 + $0x4] ss:$16 sps:$4 sm:$0xff]   ;;  %v4518_v6 = vld [vmem:[#allocation5 + $0x44c] ss:$16 sps:$4 sm:$0xff]  }
  0xe7   :  { %1819 = vmatprep.subr.bf16.mxu0 %v4432_v26  ;;  %v4614_v26 = vld [vmem:[#allocation7 + $0x24] ss:$16 sps:$4 sm:$0xff]  }
  0xe9   :  { %1902 = vmatpush1.bf16.msra.mxu1 %v4433_v28  ;;  %v4521_v28 = vld [vmem:[#allocation5 + $0x46c] ss:$16 sps:$4 sm:$0xff]  }
  0xea   :  { %1820 = vmatpush1.bf16.msra.mxu0 %v4430_v27  ;;  %1903 = vmatprep.subr.bf16.mxu1 %v4441_v30  ;;  %v4516_v27 = vld [vmem:[#allocation5 + $0x448] ss:$16 sps:$4 sm:$0xff]   ;;  %v4618_v30 = vld [vmem:[#allocation7 + $0x40] ss:$16 sps:$4 sm:$0xff]  }
  0xeb   :  { %1821 = vmatprep.subr.bf16.mxu0 %v4438_v29  ;;  %v4620_v29 = vld [vmem:[#allocation7 + $0x44] ss:$16 sps:$4 sm:$0xff]  }
  0xed   :  { %1904 = vmatpush1.bf16.msra.mxu1 %v4439_v32  ;;  %v4626_v32 = vld [vmem:[#allocation7 + $0x64] ss:$16 sps:$4 sm:$0xff]  }
  0xee   :  { %1822 = vmatpush1.bf16.msra.mxu0 %v4436_v31  ;;  %1905 = vmatprep.subr.bf16.mxu1 %v4447_v33  ;;  %v4524_v31 = vld [vmem:[#allocation5 + $0x48c] ss:$16 sps:$4 sm:$0xff]  }
  0xef   :  { %1823 = vmatprep.subr.bf16.mxu0 %v4444_v51  ;;  %v4522_v51 = vld [vmem:[#allocation5 + $0x488] ss:$16 sps:$4 sm:$0xff]   ;;  %v4527_v33 = vld [vmem:[#allocation5 + $0x4ac] ss:$16 sps:$4 sm:$0xff]  }
  0xf1   :  { %1906 = vmatpush1.bf16.msra.mxu1 %v4445_v36  ;;  %v4630_v36 = vld [vmem:[#allocation7 + $0x80] ss:$16 sps:$4 sm:$0xff]  }
  0xf2   :  { %1824 = vmatpush1.bf16.msra.mxu0 %v4442_v35  ;;  %1907 = vmatprep.subr.bf16.mxu1 %v4453_v38  ;;  %v4632_v35 = vld [vmem:[#allocation7 + $0x84] ss:$16 sps:$4 sm:$0xff]   ;;  %v4530_v38 = vld [vmem:[#allocation5 + $0x4cc] ss:$16 sps:$4 sm:$0xff]  }
  0xf3   :  { %1825 = vmatprep.subr.bf16.mxu0 %v4450_v37  ;;  %v4525_v37 = vld [vmem:[#allocation5 + $0x4a8] ss:$16 sps:$4 sm:$0xff]  }
  0xf5   :  { %1908 = vmatpush1.bf16.msra.mxu1 %v4451_v40  ;;  %v4636_v40 = vld [vmem:[#allocation7 + $0xa0] ss:$16 sps:$4 sm:$0xff]  }
  0xf6   :  { %1826 = vmatpush1.bf16.msra.mxu0 %v4448_v39  ;;  %1909 = vmatprep.subr.bf16.mxu1 %v4459_v42  ;;  %v4638_v39 = vld [vmem:[#allocation7 + $0xa4] ss:$16 sps:$4 sm:$0xff]   ;;  %v4533_v42 = vld [vmem:[#allocation5 + $0x4ec] ss:$16 sps:$4 sm:$0xff]  }
  0xf7   :  { %1827 = vmatprep.subr.bf16.mxu0 %v4456_v41  ;;  %v4528_v41 = vld [vmem:[#allocation5 + $0x4c8] ss:$16 sps:$4 sm:$0xff]  }
  0xf9   :  { %1910 = vmatpush1.bf16.msra.mxu1 %v4457_v44  ;;  %v4642_v44 = vld [vmem:[#allocation7 + $0xc0] ss:$16 sps:$4 sm:$0xff]  }
  0xfa   :  { %1828 = vmatpush1.bf16.msra.mxu0 %v4454_v43  ;;  %1911 = vmatprep.subr.bf16.mxu1 %v4465_v46  ;;  %v4644_v43 = vld [vmem:[#allocation7 + $0xc4] ss:$16 sps:$4 sm:$0xff]   ;;  %v4536_v46 = vld [vmem:[#allocation5 + $0x50c] ss:$16 sps:$4 sm:$0xff]  }
  0xfb   :  { %1829 = vmatprep.subr.bf16.mxu0 %v4462_v45  ;;  %v4531_v45 = vld [vmem:[#allocation5 + $0x4e8] ss:$16 sps:$4 sm:$0xff]  }
  0xfd   :  { %1912 = vmatpush1.bf16.msra.mxu1 %v4463_v48  ;;  %v4648_v48 = vld [vmem:[#allocation7 + $0xe0] ss:$16 sps:$4 sm:$0xff]  }
  0xfe   :  { %1830 = vmatpush1.bf16.msra.mxu0 %v4460_v47  ;;  %1913 = vmatprep.subr.bf16.mxu1 %v4471_v50  ;;  %v4650_v47 = vld [vmem:[#allocation7 + $0xe4] ss:$16 sps:$4 sm:$0xff]   ;;  %v4539_v50 = vld [vmem:[#allocation5 + $0x52c] ss:$16 sps:$4 sm:$0xff]  }
  0xff   :  { %1831 = vmatprep.subr.bf16.mxu0 %v4468_v49  ;;  %v4534_v49 = vld [vmem:[#allocation5 + $0x508] ss:$16 sps:$4 sm:$0xff]  }
 0x101   :  { %1914 = vmatpush1.bf16.msra.mxu1 %v4469_v53  ;;  %v4654_v53 = vld [vmem:[#allocation7 + $0x100] ss:$16 sps:$4 sm:$0xff]  }
 0x102   :  { %1832 = vmatpush1.bf16.msra.mxu0 %v4466_v52  ;;  %1915 = vmatprep.subr.bf16.mxu1 %v4477_v55  ;;  %v4656_v52 = vld [vmem:[#allocation7 + $0x104] ss:$16 sps:$4 sm:$0xff]   ;;  %v4542_v55 = vld [vmem:[#allocation5 + $0x54c] ss:$16 sps:$4 sm:$0xff]  }
 0x103   :  { %1833 = vmatprep.subr.bf16.mxu0 %v4474_v54  ;;  %v4537_v54 = vld [vmem:[#allocation5 + $0x528] ss:$16 sps:$4 sm:$0xff]  }
 0x105   :  { %1916 = vmatpush1.bf16.msra.mxu1 %v4475_v57  ;;  %v4660_v57 = vld [vmem:[#allocation7 + $0x120] ss:$16 sps:$4 sm:$0xff]  }
 0x106   :  { %1834 = vmatpush1.bf16.msra.mxu0 %v4472_v56  ;;  %1917 = vmatprep.subr.bf16.mxu1 %v4483_v59  ;;  %v4662_v56 = vld [vmem:[#allocation7 + $0x124] ss:$16 sps:$4 sm:$0xff]   ;;  %v4545_v59 = vld [vmem:[#allocation5 + $0x56c] ss:$16 sps:$4 sm:$0xff]  }
 0x107   :  { %1835 = vmatprep.subr.bf16.mxu0 %v4480_v58  ;;  %v4540_v58 = vld [vmem:[#allocation5 + $0x548] ss:$16 sps:$4 sm:$0xff]  }
 0x109   :  { %1918 = vmatpush1.bf16.msra.mxu1 %v4481_v61  ;;  %v4666_v61 = vld [vmem:[#allocation7 + $0x140] ss:$16 sps:$4 sm:$0xff]  }
 0x10a   :  { %1836 = vmatpush1.bf16.msra.mxu0 %v4478_v60  ;;  %1919 = vmatprep.subr.bf16.mxu1 %v4489_v63  ;;  %v4668_v60 = vld [vmem:[#allocation7 + $0x144] ss:$16 sps:$4 sm:$0xff]   ;;  %v4548_v63 = vld [vmem:[#allocation5 + $0x58c] ss:$16 sps:$4 sm:$0xff]  }
 0x10b   :  { %1837 = vmatprep.subr.bf16.mxu0 %v4486_v62  ;;  %v4543_v62 = vld [vmem:[#allocation5 + $0x568] ss:$16 sps:$4 sm:$0xff]  }
 0x10d   :  { %1920 = vmatpush1.bf16.msra.mxu1 %v4487_v1  ;;  %v4672_v1 = vld [vmem:[#allocation7 + $0x160] ss:$16 sps:$4 sm:$0xff]  }
 0x10e   :  { %1838 = vmatpush1.bf16.msra.mxu0 %v4484_v0  ;;  %1921 = vmatprep.subr.bf16.mxu1 %v4495_v3  ;;  %v4674_v0 = vld [vmem:[#allocation7 + $0x164] ss:$16 sps:$4 sm:$0xff]   ;;  %v4551_v3 = vld [vmem:[#allocation5 + $0x5ac] ss:$16 sps:$4 sm:$0xff]  }
 0x10f   :  { %1839 = vmatprep.subr.bf16.mxu0 %v4492_v2  ;;  %v4546_v2 = vld [vmem:[#allocation5 + $0x588] ss:$16 sps:$4 sm:$0xff]  }
 0x111   :  { %1922 = vmatpush1.bf16.msra.mxu1 %v4493_v5  ;;  %v4678_v5 = vld [vmem:[#allocation7 + $0x180] ss:$16 sps:$4 sm:$0xff]  }
 0x112   :  { %1840 = vmatpush1.bf16.msra.mxu0 %v4490_v4  ;;  %1923 = vmatprep.subr.bf16.mxu1 %v4501_v9  ;;  %v4680_v4 = vld [vmem:[#allocation7 + $0x184] ss:$16 sps:$4 sm:$0xff]   ;;  %v4554_v9 = vld [vmem:[#allocation5 + $0x5cc] ss:$16 sps:$4 sm:$0xff]  }
 0x113   :  { %1841 = vmatprep.subr.bf16.mxu0 %v4498_v8  ;;  %v4549_v8 = vld [vmem:[#allocation5 + $0x5a8] ss:$16 sps:$4 sm:$0xff]  }
 0x115   :  { %1924 = vmatpush1.bf16.msra.mxu1 %v4499_v11  ;;  %v4684_v11 = vld [vmem:[#allocation7 + $0x1a0] ss:$16 sps:$4 sm:$0xff]  }
 0x116   :  { %1842 = vmatpush1.bf16.msra.mxu0 %v4496_v10  ;;  %1925 = vmatprep.subr.bf16.mxu1 %v4507_v14  ;;  %v4686_v10 = vld [vmem:[#allocation7 + $0x1a4] ss:$16 sps:$4 sm:$0xff]   ;;  %v4557_v14 = vld [vmem:[#allocation5 + $0x5ec] ss:$16 sps:$4 sm:$0xff]  }
 0x117   :  { %1843 = vmatprep.subr.bf16.mxu0 %v4504_v12  ;;  %v4552_v12 = vld [vmem:[#allocation5 + $0x5c8] ss:$16 sps:$4 sm:$0xff]  }
 0x119   :  { %1926 = vmatpush1.bf16.msra.mxu1 %v4505_v16  ;;  %v4560_v16 = vld [vmem:[#allocation5 + $0x60c] ss:$16 sps:$4 sm:$0xff]  }
 0x11a   :  { %1844 = vmatpush1.bf16.msra.mxu0 %v4502_v15  ;;  %1936 = vmatprep.subr.bf16.mxu1 %v4512_v17  ;;  %v4555_v15 = vld [vmem:[#allocation5 + $0x5e8] ss:$16 sps:$4 sm:$0xff]  }
 0x11b   :  { %2816 = vmatprep.subr.bf16.mxu0 %v4608_v24  ;;  %v4558_v17 = vld [vmem:[#allocation5 + $0x608] ss:$16 sps:$4 sm:$0xff]  }
 0x11c   :  { %1928 = vmatmul.mubr.bf16.vlgmr.msra.gmra.mrb[4].mxu1 %v5193_v7  ;;  %v4519_v7 = vld [vmem:[#allocation5 + $0x468] ss:$16 sps:$4 sm:$0xff]  }
 0x11d   :  { %1846 = vmatmul.mubr.bf16.vlgmr.msra.gmra.mrb[0].mxu0 %v5221_v21  ;;  %1937 = vmatpush1.bf16.msra.mxu1 %v4510_v20  ;;  %v4563_v20 = vld [vmem:[#allocation5 + $0x62c] ss:$16 sps:$4 sm:$0xff]   ;;  %v4564_v24 = vld [vmem:[#allocation5 + $0x648] ss:$16 sps:$4 sm:$0xff]  }
 0x11e   :  { %1968 = vmatprep.mubr.bf16.mxu1 %v5202_v34  ;;  %1938 = vmatprep.subr.bf16.mxu1 %v4515_v22  ;;  %v4624_v34 = vld [vmem:[#allocation7 + $0x60] ss:$16 sps:$4 sm:$0xff]   ;;  %v4561_v22 = vld [vmem:[#allocation5 + $0x628] ss:$16 sps:$4 sm:$0xff]  }
 0x11f   :  { %2817 = vmatpush1.bf16.msra.mxu0 %v4606_v23  ;;  %v4566_v23 = vld [vmem:[#allocation5 + $0x64c] ss:$16 sps:$4 sm:$0xff]  }
 0x120   :  { %2818 = vmatprep.subr.bf16.mxu0 %v4614_v26  ;;  %v4567_v26 = vld [vmem:[#allocation5 + $0x668] ss:$16 sps:$4 sm:$0xff]  }
 0x121   :  { %1939 = vmatpush1.bf16.msra.mxu1 %v4513_v25  ;;  %v4569_v25 = vld [vmem:[#allocation5 + $0x66c] ss:$16 sps:$4 sm:$0xff]  }
 0x122   :  { %1940 = vmatprep.subr.bf16.mxu1 %v4518_v6  ;;  %v4572_v6 = vld [vmem:[#allocation5 + $0x68c] ss:$16 sps:$4 sm:$0xff]  }
 0x123   :  { %2819 = vmatpush1.bf16.msra.mxu0 %v4612_v18  ;;  %v4570_v18 = vld [vmem:[#allocation5 + $0x688] ss:$16 sps:$4 sm:$0xff]  }
 0x124   :  { %2820 = vmatprep.subr.bf16.mxu0 %v4620_v29  ;;  %v4692_v29 = vld [vmem:[#allocation7 + $0x1c4] ss:$16 sps:$4 sm:$0xff]  }
 0x125   :  { %1941 = vmatpush1.bf16.msra.mxu1 %v4516_v27  ;;  %v4575_v27 = vld [vmem:[#allocation5 + $0x6ac] ss:$16 sps:$4 sm:$0xff]  }
 0x126   :  { %1942 = vmatprep.subr.bf16.mxu1 %v4521_v28  ;;  %v4573_v28 = vld [vmem:[#allocation5 + $0x6a8] ss:$16 sps:$4 sm:$0xff]  }
 0x127   :  { %2821 = vmatpush1.bf16.msra.mxu0 %v4618_v30 }
 0x128   :  { %2822 = vmatprep.subr.bf16.mxu0 %v4626_v32  ;;  %v4576_v32 = vld [vmem:[#allocation5 + $0x6c8] ss:$16 sps:$4 sm:$0xff]  }
 0x129   :  { %1943 = vmatpush1.bf16.msra.mxu1 %v4519_v7 }
 0x12a   :  { %1944 = vmatprep.subr.bf16.mxu1 %v4524_v31 }
 0x12b   :  { %2823 = vmatpush1.bf16.msra.mxu0 %v4624_v34 }
 0x12c   :  { %2824 = vmatprep.subr.bf16.mxu0 %v4632_v35  ;;  %v4696_v35 = vld [vmem:[#allocation7 + $0x1e0] ss:$16 sps:$4 sm:$0xff]  }
 0x12d   :  { %1945 = vmatpush1.bf16.msra.mxu1 %v4522_v51  ;;  %v4581_v51 = vld [vmem:[#allocation5 + $0x6ec] ss:$16 sps:$4 sm:$0xff]  }
 0x12e   :  { %1946 = vmatprep.subr.bf16.mxu1 %v4527_v33  ;;  %v4698_v33 = vld [vmem:[#allocation7 + $0x1e4] ss:$16 sps:$4 sm:$0xff]  }
 0x12f   :  { %2825 = vmatpush1.bf16.msra.mxu0 %v4630_v36  ;;  %v4579_v36 = vld [vmem:[#allocation5 + $0x6e8] ss:$16 sps:$4 sm:$0xff]  }
 0x130   :  { %2826 = vmatprep.subr.bf16.mxu0 %v4638_v39  ;;  %v4582_v39 = vld [vmem:[#allocation5 + $0x708] ss:$16 sps:$4 sm:$0xff]  }
 0x131   :  { %1947 = vmatpush1.bf16.msra.mxu1 %v4525_v37  ;;  %v4584_v37 = vld [vmem:[#allocation5 + $0x70c] ss:$16 sps:$4 sm:$0xff]  }
 0x132   :  { %1948 = vmatprep.subr.bf16.mxu1 %v4530_v38  ;;  %v4704_v38 = vld [vmem:[#allocation7 + $0x204] ss:$16 sps:$4 sm:$0xff]  }
 0x133   :  { %2827 = vmatpush1.bf16.msra.mxu0 %v4636_v40  ;;  %v4587_v40 = vld [vmem:[#allocation5 + $0x72c] ss:$16 sps:$4 sm:$0xff]  }
 0x134   :  { %2828 = vmatprep.subr.bf16.mxu0 %v4644_v43  ;;  %v4588_v43 = vld [vmem:[#allocation5 + $0x748] ss:$16 sps:$4 sm:$0xff]  }
 0x135   :  { %1949 = vmatpush1.bf16.msra.mxu1 %v4528_v41  ;;  %v4585_v41 = vld [vmem:[#allocation5 + $0x728] ss:$16 sps:$4 sm:$0xff]  }
 0x136   :  { %1950 = vmatprep.subr.bf16.mxu1 %v4533_v42  ;;  %v4590_v42 = vld [vmem:[#allocation5 + $0x74c] ss:$16 sps:$4 sm:$0xff]  }
 0x137   :  { %2829 = vmatpush1.bf16.msra.mxu0 %v4642_v44  ;;  %v4593_v44 = vld [vmem:[#allocation5 + $0x76c] ss:$16 sps:$4 sm:$0xff]  }
 0x138   :  { %2830 = vmatprep.subr.bf16.mxu0 %v4650_v47  ;;  %v4594_v47 = vld [vmem:[#allocation5 + $0x788] ss:$16 sps:$4 sm:$0xff]  }
 0x139   :  { %1951 = vmatpush1.bf16.msra.mxu1 %v4531_v45  ;;  %v4591_v45 = vld [vmem:[#allocation5 + $0x768] ss:$16 sps:$4 sm:$0xff]  }
 0x13a   :  { %1952 = vmatprep.subr.bf16.mxu1 %v4536_v46  ;;  %v4596_v46 = vld [vmem:[#allocation5 + $0x78c] ss:$16 sps:$4 sm:$0xff]  }
 0x13b   :  { %2831 = vmatpush1.bf16.msra.mxu0 %v4648_v48  ;;  %v4599_v48 = vld [vmem:[#allocation5 + $0x7ac] ss:$16 sps:$4 sm:$0xff]  }
 0x13c   :  { %2832 = vmatprep.subr.bf16.mxu0 %v4656_v52  ;;  %v4600_v52 = vld [vmem:[#allocation5 + $0x7c8] ss:$16 sps:$4 sm:$0xff]  }
 0x13d   :  { %1953 = vmatpush1.bf16.msra.mxu1 %v4534_v49  ;;  %v4597_v49 = vld [vmem:[#allocation5 + $0x7a8] ss:$16 sps:$4 sm:$0xff]  }
 0x13e   :  { %1954 = vmatprep.subr.bf16.mxu1 %v4539_v50  ;;  %v4602_v50 = vld [vmem:[#allocation5 + $0x7cc] ss:$16 sps:$4 sm:$0xff]  }
 0x13f   :  { %2833 = vmatpush1.bf16.msra.mxu0 %v4654_v53  ;;  %v4605_v53 = vld [vmem:[#allocation5 + $0x7ec] ss:$16 sps:$4 sm:$0xff]  }
 0x140   :  { %2834 = vmatprep.subr.bf16.mxu0 %v4662_v56  ;;  %v4609_v56 = vld [vmem:[#allocation7 + $0x8] ss:$16 sps:$4 sm:$0xff]  }
 0x141   :  { %1955 = vmatpush1.bf16.msra.mxu1 %v4537_v54  ;;  %v4603_v54 = vld [vmem:[#allocation5 + $0x7e8] ss:$16 sps:$4 sm:$0xff]  }
 0x142   :  { %1956 = vmatprep.subr.bf16.mxu1 %v4542_v55  ;;  %v4611_v55 = vld [vmem:[#allocation7 + $0xc] ss:$16 sps:$4 sm:$0xff]  }
 0x143   :  { %2835 = vmatpush1.bf16.msra.mxu0 %v4660_v57  ;;  %v4617_v57 = vld [vmem:[#allocation7 + $0x2c] ss:$16 sps:$4 sm:$0xff]  }
 0x144   :  { %2836 = vmatprep.subr.bf16.mxu0 %v4668_v60  ;;  %v4621_v60 = vld [vmem:[#allocation7 + $0x48] ss:$16 sps:$4 sm:$0xff]  }
 0x145   :  { %1957 = vmatpush1.bf16.msra.mxu1 %v4540_v58  ;;  %v4615_v58 = vld [vmem:[#allocation7 + $0x28] ss:$16 sps:$4 sm:$0xff]  }
 0x146   :  { %1958 = vmatprep.subr.bf16.mxu1 %v4545_v59  ;;  %v4623_v59 = vld [vmem:[#allocation7 + $0x4c] ss:$16 sps:$4 sm:$0xff]  }
 0x147   :  { %2837 = vmatpush1.bf16.msra.mxu0 %v4666_v61  ;;  %v4629_v61 = vld [vmem:[#allocation7 + $0x6c] ss:$16 sps:$4 sm:$0xff]  }
 0x148   :  { %2838 = vmatprep.subr.bf16.mxu0 %v4674_v0  ;;  %v4633_v0 = vld [vmem:[#allocation7 + $0x88] ss:$16 sps:$4 sm:$0xff]  }
 0x149   :  { %1959 = vmatpush1.bf16.msra.mxu1 %v4543_v62  ;;  %v4627_v62 = vld [vmem:[#allocation7 + $0x68] ss:$16 sps:$4 sm:$0xff]  }
 0x14a   :  { %1960 = vmatprep.subr.bf16.mxu1 %v4548_v63  ;;  %v4635_v63 = vld [vmem:[#allocation7 + $0x8c] ss:$16 sps:$4 sm:$0xff]  }
 0x14b   :  { %2839 = vmatpush1.bf16.msra.mxu0 %v4672_v1  ;;  %v4641_v1 = vld [vmem:[#allocation7 + $0xac] ss:$16 sps:$4 sm:$0xff]  }
 0x14c   :  { %2840 = vmatprep.subr.bf16.mxu0 %v4680_v4  ;;  %v4653_v4 = vld [vmem:[#allocation7 + $0xec] ss:$16 sps:$4 sm:$0xff]  }
 0x14d   :  { %1961 = vmatpush1.bf16.msra.mxu1 %v4546_v2  ;;  %v4639_v2 = vld [vmem:[#allocation7 + $0xa8] ss:$16 sps:$4 sm:$0xff]  }
 0x14e   :  { %1962 = vmatprep.subr.bf16.mxu1 %v4551_v3  ;;  %v4645_v3 = vld [vmem:[#allocation7 + $0xc8] ss:$16 sps:$4 sm:$0xff]  }
 0x14f   :  { %2841 = vmatpush1.bf16.msra.mxu0 %v4678_v5  ;;  %v4651_v5 = vld [vmem:[#allocation7 + $0xe8] ss:$16 sps:$4 sm:$0xff]  }
 0x150   :  { %2842 = vmatprep.subr.bf16.mxu0 %v4686_v10  ;;  %v4665_v10 = vld [vmem:[#allocation7 + $0x12c] ss:$16 sps:$4 sm:$0xff]  }
 0x151   :  { %1963 = vmatpush1.bf16.msra.mxu1 %v4549_v8  ;;  %v4659_v8 = vld [vmem:[#allocation7 + $0x10c] ss:$16 sps:$4 sm:$0xff]  }
 0x152   :  { %1964 = vmatprep.subr.bf16.mxu1 %v4554_v9  ;;  %v4657_v9 = vld [vmem:[#allocation7 + $0x108] ss:$16 sps:$4 sm:$0xff]  }
 0x153   :  { %2843 = vmatpush1.bf16.msra.mxu0 %v4684_v11  ;;  %v4663_v11 = vld [vmem:[#allocation7 + $0x128] ss:$16 sps:$4 sm:$0xff]  }
 0x154   :  { %2844 = vmatprep.subr.bf16.mxu0 %v4692_v29  ;;  %v5241_v29 = vld [vmem:[%s5300_s2] sm:$0xf] }
 0x155   :  { %1965 = vmatpush1.bf16.msra.mxu1 %v4552_v12  ;;  %v4671_v12 = vld [vmem:[#allocation7 + $0x14c] ss:$16 sps:$4 sm:$0xff]  }
 0x156   :  { %1966 = vmatprep.subr.bf16.mxu1 %v4557_v14  ;;  %v4669_v14 = vld [vmem:[#allocation7 + $0x148] ss:$16 sps:$4 sm:$0xff]  }
 0x159   :  { %1967 = vmatpush1.bf16.msra.mxu1 %v4555_v15  ;;  %v4677_v15 = vld [vmem:[#allocation7 + $0x16c] ss:$16 sps:$4 sm:$0xff]  }
 0x15a   :  { %1977 = vmatprep.subr.bf16.mxu1 %v4560_v16  ;;  %v4675_v16 = vld [vmem:[#allocation7 + $0x168] ss:$16 sps:$4 sm:$0xff]  }
 0x15c   :  { %1969 = vmatmul.mubr.bf16.vlgmr.msra.gmra.mrb[4].mxu1 %v5207_v13  ;;  %v4578_v13 = vld [vmem:[#allocation5 + $0x6cc] ss:$16 sps:$4 sm:$0xff]  }
 0x15d   :  { %1978 = vmatpush1.bf16.msra.mxu1 %v4558_v17  ;;  %2009 = vmatprep.mubr.bf16.mxu1 %v5213_v19  ;;  %v4690_v19 = vld [vmem:[#allocation7 + $0x1c0] ss:$16 sps:$4 sm:$0xff]   ;;  %v4683_v17 = vld [vmem:[#allocation7 + $0x18c] ss:$16 sps:$4 sm:$0xff]  }
 0x15e   :  { %1979 = vmatprep.subr.bf16.mxu1 %v4563_v20  ;;  %2845 = vmatpush1.bf16.msra.mxu0 %v4690_v19  ;;  %v4681_v20 = vld [vmem:[#allocation7 + $0x188] ss:$16 sps:$4 sm:$0xff]  }
 0x15f   :  { %2846 = vmatprep.subr.bf16.mxu0 %v4698_v33 }
 0x161   :  { %1980 = vmatpush1.bf16.msra.mxu1 %v4561_v22  ;;  %v4689_v22 = vld [vmem:[#allocation7 + $0x1ac] ss:$16 sps:$4 sm:$0xff]  }
 0x162   :  { %1981 = vmatprep.subr.bf16.mxu1 %v4566_v23  ;;  %2847 = vmatpush1.bf16.msra.mxu0 %v4696_v35  ;;  %v4687_v23 = vld [vmem:[#allocation7 + $0x1a8] ss:$16 sps:$4 sm:$0xff]  }
 0x163   :  { %2857 = vmatprep.subr.bf16.mxu0 %v4704_v38 }
 0x165   :  { %1982 = vmatpush1.bf16.msra.mxu1 %v4564_v24  ;;  %v4695_v24 = vld [vmem:[#allocation7 + $0x1cc] ss:$16 sps:$4 sm:$0xff]  }
 0x166   :  { %1983 = vmatprep.subr.bf16.mxu1 %v4569_v25  ;;  %v4693_v25 = vld [vmem:[#allocation7 + $0x1c8] ss:$16 sps:$4 sm:$0xff]  }
 0x169   :  { %1984 = vmatpush1.bf16.msra.mxu1 %v4567_v26  ;;  %v4701_v26 = vld [vmem:[#allocation7 + $0x1ec] ss:$16 sps:$4 sm:$0xff]  }
 0x16a   :  { %1985 = vmatprep.subr.bf16.mxu1 %v4572_v6  ;;  %v4699_v6 = vld [vmem:[#allocation7 + $0x1e8] ss:$16 sps:$4 sm:$0xff]  }
 0x16d   :  { %1986 = vmatpush1.bf16.msra.mxu1 %v4570_v18  ;;  %v4707_v18 = vld [vmem:[#allocation7 + $0x20c] ss:$16 sps:$4 sm:$0xff]  }
 0x16e   :  { %1987 = vmatprep.subr.bf16.mxu1 %v4575_v27  ;;  %v362_v27 = vlaneseq }
 0x16f   :  { %v5228_v30 = vpop.f32.mrb[0].mxu1 }
 0x170   :  { %v5230_v7 = vpop.f32.mrb[1].mxu1 }
 0x171   :  { %v1728_v31 = vpop.f32.mrb[2].mxu1  ;;  %1988 = vmatpush1.bf16.msra.mxu1 %v4573_v28  ;;  %v5233_v28 = vshrl.u32 %v362_v27, 7  ;;  %v4771_v27 = vld [vmem:[#allocation7 + $0x368] ss:$16 sps:$4 sm:$0xff]  }
 0x172   :  { %v1729_v34 = vpop.f32.mrb[3].mxu1  ;;  %1989 = vmatprep.subr.bf16.mxu1 %v4578_v13 }
 0x173   :  { %v5236_v13 = vsub.s32 0, %v5233_v28  ;;  %v5244_v19 = vsub.s32 1, %v5233_v28 }
 0x175   :  { %1990 = vmatpush1.bf16.msra.mxu1 %v4576_v32  ;;  %v365_v31 = vrot.slane %v5241_v29, %v5236_v13  ;;  %v369_v32 = vrot.slane %v5241_v29, %v5244_v19 }
 0x176   :  { %1991 = vmatprep.subr.bf16.mxu1 %v4581_v51 }
 0x177   :  { %v1725_v34 = vadd.f32 %v5228_v30, %v365_v31  ;;  %v1727_v51 = vadd.f32 %v5230_v7, %v369_v32  ;;  %v4708_v30 = vld [vmem:[#allocation7 + $0x220] ss:$16 sps:$4 sm:$0xff]   ;;  %v4711_v7 = vld [vmem:[#allocation7 + $0x228] ss:$16 sps:$4 sm:$0xff]   ;;  %v4776_v31 = vld [vmem:[#allocation7 + $0x384] ss:$16 sps:$4 sm:$0xff]  }
 0x178   :  { %v4779_v32 = vld [vmem:[#allocation7 + $0x38c] ss:$16 sps:$4 sm:$0xff]  }
 0x179   :  { %1992 = vmatpush1.bf16.msra.mxu1 %v4579_v36 }
 0x17a   :  { %1993 = vmatprep.subr.bf16.mxu1 %v4584_v37 }
 0x17d   :  { %1994 = vmatpush1.bf16.msra.mxu1 %v4582_v39 }
 0x17e   :  { %1995 = vmatprep.subr.bf16.mxu1 %v4587_v40 }
 0x181   :  { %1996 = vmatpush1.bf16.msra.mxu1 %v4585_v41 }
 0x182   :  { %1997 = vmatprep.subr.bf16.mxu1 %v4590_v42 }
 0x185   :  { %1998 = vmatpush1.bf16.msra.mxu1 %v4588_v43  ;;  %v4702_v43 = vld [vmem:[#allocation7 + $0x200] ss:$16 sps:$4 sm:$0xff]  }
 0x186   :  { %1999 = vmatprep.subr.bf16.mxu1 %v4593_v44  ;;  %v4705_v44 = vld [vmem:[#allocation7 + $0x208] ss:$16 sps:$4 sm:$0xff]  }
 0x189   :  { %2000 = vmatpush1.bf16.msra.mxu1 %v4591_v45 }
 0x18a   :  { %2001 = vmatprep.subr.bf16.mxu1 %v4596_v46  ;;  %v4710_v46 = vld [vmem:[#allocation7 + $0x224] ss:$16 sps:$4 sm:$0xff]  }
 0x18d   :  { %2002 = vmatpush1.bf16.msra.mxu1 %v4594_v47  ;;  %v4713_v47 = vld [vmem:[#allocation7 + $0x22c] ss:$16 sps:$4 sm:$0xff]  }
 0x18e   :  { %2003 = vmatprep.subr.bf16.mxu1 %v4599_v48  ;;  %v4716_v48 = vld [vmem:[#allocation7 + $0x244] ss:$16 sps:$4 sm:$0xff]  }
 0x191   :  { %2004 = vmatpush1.bf16.msra.mxu1 %v4597_v49  ;;  %v4719_v49 = vld [vmem:[#allocation7 + $0x24c] ss:$16 sps:$4 sm:$0xff]  }
 0x192   :  { %2005 = vmatprep.subr.bf16.mxu1 %v4602_v50  ;;  %v4714_v50 = vld [vmem:[#allocation7 + $0x240] ss:$16 sps:$4 sm:$0xff]  }
 0x195   :  { %2006 = vmatpush1.bf16.msra.mxu1 %v4600_v52  ;;  %v4717_v52 = vld [vmem:[#allocation7 + $0x248] ss:$16 sps:$4 sm:$0xff]  }
 0x196   :  { %2007 = vmatprep.subr.bf16.mxu1 %v4605_v53  ;;  %v4722_v53 = vld [vmem:[#allocation7 + $0x264] ss:$16 sps:$4 sm:$0xff]  }
 0x199   :  { %2008 = vmatpush1.bf16.msra.mxu1 %v4603_v54  ;;  %v4725_v54 = vld [vmem:[#allocation7 + $0x26c] ss:$16 sps:$4 sm:$0xff]  }
 0x19a   :  { %2898 = vmatprep.subr.bf16.mxu1 %v4611_v55  ;;  %v4720_v55 = vld [vmem:[#allocation7 + $0x260] ss:$16 sps:$4 sm:$0xff]  }
 0x19c   :  { %2010 = vmatmul.mubr.bf16.vlgmr.msra.gmra.mrb[4].mxu1 %v5221_v21  ;;  %v4647_v21 = vld [vmem:[#allocation7 + $0xcc] ss:$16 sps:$4 sm:$0xff]  }
 0x19d   :  { %2899 = vmatpush1.bf16.msra.mxu1 %v4609_v56  ;;  %v4723_v56 = vld [vmem:[#allocation7 + $0x268] ss:$16 sps:$4 sm:$0xff]  }
 0x19e   :  { %2900 = vmatprep.subr.bf16.mxu1 %v4617_v57  ;;  %v4728_v57 = vld [vmem:[#allocation7 + $0x284] ss:$16 sps:$4 sm:$0xff]  }
 0x1a1   :  { %2901 = vmatpush1.bf16.msra.mxu1 %v4615_v58  ;;  %v4731_v58 = vld [vmem:[#allocation7 + $0x28c] ss:$16 sps:$4 sm:$0xff]  }
 0x1a2   :  { %2902 = vmatprep.subr.bf16.mxu1 %v4623_v59  ;;  %v4726_v59 = vld [vmem:[#allocation7 + $0x280] ss:$16 sps:$4 sm:$0xff]  }
 0x1a5   :  { %2903 = vmatpush1.bf16.msra.mxu1 %v4621_v60  ;;  %v4729_v60 = vld [vmem:[#allocation7 + $0x288] ss:$16 sps:$4 sm:$0xff]  }
 0x1a6   :  { %2904 = vmatprep.subr.bf16.mxu1 %v4629_v61  ;;  %v4734_v61 = vld [vmem:[#allocation7 + $0x2a4] ss:$16 sps:$4 sm:$0xff]  }
 0x1a9   :  { %2905 = vmatpush1.bf16.msra.mxu1 %v4627_v62  ;;  %v4737_v62 = vld [vmem:[#allocation7 + $0x2ac] ss:$16 sps:$4 sm:$0xff]  }
 0x1aa   :  { %2906 = vmatprep.subr.bf16.mxu1 %v4635_v63  ;;  %v4732_v63 = vld [vmem:[#allocation7 + $0x2a0] ss:$16 sps:$4 sm:$0xff]  }
 0x1ad   :  { %2907 = vmatpush1.bf16.msra.mxu1 %v4633_v0  ;;  %v4735_v0 = vld [vmem:[#allocation7 + $0x2a8] ss:$16 sps:$4 sm:$0xff]  }
 0x1ae   :  { %2908 = vmatprep.subr.bf16.mxu1 %v4641_v1  ;;  %v4740_v1 = vld [vmem:[#allocation7 + $0x2c4] ss:$16 sps:$4 sm:$0xff]  }
 0x1b1   :  { %2909 = vmatpush1.bf16.msra.mxu1 %v4639_v2  ;;  %v4743_v2 = vld [vmem:[#allocation7 + $0x2cc] ss:$16 sps:$4 sm:$0xff]  }
 0x1b2   :  { %2910 = vmatprep.subr.bf16.mxu1 %v4647_v21  ;;  %v4738_v21 = vld [vmem:[#allocation7 + $0x2c0] ss:$16 sps:$4 sm:$0xff]  }
 0x1b5   :  { %2911 = vmatpush1.bf16.msra.mxu1 %v4645_v3  ;;  %v4741_v3 = vld [vmem:[#allocation7 + $0x2c8] ss:$16 sps:$4 sm:$0xff]  }
 0x1b6   :  { %2912 = vmatprep.subr.bf16.mxu1 %v4653_v4  ;;  %v4746_v4 = vld [vmem:[#allocation7 + $0x2e4] ss:$16 sps:$4 sm:$0xff]  }
 0x1b9   :  { %2913 = vmatpush1.bf16.msra.mxu1 %v4651_v5  ;;  %v4749_v5 = vld [vmem:[#allocation7 + $0x2ec] ss:$16 sps:$4 sm:$0xff]  }
 0x1ba   :  { %2914 = vmatprep.subr.bf16.mxu1 %v4659_v8  ;;  %v4744_v8 = vld [vmem:[#allocation7 + $0x2e0] ss:$16 sps:$4 sm:$0xff]  }
 0x1bd   :  { %2915 = vmatpush1.bf16.msra.mxu1 %v4657_v9  ;;  %v4747_v9 = vld [vmem:[#allocation7 + $0x2e8] ss:$16 sps:$4 sm:$0xff]  }
 0x1be   :  { %2916 = vmatprep.subr.bf16.mxu1 %v4665_v10  ;;  %v4752_v10 = vld [vmem:[#allocation7 + $0x304] ss:$16 sps:$4 sm:$0xff]  }
 0x1c1   :  { %2917 = vmatpush1.bf16.msra.mxu1 %v4663_v11  ;;  %v4755_v11 = vld [vmem:[#allocation7 + $0x30c] ss:$16 sps:$4 sm:$0xff]  }
 0x1c2   :  { %2918 = vmatprep.subr.bf16.mxu1 %v4671_v12  ;;  %v4750_v12 = vld [vmem:[#allocation7 + $0x300] ss:$16 sps:$4 sm:$0xff]  }
 0x1c5   :  { %2919 = vmatpush1.bf16.msra.mxu1 %v4669_v14  ;;  %v4753_v14 = vld [vmem:[#allocation7 + $0x308] ss:$16 sps:$4 sm:$0xff]  }
 0x1c6   :  { %2920 = vmatprep.subr.bf16.mxu1 %v4677_v15  ;;  %v4758_v15 = vld [vmem:[#allocation7 + $0x324] ss:$16 sps:$4 sm:$0xff]  }
 0x1c9   :  { %2921 = vmatpush1.bf16.msra.mxu1 %v4675_v16  ;;  %v4761_v16 = vld [vmem:[#allocation7 + $0x32c] ss:$16 sps:$4 sm:$0xff]  }
 0x1ca   :  { %2922 = vmatprep.subr.bf16.mxu1 %v4683_v17  ;;  %v4756_v17 = vld [vmem:[#allocation7 + $0x320] ss:$16 sps:$4 sm:$0xff]  }
 0x1cd   :  { %2923 = vmatpush1.bf16.msra.mxu1 %v4681_v20  ;;  %v4759_v20 = vld [vmem:[#allocation7 + $0x328] ss:$16 sps:$4 sm:$0xff]  }
 0x1ce   :  { %2924 = vmatprep.subr.bf16.mxu1 %v4689_v22  ;;  %v4764_v22 = vld [vmem:[#allocation7 + $0x344] ss:$16 sps:$4 sm:$0xff]  }
 0x1d1   :  { %2925 = vmatpush1.bf16.msra.mxu1 %v4687_v23  ;;  %v4767_v23 = vld [vmem:[#allocation7 + $0x34c] ss:$16 sps:$4 sm:$0xff]  }
 0x1d2   :  { %2926 = vmatprep.subr.bf16.mxu1 %v4695_v24  ;;  %v4762_v24 = vld [vmem:[#allocation7 + $0x340] ss:$16 sps:$4 sm:$0xff]  }
 0x1d5   :  { %2927 = vmatpush1.bf16.msra.mxu1 %v4693_v25  ;;  %v4765_v25 = vld [vmem:[#allocation7 + $0x348] ss:$16 sps:$4 sm:$0xff]  }
 0x1d6   :  { %2928 = vmatprep.subr.bf16.mxu1 %v4701_v26  ;;  %v4770_v26 = vld [vmem:[#allocation7 + $0x364] ss:$16 sps:$4 sm:$0xff]  }
 0x1d9   :  { %2929 = vmatpush1.bf16.msra.mxu1 %v4699_v6  ;;  %v4773_v6 = vld [vmem:[#allocation7 + $0x36c] ss:$16 sps:$4 sm:$0xff]  }
 0x1da   :  { %2939 = vmatprep.subr.bf16.mxu1 %v4707_v18  ;;  %v4768_v18 = vld [vmem:[#allocation7 + $0x360] ss:$16 sps:$4 sm:$0xff]  }
 0x1f0   :  { %v1847_v33 = vpop.f32.mrb[0].mxu0 }
 0x1f1   :  { %v4159_v35 = vadd.f32 %v1847_v33, %v1725_v34  ;;  %v1849_v36 = vpop.f32.mrb[1].mxu0  ;;  %v4774_v34 = vld [vmem:[#allocation7 + $0x380] ss:$16 sps:$4 sm:$0xff]   ;;  %v4782_v33 = vld [vmem:[#allocation7 + $0x3a4] ss:$16 sps:$4 sm:$0xff]  }
 0x1f2   :  { %v4161_v37 = vadd.f32 %v1849_v36, %v1727_v51  ;;  %v1851_v38 = vpop.f32.mrb[2].mxu0  ;;  %v4777_v51 = vld [vmem:[#allocation7 + $0x388] ss:$16 sps:$4 sm:$0xff]   ;;  %v4780_v36 = vld [vmem:[#allocation7 + $0x3a0] ss:$16 sps:$4 sm:$0xff]  }
 0x1f3   :  { %v2018_v39 = vmax.f32 %v4159_v35, 0.0  ;;  %v1852_v40 = vpop.f32.mrb[3].mxu0  ;;  %v4785_v35 = vld [vmem:[#allocation7 + $0x3ac] ss:$16 sps:$4 sm:$0xff]   ;;  %v4788_v38 = vld [vmem:[#allocation7 + $0x3c4] ss:$16 sps:$4 sm:$0xff]  }
 0x1f4   :  { %v2019_v41 = vmax.f32 %v4161_v37, 0.0  ;;  %v4783_v37 = vld [vmem:[#allocation7 + $0x3a8] ss:$16 sps:$4 sm:$0xff]   ;;  %v4786_v40 = vld [vmem:[#allocation7 + $0x3c0] ss:$16 sps:$4 sm:$0xff]  }
 0x1f5   :  { %v2022_v45 = vpack.c.bf16 %v2018_v39, %v2018_v39  ;;  %v4791_v39 = vld [vmem:[#allocation7 + $0x3cc] ss:$16 sps:$4 sm:$0xff]  }
 0x1f6   :  { %v2023_v42 = vpack.c.bf16 %v2019_v41, %v2019_v41  ;;  %v4789_v41 = vld [vmem:[#allocation7 + $0x3c8] ss:$16 sps:$4 sm:$0xff]  }
 0x1f8   :  { %2848 = vmatprep.mubr.bf16.mxu0 %v2023_v42  ;;  %2930 = vmatprep.mubr.bf16.mxu1 %v2023_v42  ;;  %v4794_v42 = vld [vmem:[#allocation7 + $0x3e4] ss:$16 sps:$4 sm:$0xff]  }
 0x1f9   :  { %2849 = vmatmul.mubr.bf16.vlgmr.msra.gmra.mrb[4].mxu0 %v2022_v45  ;;  %2931 = vmatmul.mubr.bf16.vlgmr.msra.gmra.mrb[8].mxu1 %v2022_v45  ;;  %v4795_v45 = vld [vmem:[#allocation7 + $0x3e8] ss:$16 sps:$4 sm:$0xff]  }
 0x1fa   :  { %2858 = vmatpush1.bf16.msra.mxu0 %v4702_v43  ;;  %2940 = vmatpush1.bf16.msra.mxu1 %v4705_v44  ;;  %v4797_v43 = vld [vmem:[#allocation7 + $0x3ec] ss:$16 sps:$4 sm:$0xff]   ;;  %v4792_v44 = vld [vmem:[#allocation7 + $0x3e0] ss:$16 sps:$4 sm:$0xff]  }
 0x1fb   :  { %2859 = vmatprep.subr.bf16.mxu0 %v4710_v46  ;;  %2941 = vmatprep.subr.bf16.mxu1 %v4713_v47  ;;  %v4800_v46 = vld [vmem:[#allocation8 + $0x4] ss:$8 sps:$4 sm:$0xff]   ;;  %v372_v47 = vsub.s32 2, %v5233_v28 }
 0x1fe   :  { %2860 = vmatpush1.bf16.msra.mxu0 %v4708_v30  ;;  %2942 = vmatpush1.bf16.msra.mxu1 %v4711_v7  ;;  %v376_v30 = vsub.s32 3, %v5233_v28  ;;  %v373_v7 = vrot.slane %v5241_v29, %v372_v47  ;;  %v4908_v28 = vld [vmem:[#allocation10 + $0x78] sm:$0xff]  }
 0x1ff   :  { %2861 = vmatprep.subr.bf16.mxu0 %v4716_v48  ;;  %2943 = vmatprep.subr.bf16.mxu1 %v4719_v49 }
 0x200   :  { %v377_v48 = vrot.slane %v5241_v29, %v376_v30  ;;  %v4806_v29 = vld [vmem:[#allocation8 + $0x24] ss:$8 sps:$4 sm:$0xff]  }
 0x202   :  { %2862 = vmatpush1.bf16.msra.mxu0 %v4714_v50  ;;  %2944 = vmatpush1.bf16.msra.mxu1 %v4717_v52 }
 0x203   :  { %2863 = vmatprep.subr.bf16.mxu0 %v4722_v53  ;;  %2945 = vmatprep.subr.bf16.mxu1 %v4725_v54 }
 0x206   :  { %2864 = vmatpush1.bf16.msra.mxu0 %v4720_v55  ;;  %2946 = vmatpush1.bf16.msra.mxu1 %v4723_v56 }
 0x207   :  { %2865 = vmatprep.subr.bf16.mxu0 %v4728_v57  ;;  %2947 = vmatprep.subr.bf16.mxu1 %v4731_v58 }
 0x20a   :  { %2866 = vmatpush1.bf16.msra.mxu0 %v4726_v59  ;;  %2948 = vmatpush1.bf16.msra.mxu1 %v4729_v60  ;;  %v4798_v59 = vld [vmem:[#allocation8] ss:$8 sps:$4 sm:$0xff]  }
 0x20b   :  { %2867 = vmatprep.subr.bf16.mxu0 %v4734_v61  ;;  %2949 = vmatprep.subr.bf16.mxu1 %v4737_v62  ;;  %v4803_v61 = vld [vmem:[#allocation8 + $0x14] ss:$8 sps:$4 sm:$0xff]   ;;  %v4801_v62 = vld [vmem:[#allocation8 + $0x10] ss:$8 sps:$4 sm:$0xff]  }
 0x20e   :  { %2868 = vmatpush1.bf16.msra.mxu0 %v4732_v63  ;;  %2950 = vmatpush1.bf16.msra.mxu1 %v4735_v0  ;;  %v4804_v63 = vld [vmem:[#allocation8 + $0x20] ss:$8 sps:$4 sm:$0xff]   ;;  %v4809_v0 = vld [vmem:[#allocation8 + $0x34] ss:$8 sps:$4 sm:$0xff]  }
 0x20f   :  { %2869 = vmatprep.subr.bf16.mxu0 %v4740_v1  ;;  %2951 = vmatprep.subr.bf16.mxu1 %v4743_v2  ;;  %v4807_v1 = vld [vmem:[#allocation8 + $0x30] ss:$8 sps:$4 sm:$0xff]   ;;  %v4812_v2 = vld [vmem:[#allocation8 + $0x44] ss:$8 sps:$4 sm:$0xff]  }
 0x212   :  { %2870 = vmatpush1.bf16.msra.mxu0 %v4738_v21  ;;  %2952 = vmatpush1.bf16.msra.mxu1 %v4741_v3  ;;  %v4810_v21 = vld [vmem:[#allocation8 + $0x40] ss:$8 sps:$4 sm:$0xff]   ;;  %v4815_v3 = vld [vmem:[#allocation8 + $0x54] ss:$8 sps:$4 sm:$0xff]  }
 0x213   :  { %2871 = vmatprep.subr.bf16.mxu0 %v4746_v4  ;;  %2953 = vmatprep.subr.bf16.mxu1 %v4749_v5  ;;  %v4813_v4 = vld [vmem:[#allocation8 + $0x50] ss:$8 sps:$4 sm:$0xff]   ;;  %v4818_v5 = vld [vmem:[#allocation8 + $0x64] ss:$8 sps:$4 sm:$0xff]  }
 0x216   :  { %2872 = vmatpush1.bf16.msra.mxu0 %v4744_v8  ;;  %2954 = vmatpush1.bf16.msra.mxu1 %v4747_v9  ;;  %v4816_v8 = vld [vmem:[#allocation8 + $0x60] ss:$8 sps:$4 sm:$0xff]   ;;  %v4821_v9 = vld [vmem:[#allocation8 + $0x74] ss:$8 sps:$4 sm:$0xff]  }
 0x217   :  { %2873 = vmatprep.subr.bf16.mxu0 %v4752_v10  ;;  %2955 = vmatprep.subr.bf16.mxu1 %v4755_v11  ;;  %v4819_v10 = vld [vmem:[#allocation8 + $0x70] ss:$8 sps:$4 sm:$0xff]   ;;  %v4824_v11 = vld [vmem:[#allocation8 + $0x84] ss:$8 sps:$4 sm:$0xff]  }
 0x21a   :  { %2874 = vmatpush1.bf16.msra.mxu0 %v4750_v12  ;;  %2956 = vmatpush1.bf16.msra.mxu1 %v4753_v14  ;;  %v4822_v12 = vld [vmem:[#allocation8 + $0x80] ss:$8 sps:$4 sm:$0xff]   ;;  %v4827_v14 = vld [vmem:[#allocation8 + $0x94] ss:$8 sps:$4 sm:$0xff]  }
 0x21b   :  { %2875 = vmatprep.subr.bf16.mxu0 %v4758_v15  ;;  %2957 = vmatprep.subr.bf16.mxu1 %v4761_v16  ;;  %v4825_v15 = vld [vmem:[#allocation8 + $0x90] ss:$8 sps:$4 sm:$0xff]   ;;  %v4830_v16 = vld [vmem:[#allocation8 + $0xa4] ss:$8 sps:$4 sm:$0xff]  }
 0x21e   :  { %2876 = vmatpush1.bf16.msra.mxu0 %v4756_v17  ;;  %2958 = vmatpush1.bf16.msra.mxu1 %v4759_v20  ;;  %v4828_v17 = vld [vmem:[#allocation8 + $0xa0] ss:$8 sps:$4 sm:$0xff]   ;;  %v4833_v20 = vld [vmem:[#allocation8 + $0xb4] ss:$8 sps:$4 sm:$0xff]  }
 0x21f   :  { %2877 = vmatprep.subr.bf16.mxu0 %v4764_v22  ;;  %2959 = vmatprep.subr.bf16.mxu1 %v4767_v23  ;;  %v4831_v22 = vld [vmem:[#allocation8 + $0xb0] ss:$8 sps:$4 sm:$0xff]   ;;  %v4836_v23 = vld [vmem:[#allocation8 + $0xc4] ss:$8 sps:$4 sm:$0xff]  }
 0x222   :  { %2878 = vmatpush1.bf16.msra.mxu0 %v4762_v24  ;;  %2960 = vmatpush1.bf16.msra.mxu1 %v4765_v25  ;;  %v4834_v24 = vld [vmem:[#allocation8 + $0xc0] ss:$8 sps:$4 sm:$0xff]   ;;  %v4839_v25 = vld [vmem:[#allocation8 + $0xd4] ss:$8 sps:$4 sm:$0xff]  }
 0x223   :  { %2879 = vmatprep.subr.bf16.mxu0 %v4770_v26  ;;  %2961 = vmatprep.subr.bf16.mxu1 %v4773_v6  ;;  %v4837_v26 = vld [vmem:[#allocation8 + $0xd0] ss:$8 sps:$4 sm:$0xff]   ;;  %v4842_v6 = vld [vmem:[#allocation8 + $0xe4] ss:$8 sps:$4 sm:$0xff]  }
 0x226   :  { %2880 = vmatpush1.bf16.msra.mxu0 %v4768_v18  ;;  %2962 = vmatpush1.bf16.msra.mxu1 %v4771_v27  ;;  %v4840_v18 = vld [vmem:[#allocation8 + $0xe0] ss:$8 sps:$4 sm:$0xff]   ;;  %v4845_v27 = vld [vmem:[#allocation8 + $0xf4] ss:$8 sps:$4 sm:$0xff]  }
 0x227   :  { %2881 = vmatprep.subr.bf16.mxu0 %v4776_v31  ;;  %2963 = vmatprep.subr.bf16.mxu1 %v4779_v32  ;;  %v4843_v31 = vld [vmem:[#allocation8 + $0xf0] ss:$8 sps:$4 sm:$0xff]   ;;  %v4848_v32 = vld [vmem:[#allocation8 + $0x104] ss:$8 sps:$4 sm:$0xff]  }
 0x22a   :  { %2882 = vmatpush1.bf16.msra.mxu0 %v4774_v34  ;;  %2964 = vmatpush1.bf16.msra.mxu1 %v4777_v51  ;;  %v4894_v34 = vld [vmem:[#allocation10 + $0x40] sm:$0xff]  }
 0x22b   :  { %2883 = vmatprep.subr.bf16.mxu0 %v4782_v33  ;;  %2965 = vmatprep.subr.bf16.mxu1 %v4785_v35  ;;  %v4895_v51 = vld [vmem:[#allocation10] sm:$0xff]   ;;  %v4896_v33 = vld [vmem:[#allocation10 + $0x48] sm:$0xff]  }
 0x22c   :  { %v4897_v35 = vld [vmem:[#allocation10 + $0x8] sm:$0xff]  }
 0x22e   :  { %2884 = vmatpush1.bf16.msra.mxu0 %v4780_v36  ;;  %2966 = vmatpush1.bf16.msra.mxu1 %v4783_v37  ;;  %v4898_v36 = vld [vmem:[#allocation10 + $0x50] sm:$0xff]  }
 0x22f   :  { %2885 = vmatprep.subr.bf16.mxu0 %v4788_v38  ;;  %2967 = vmatprep.subr.bf16.mxu1 %v4791_v39  ;;  %v4899_v37 = vld [vmem:[#allocation10 + $0x10] sm:$0xff]   ;;  %v4900_v38 = vld [vmem:[#allocation10 + $0x58] sm:$0xff]  }
 0x230   :  { %v4901_v39 = vld [vmem:[#allocation10 + $0x18] sm:$0xff]  }
 0x232   :  { %2886 = vmatpush1.bf16.msra.mxu0 %v4786_v40  ;;  %2968 = vmatpush1.bf16.msra.mxu1 %v4789_v41  ;;  %v4902_v40 = vld [vmem:[#allocation10 + $0x60] sm:$0xff]  }
 0x233   :  { %2887 = vmatprep.subr.bf16.mxu0 %v4794_v42  ;;  %2969 = vmatprep.subr.bf16.mxu1 %v4797_v43  ;;  %v4903_v41 = vld [vmem:[#allocation10 + $0x20] sm:$0xff]   ;;  %v4904_v42 = vld [vmem:[#allocation10 + $0x68] sm:$0xff]  }
 0x234   :  { %v4905_v43 = vld [vmem:[#allocation10 + $0x28] sm:$0xff]  }
 0x236   :  { %2888 = vmatpush1.bf16.msra.mxu0 %v4792_v44  ;;  %2970 = vmatpush1.bf16.msra.mxu1 %v4795_v45  ;;  %v5263_v44 = vld [vmem:[%s5302_s4] sm:$0xf] }
 0x237   :  { %3384 = vmatprep.subr.bf16.mxu0 %v4800_v46  ;;  %4136 = vmatprep.subr.bf16.mxu1 %v4894_v34  ;;  %v2159_v45 = vrot.slane %v5263_v44, %v5236_v13  ;;  %v2163_v46 = vrot.slane %v5263_v44, %v5244_v19  ;;  %v2167_v34 = vrot.slane %v5263_v44, %v372_v47  ;;  %v4909_v47 = vld [vmem:[#allocation10 + $0x38] sm:$0xff]  }
 0x26f   :  { %v2011_v49 = vpop.f32.mrb[4].mxu1 }
 0x270   :  { %v4162_v50 = vadd.f32 %v2011_v49, %v373_v7  ;;  %v2013_v52 = vpop.f32.mrb[5].mxu1  ;;  %v2171_v7 = vrot.slane %v5263_v44, %v376_v30 }
 0x271   :  { %v4163_v53 = vadd.f32 %v2013_v52, %v377_v48  ;;  %v2015_v54 = vpop.f32.mrb[6].mxu1 }
 0x272   :  { %v2020_v55 = vmax.f32 %v4162_v50, 0.0  ;;  %v2016_v56 = vpop.f32.mrb[7].mxu1 }
 0x273   :  { %v2021_v57 = vmax.f32 %v4163_v53, 0.0 }
 0x274   :  { %v2024_v60 = vpack.c.bf16 %v2020_v55, %v2020_v55 }
 0x275   :  { %v2025_v58 = vpack.c.bf16 %v2021_v57, %v2021_v57 }
 0x277   :  { %2889 = vmatprep.mubr.bf16.mxu0 %v2025_v58  ;;  %2971 = vmatprep.mubr.bf16.mxu1 %v2025_v58 }
 0x278   :  { %2890 = vmatmul.mubr.bf16.vlgmr.msra.gmra.mrb[4].mxu0 %v2024_v60  ;;  %2972 = vmatmul.mubr.bf16.vlgmr.msra.gmra.mrb[8].mxu1 %v2024_v60 }
 0x279   :  { %3385 = vmatpush1.bf16.msra.mxu0 %v4798_v59  ;;  %4137 = vmatpush3.bf16.msra.mxu1 %v4895_v51  ;;  %v4890_v51 = vld [vmem:[#allocation8 + $0x1e4] ss:$8 sps:$4 sm:$0xff]  }
 0x27a   :  { %3386 = vmatprep.subr.bf16.mxu0 %v4803_v61  ;;  %4138 = vmatprep.subr.bf16.mxu1 %v4896_v33  ;;  %v4888_v33 = vld [vmem:[#allocation8 + $0x1e0] ss:$8 sps:$4 sm:$0xff]  }
 0x27d   :  { %3387 = vmatpush1.bf16.msra.mxu0 %v4801_v62  ;;  %4139 = vmatpush3.bf16.msra.mxu1 %v4897_v35 }
 0x27e   :  { %3388 = vmatprep.subr.bf16.mxu0 %v4806_v29  ;;  %4140 = vmatprep.subr.bf16.mxu1 %v4898_v36  ;;  %v4893_v36 = vld [vmem:[#allocation8 + $0x1f4] ss:$8 sps:$4 sm:$0xff]  }
 0x281   :  { %3389 = vmatpush1.bf16.msra.mxu0 %v4804_v63  ;;  %4141 = vmatpush3.bf16.msra.mxu1 %v4899_v37  ;;  %v4846_v63 = vld [vmem:[#allocation8 + $0x100] ss:$8 sps:$4 sm:$0xff]   ;;  %v4891_v37 = vld [vmem:[#allocation8 + $0x1f0] ss:$8 sps:$4 sm:$0xff]  }
 0x282   :  { %3390 = vmatprep.subr.bf16.mxu0 %v4809_v0  ;;  %4142 = vmatprep.subr.bf16.mxu1 %v4900_v38 }
 0x285   :  { %3391 = vmatpush1.bf16.msra.mxu0 %v4807_v1  ;;  %4143 = vmatpush3.bf16.msra.mxu1 %v4901_v39  ;;  %v4851_v1 = vld [vmem:[#allocation8 + $0x114] ss:$8 sps:$4 sm:$0xff]  }
 0x286   :  { %3392 = vmatprep.subr.bf16.mxu0 %v4812_v2  ;;  %4144 = vmatprep.subr.bf16.mxu1 %v4902_v40  ;;  %v4849_v2 = vld [vmem:[#allocation8 + $0x110] ss:$8 sps:$4 sm:$0xff]  }
 0x287   :  { %v4906_v40 = vld [vmem:[#allocation10 + $0x70] sm:$0xff]  }
 0x289   :  { %3393 = vmatpush1.bf16.msra.mxu0 %v4810_v21  ;;  %4145 = vmatpush3.bf16.msra.mxu1 %v4903_v41  ;;  %v4854_v21 = vld [vmem:[#allocation8 + $0x124] ss:$8 sps:$4 sm:$0xff]   ;;  %v4907_v41 = vld [vmem:[#allocation10 + $0x30] sm:$0xff]  }
 0x28a   :  { %3394 = vmatprep.subr.bf16.mxu0 %v4815_v3  ;;  %4146 = vmatprep.subr.bf16.mxu1 %v4904_v42  ;;  %v4852_v3 = vld [vmem:[#allocation8 + $0x120] ss:$8 sps:$4 sm:$0xff]  }
 0x28b   :  { %v3052_v42 = vld [vmem:[%s5304_s6] sm:$0x3]  ;;  %s5061_s6 = smov [#allocation11]  }
 0x28c   :  { %v3061_v44 = vrot.slane %v3052_v42, %v5244_v19  ;;  %s3652_s10 = sshll.u32 %s5061_s6, 4  ;;  %s3653_s10 = int_to_ptr.vmem [resolvable:$true] %s3652_s10 }
 0x28d   :  { %3395 = vmatpush1.bf16.msra.mxu0 %v4813_v4  ;;  %4147 = vmatpush3.bf16.msra.mxu1 %v4905_v43  ;;  %v4857_v4 = vld [vmem:[#allocation8 + $0x134] ss:$8 sps:$4 sm:$0xff]   ;;  %v3057_v43 = vrot.slane %v3052_v42, %v5236_v13  ;;  %s5020_s13 = scalar_lea.vmem %s3653_s10, 128  ;;  %p5025_p13 = scmp.lt.s32.totalorder %s3653_s10, %s3653_s10 }
 0x28e   :  { %3396 = vmatprep.subr.bf16.mxu0 %v4818_v5  ;;  %v4855_v5 = vld [vmem:[#allocation8 + $0x130] ss:$8 sps:$4 sm:$0xff]   ;;  %4148 = vmatprep.subr.bf16.mxu1 %v4906_v40  ;;  %p5021_p12 = scmp.ne.s32.totalorder %s3653_s10, %s5020_s13  ;;  %p5026_p0 = scmp.lt.s32.totalorder %s5020_s13, %s5020_s13 }
 0x290   :  { %p5027_p1 = por %p5026_p0, %p5025_p13 }
 0x291   :  { %3397 = vmatpush1.bf16.msra.mxu0 %v4816_v8  ;;  %v4860_v8 = vld [vmem:[#allocation8 + $0x144] ss:$8 sps:$4 sm:$0xff]   ;;  %4149 = vmatpush3.bf16.msra.mxu1 %v4907_v41 }
 0x292   :  { %3398 = vmatprep.subr.bf16.mxu0 %v4821_v9  ;;  %v4858_v9 = vld [vmem:[#allocation8 + $0x140] ss:$8 sps:$4 sm:$0xff]   ;;  %4150 = vmatprep.subr.bf16.mxu1 %v4908_v28  ;;  %p5028_p2 = pnand %p5027_p1, %p5021_p12 }
 0x295   :  { %3399 = vmatpush1.bf16.msra.mxu0 %v4819_v10  ;;  %v4863_v10 = vld [vmem:[#allocation8 + $0x154] ss:$8 sps:$4 sm:$0xff]   ;;  %4151 = vmatpush3.bf16.msra.mxu1 %v4909_v47 }
 0x296   :  { %3400 = vmatprep.subr.bf16.mxu0 %v4824_v11  ;;  %v4861_v11 = vld [vmem:[#allocation8 + $0x150] ss:$8 sps:$4 sm:$0xff]  }
 0x299   :  { %3401 = vmatpush1.bf16.msra.mxu0 %v4822_v12  ;;  %v4866_v12 = vld [vmem:[#allocation8 + $0x164] ss:$8 sps:$4 sm:$0xff]  }
 0x29a   :  { %3402 = vmatprep.subr.bf16.mxu0 %v4827_v14  ;;  %v4864_v14 = vld [vmem:[#allocation8 + $0x160] ss:$8 sps:$4 sm:$0xff]  }
 0x29d   :  { %3403 = vmatpush1.bf16.msra.mxu0 %v4825_v15  ;;  %v4869_v15 = vld [vmem:[#allocation8 + $0x174] ss:$8 sps:$4 sm:$0xff]  }
 0x29e   :  { %3404 = vmatprep.subr.bf16.mxu0 %v4830_v16  ;;  %v4867_v16 = vld [vmem:[#allocation8 + $0x170] ss:$8 sps:$4 sm:$0xff]  }
 0x2a1   :  { %3405 = vmatpush1.bf16.msra.mxu0 %v4828_v17  ;;  %v4872_v17 = vld [vmem:[#allocation8 + $0x184] ss:$8 sps:$4 sm:$0xff]  }
 0x2a2   :  { %3406 = vmatprep.subr.bf16.mxu0 %v4833_v20  ;;  %v4870_v20 = vld [vmem:[#allocation8 + $0x180] ss:$8 sps:$4 sm:$0xff]  }
 0x2a5   :  { %3407 = vmatpush1.bf16.msra.mxu0 %v4831_v22  ;;  %v4875_v22 = vld [vmem:[#allocation8 + $0x194] ss:$8 sps:$4 sm:$0xff]  }
 0x2a6   :  { %3408 = vmatprep.subr.bf16.mxu0 %v4836_v23  ;;  %v4873_v23 = vld [vmem:[#allocation8 + $0x190] ss:$8 sps:$4 sm:$0xff]  }
 0x2a9   :  { %3409 = vmatpush1.bf16.msra.mxu0 %v4834_v24  ;;  %v4878_v24 = vld [vmem:[#allocation8 + $0x1a4] ss:$8 sps:$4 sm:$0xff]  }
 0x2aa   :  { %3410 = vmatprep.subr.bf16.mxu0 %v4839_v25  ;;  %v4876_v25 = vld [vmem:[#allocation8 + $0x1a0] ss:$8 sps:$4 sm:$0xff]  }
 0x2ad   :  { %3411 = vmatpush1.bf16.msra.mxu0 %v4837_v26  ;;  %v4881_v26 = vld [vmem:[#allocation8 + $0x1b4] ss:$8 sps:$4 sm:$0xff]  }
 0x2ae   :  { %3412 = vmatprep.subr.bf16.mxu0 %v4842_v6  ;;  %v4879_v6 = vld [vmem:[#allocation8 + $0x1b0] ss:$8 sps:$4 sm:$0xff]  }
 0x2b1   :  { %3413 = vmatpush1.bf16.msra.mxu0 %v4840_v18  ;;  %v4884_v18 = vld [vmem:[#allocation8 + $0x1c4] ss:$8 sps:$4 sm:$0xff]  }
 0x2b2   :  { %3414 = vmatprep.subr.bf16.mxu0 %v4845_v27  ;;  %v4882_v27 = vld [vmem:[#allocation8 + $0x1c0] ss:$8 sps:$4 sm:$0xff]  }
 0x2b5   :  { %3415 = vmatpush1.bf16.msra.mxu0 %v4843_v31  ;;  %v4887_v31 = vld [vmem:[#allocation8 + $0x1d4] ss:$8 sps:$4 sm:$0xff]  }
 0x2b6   :  { %3425 = vmatprep.subr.bf16.mxu0 %v4848_v32  ;;  %v4885_v32 = vld [vmem:[#allocation8 + $0x1d0] ss:$8 sps:$4 sm:$0xff]  }
 0x34b   :  { %v2891_v48 = vpop.f32.mrb[4].mxu0  ;;  %v5272_v49 = vpop.f32.mrb[8].mxu1 }
 0x34c   :  { %v4164_v50 = vadd.f32 %v2891_v48, %v2159_v45  ;;  %v2893_v52 = vpop.f32.mrb[5].mxu0  ;;  %v2975_v53 = vpop.f32.mrb[9].mxu1  ;;  %v4166_v35 = vadd.f32 %v5272_v49, %v2167_v34 }
 0x34d   :  { %v4165_v54 = vadd.f32 %v2893_v52, %v2163_v46  ;;  %v4167_v55 = vadd.f32 %v2975_v53, %v2171_v7  ;;  %v2895_v56 = vpop.f32.mrb[6].mxu0  ;;  %v2977_v57 = vpop.f32.mrb[10].mxu1 }
 0x34e   :  { %v2980_v58 = vmax.f32 %v4164_v50, 0.0  ;;  %v2896_v59 = vpop.f32.mrb[7].mxu0  ;;  %v2978_v60 = vpop.f32.mrb[11].mxu1  ;;  %v2982_v38 = vmax.f32 %v4166_v35, 0.0  ;;  %v4119_v57 = vld [vmem:[%s5306_s8] ss:$0 sm:$0xff] }
 0x34f   :  { %v2981_v61 = vmax.f32 %v4165_v54, 0.0  ;;  %v2983_v62 = vmax.f32 %v4167_v55, 0.0 }
 0x350   :  { %v2984_v0 = vpack.c.bf16 %v2980_v58, %v2980_v58  ;;  %v2986_v39 = vpack.c.bf16 %v2982_v38, %v2982_v38 }
 0x351   :  { %v2985_v29 = vpack.c.bf16 %v2981_v61, %v2981_v61  ;;  %v2987_v30 = vpack.c.bf16 %v2983_v62, %v2983_v62 }
 0x353   :  { %3416 = vmatprep.mubr.bf16.mxu0 %v2985_v29 }
 0x354   :  { %3417 = vmatmul.mubr.bf16.vlgmr.msra.gmra.mrb[8].mxu0 %v2984_v0 }
 0x355   :  { %3426 = vmatpush1.bf16.msra.mxu0 %v4846_v63  ;;  %3457 = vmatprep.mubr.bf16.mxu0 %v2987_v30 }
 0x356   :  { %3427 = vmatprep.subr.bf16.mxu0 %v4851_v1 }
 0x359   :  { %3428 = vmatpush1.bf16.msra.mxu0 %v4849_v2 }
 0x35a   :  { %3429 = vmatprep.subr.bf16.mxu0 %v4854_v21 }
 0x35d   :  { %3430 = vmatpush1.bf16.msra.mxu0 %v4852_v3 }
 0x35e   :  { %3431 = vmatprep.subr.bf16.mxu0 %v4857_v4 }
 0x361   :  { %3432 = vmatpush1.bf16.msra.mxu0 %v4855_v5 }
 0x362   :  { %3433 = vmatprep.subr.bf16.mxu0 %v4860_v8 }
 0x365   :  { %3434 = vmatpush1.bf16.msra.mxu0 %v4858_v9 }
 0x366   :  { %3435 = vmatprep.subr.bf16.mxu0 %v4863_v10 }
 0x369   :  { %3436 = vmatpush1.bf16.msra.mxu0 %v4861_v11 }
 0x36a   :  { %3437 = vmatprep.subr.bf16.mxu0 %v4866_v12 }
 0x36d   :  { %3438 = vmatpush1.bf16.msra.mxu0 %v4864_v14 }
 0x36e   :  { %3439 = vmatprep.subr.bf16.mxu0 %v4869_v15 }
 0x371   :  { %3440 = vmatpush1.bf16.msra.mxu0 %v4867_v16 }
 0x372   :  { %3441 = vmatprep.subr.bf16.mxu0 %v4872_v17 }
 0x375   :  { %3442 = vmatpush1.bf16.msra.mxu0 %v4870_v20 }
 0x376   :  { %3443 = vmatprep.subr.bf16.mxu0 %v4875_v22 }
 0x379   :  { %3444 = vmatpush1.bf16.msra.mxu0 %v4873_v23 }
 0x37a   :  { %3445 = vmatprep.subr.bf16.mxu0 %v4878_v24 }
 0x37d   :  { %3446 = vmatpush1.bf16.msra.mxu0 %v4876_v25 }
 0x37e   :  { %3447 = vmatprep.subr.bf16.mxu0 %v4881_v26 }
 0x381   :  { %3448 = vmatpush1.bf16.msra.mxu0 %v4879_v6 }
 0x382   :  { %3449 = vmatprep.subr.bf16.mxu0 %v4884_v18 }
 0x385   :  { %3450 = vmatpush1.bf16.msra.mxu0 %v4882_v27 }
 0x386   :  { %3451 = vmatprep.subr.bf16.mxu0 %v4887_v31 }
 0x389   :  { %3452 = vmatpush1.bf16.msra.mxu0 %v4885_v32 }
 0x38a   :  { %3453 = vmatprep.subr.bf16.mxu0 %v4890_v51 }
 0x38d   :  { %3454 = vmatpush1.bf16.msra.mxu0 %v4888_v33 }
 0x38e   :  { %3455 = vmatprep.subr.bf16.mxu0 %v4893_v36 }
 0x391   :  { %3456 = vmatpush1.bf16.msra.mxu0 %v4891_v37 }
 0x394   :  { %3458 = vmatmul.mubr.bf16.vlgmr.msra.gmra.mrb[8].mxu0 %v2986_v39 }
 0x467   :  { %v3459_v45 = vpop.f32.mrb[8].mxu0 }
 0x468   :  { %v4168_v46 = vadd.f32 %v3459_v45, %v3057_v43  ;;  %v3461_v7 = vpop.f32.mrb[9].mxu0 }
 0x469   :  { %v4169_v48 = vadd.f32 %v3461_v7, %v3061_v44  ;;  %v3463_v49 = vpop.f32.mrb[10].mxu0 }
 0x46a   :  { %v3466_v50 = vmax.f32 %v4168_v46, 0.0  ;;  %v3464_v52 = vpop.f32.mrb[11].mxu0 }
 0x46b   :  { %v3467_v53 = vmax.f32 %v4169_v48, 0.0 }
 0x46c   :  { %v3468_v55 = vpack.c.bf16 %v3466_v50, %v3466_v50 }
 0x46d   :  { %v3469_v54 = vpack.c.bf16 %v3467_v53, %v3467_v53 }
 0x46f   :  { %3637 = vmatprep.mubr.bf16.mxu1 %v3469_v54 }
 0x470   :  { %3638 = vmatmul.mubr.bf16.vlgmr.msra.gmra.mrb[12].mxu1 %v3468_v55 }
 0x543   :  { %v4152_v56 = vpop.f32.mrb[12].mxu1 }
 0x544   :  { %v4153_v13 = vpop.f32.mrb[13].mxu1 }
 0x545   :  { %v4154_v19 = vadd.f32 %v4153_v13, %v4152_v56  ;;  %v4155_v58 = vpop.f32.mrb[14].mxu1 }
 0x546   :  { %v4156_v59 = vpop.f32.mrb[15].mxu1 }
 0x547   :  { %v3640_v60 = vadd.f32 %v4154_v19, %v4119_v57 }
 0x549   :  { %3645 = vst [vmem:[#allocation11] sm:$0xff] %v3640_v60 }
 0x54a   :  { %5031 = shalt.err (!%p5028_p2)
}
 0x54b   :  { %s5032_s8 = scalar_lea.hbm %s5307_s9, 128 }
 0x54c   :  { %p5033_p3 = scmp.ne.s32.totalorder %s5307_s9, %s5032_s8  ;;  %p5036_p4 = scmp.lt.u32.totalorder %s5032_s8, %s5307_s9 }
 0x54e   :  { %p5038_p5 = pnand %p5036_p4, %p5033_p3 }
 0x550   :  { %5041 = shalt.err (!%p5038_p5)
}
 0x551   :  { %3655 = dma.vmem_to_hbm [thread:$0]  %s3653_s10, 128, %s5307_s9, [#allocation4]  }
 0x552   :  { %5048 = dma.done.wait [#allocation4], 128  }
 0x553   :  { %5049 = vsyncadd [#allocation4], 4294967168 }
 0x554   :  { %3659 = vsyncpa [#allocation3], 1 }
 0x555   :  { %3660 = vsyncpa [#allocation6], 1 }
 0x556   :  { %3661 = vsyncpa [#allocation9], 1 }
 0x557   :  { %3662 = vsyncpa [#allocation4], 1 }

</bundles_post_ra>
